<compile_context>
chip_gen: v6e
topology: v6e:2x2x1
jax: 0.10.0
libtpu: 0.0.40
codegen_flags: <defaults>
</compile_context>

<pallas_src>
import numpy as np

import jax
import jax.numpy as jnp
from jax import lax
from jax.experimental import pallas as pl
from jax.experimental.pallas import tpu as pltpu

_PREC = lax.Precision.HIGHEST  # accurate f32 MXU path; exact parity with reference


def _dot(a, b):
    return jnp.dot(a, b, precision=_PREC, preferred_element_type=jnp.float32)


# --------------------------------------------------------------------------
# Fused kernel: operates on one sample's (channels, D*H*W) lane-dense tile.
# --------------------------------------------------------------------------
def _make_fused_kernel(sp_shifts, sp_trivial, tp_shifts, tp_trivial, c1, L):
    def kernel(skip_ref, x_ref, spm_ref, tpm_ref,
               whs_ref, whx_ref, bh_ref,
               wsp_ref, bsp_ref,
               wat_ref, bat_ref, wbt_ref, bbt_ref,
               wr1_ref, wr2_ref, br_ref,
               wu1_ref, wu2_ref, bu_ref,
               o_ref):
        skip = skip_ref[...]                      # (Ci, L)
        x = x_ref[...]                            # (Ci, L)
        spm = spm_ref[...]                        # (9, L)  spatial tap validity
        tpm = tpm_ref[...]                        # (3, L)  temporal tap validity

        def roll_cols(v, s):
            # out[:, p] == v[:, p + s]; wrap-around lanes are always masked taps
            return v if s == 0 else pltpu.roll(v, (-s) % L, axis=1)

        # -- head: fea = cat(relu(bn(conv_skip(skip))), relu(bn(conv_in(x)))) --
        fea = jnp.maximum(
            _dot(whs_ref[...], skip) + _dot(whx_ref[...], x) + bh_ref[...], 0.0)   # (c1, L)

        # -- (1,3,3) spatial conv for branches A and B (shared input fea) --
        acc = jnp.zeros((2 * c1, L), jnp.float32)
        for t, s in enumerate(sp_shifts):
            xs = roll_cols(fea, s)
            if not sp_trivial[t]:
                xs = xs * spm[t:t + 1, :]         # mask the (c1, L) input (fewer rows)
            acc = acc + _dot(wsp_ref[t], xs)
        sab = jnp.maximum(acc + bsp_ref[...], 0.0)                                   # (2c1, L) = [a; b1]

        # -- (3,1,1) temporal convs: stream A reads `a` (rows 0:c1 of sab via
        #    zero right-half weight cols), stream B reads fea --
        acc_a = jnp.zeros((c1, L), jnp.float32)
        acc_b = jnp.zeros((c1, L), jnp.float32)
        for t, s in enumerate(tp_shifts):
            ya = _dot(wat_ref[t], roll_cols(sab, s))     # mask commutes with the dot:
            yb_in = roll_cols(fea, s)                    # mask output for A (c1 < 2c1 rows)
            if not tp_trivial[t]:
                m = tpm[t:t + 1, :]
                ya = ya * m
                yb_in = yb_in * m
            acc_a = acc_a + ya
            acc_b = acc_b + _dot(wbt_ref[t], yb_in)
        out_a = jnp.maximum(acc_a + bat_ref[...], 0.0)                               # (c1, L)
        b2 = jnp.maximum(acc_b + bbt_ref[...], 0.0)                                  # (c1, L)

        # -- tail: out_b = relu(conv_redu(cat(b1,b2))); res = relu(conv_up(cat(out_a,out_b))) --
        out_b = jnp.maximum(_dot(wr1_ref[...], sab) + _dot(wr2_ref[...], b2)
                            + br_ref[...], 0.0)                                      # (c1, L)
        res = jnp.maximum(_dot(wu1_ref[...], out_a) + _dot(wu2_ref[...], out_b)
                          + bu_ref[...], 0.0)                                        # (Co, L)
        o_ref[...] = res

    return kernel


# --------------------------------------------------------------------------
# BlockSpec helpers / VMEM budget
# --------------------------------------------------------------------------
def _sample_spec(rows, cols):
    # (N, rows, cols) array, one sample per grid step, batch dim squeezed.
    return pl.BlockSpec((None, rows, cols), lambda n: (n, 0, 0))


def _const_spec(arr):
    nd = arr.ndim
    return pl.BlockSpec(arr.shape, lambda n, _nd=nd: (0,) * _nd)


def _vmem_limit_bytes(Ci, c1, Co, L):
    # double-buffered HBM<->VMEM activation blocks + masks + held intermediates
    act = 2 * (2 * Ci + Co + 12) * L * 4
    mids = (14 * c1 + Co) * L * 4
    est = act + mids + (2 << 20)
    return int(min(100 * 2**20, max(32 * 2**20, 2 * est)))


# --------------------------------------------------------------------------
# Parameters (PyTorch conv layout (Cout, Cin, kD, kH, kW), BN in eval form)
# --------------------------------------------------------------------------
def _bn_params(key, c):
    k1, k2, k3, k4 = jax.random.split(key, 4)
    gamma = 1.0 + 0.1 * jax.random.normal(k1, (c,), jnp.float32)
    beta = 0.1 * jax.random.normal(k2, (c,), jnp.float32)
    mean = 0.1 * jax.random.normal(k3, (c,), jnp.float32)
    var = 1.0 + 0.1 * jnp.abs(jax.random.normal(k4, (c,), jnp.float32))
    eps = 1e-5
    scale = gamma / jnp.sqrt(var + eps)
    bias = beta - mean * scale
    return scale, bias


def _conv_w(key, cout, cin, kd, kh, kw):
    return 0.1 * jax.random.normal(key, (cout, cin, kd, kh, kw), jnp.float32)


def make_params(in_planes, out_planes, seed=0):
    cd = in_planes // 16
    c1 = 2 * cd
    keys = jax.random.split(jax.random.PRNGKey(seed), 16)
    p = {}
    p["w_skip"], p["bn_skip"] = _conv_w(keys[0], cd, in_planes, 1, 1, 1), _bn_params(keys[1], cd)
    p["w_in"], p["bn_in"] = _conv_w(keys[2], cd, in_planes, 1, 1, 1), _bn_params(keys[3], cd)
    p["w_a_s"], p["bn_a_s"] = _conv_w(keys[4], c1, c1, 1, 3, 3), _bn_params(keys[5], c1)
    p["w_a_t"], p["bn_a_t"] = _conv_w(keys[6], c1, c1, 3, 1, 1), _bn_params(keys[7], c1)
    p["w_b_s"], p["bn_b_s"] = _conv_w(keys[8], c1, c1, 1, 3, 3), _bn_params(keys[9], c1)
    p["w_b_t"], p["bn_b_t"] = _conv_w(keys[10], c1, c1, 3, 1, 1), _bn_params(keys[11], c1)
    p["w_redu"], p["bn_redu"] = _conv_w(keys[12], c1, 2 * c1, 1, 1, 1), _bn_params(keys[13], c1)
    p["w_up"], p["bn_up"] = _conv_w(keys[14], out_planes, 2 * c1, 1, 1, 1), _bn_params(keys[15], out_planes)
    # NOTE: conv_cha_down / bn_cha_down exist in __init__ but are unused in forward.
    return p


# --------------------------------------------------------------------------
# Pallas forward (mirrors SkipConnection.forward, both upsample flags False)
# --------------------------------------------------------------------------
def skip_connection_forward(skip_ncdhw, x_ncdhw, params):
    N, Ci, D, H, W = skip_ncdhw.shape
    HW = H * W
    DHW = D * HW
    cd = params["w_skip"].shape[0]
    c1 = 2 * cd
    Co = params["w_up"].shape[0]

    def fold(w, bn):  # fold BN scale into conv weight output rows
        scale, bias = bn
        return w * scale[:, None, None, None, None], bias

    w_skip, b_skip = fold(params["w_skip"], params["bn_skip"])
    w_in, b_in = fold(params["w_in"], params["bn_in"])
    w_a_s, b_a_s = fold(params["w_a_s"], params["bn_a_s"])
    w_a_t, b_a_t = fold(params["w_a_t"], params["bn_a_t"])
    w_b_s, b_b_s = fold(params["w_b_s"], params["bn_b_s"])
    w_b_t, b_b_t = fold(params["w_b_t"], params["bn_b_t"])
    w_redu, b_redu = fold(params["w_redu"], params["bn_redu"])
    w_up, b_up = fold(params["w_up"], params["bn_up"])

    # ----- tiny host-side weight packing -----
    zeros_cd = jnp.zeros((cd, Ci), jnp.float32)
    whs = jnp.concatenate([w_skip[:, :, 0, 0, 0], zeros_cd], axis=0)            # (c1, Ci)
    whx = jnp.concatenate([zeros_cd, w_in[:, :, 0, 0, 0]], axis=0)              # (c1, Ci)
    bh = jnp.concatenate([b_skip, b_in])[:, None]                               # (c1, 1)

    sp_offsets = [(dh, dw) for dh in (-1, 0, 1) for dw in (-1, 0, 1)]
    sp_shifts = tuple(dh * W + dw for dh, dw in sp_offsets)
    sp_trivial = tuple(dh == 0 and dw == 0 for dh, dw in sp_offsets)
    wsp = jnp.stack(
        [jnp.concatenate([w_a_s[:, :, 0, dh + 1, dw + 1],
                          w_b_s[:, :, 0, dh + 1, dw + 1]], axis=0)
         for dh, dw in sp_offsets], axis=0)                                     # (9, 2c1, c1)
    bsp = jnp.concatenate([b_a_s, b_b_s])[:, None]                              # (2c1, 1)

    tp_offsets = (-1, 0, 1)
    tp_shifts = tuple(dd * HW for dd in tp_offsets)
    tp_trivial = tuple(dd == 0 for dd in tp_offsets)
    zeros_c1 = jnp.zeros((c1, c1), jnp.float32)
    wat = jnp.stack([jnp.concatenate([w_a_t[:, :, dd + 1, 0, 0], zeros_c1], axis=1)
                     for dd in tp_offsets], axis=0)                             # (3, c1, 2c1)
    wbt = jnp.stack([w_b_t[:, :, dd + 1, 0, 0] for dd in tp_offsets], axis=0)   # (3, c1, c1)
    bat = b_a_t[:, None]
    bbt = b_b_t[:, None]

    wr1 = jnp.concatenate([jnp.zeros((c1, c1), jnp.float32),
                           w_redu[:, :c1, 0, 0, 0]], axis=1)                    # (c1, 2c1): picks b1 from sab
    wr2 = w_redu[:, c1:, 0, 0, 0]                                               # (c1, c1)
    br = b_redu[:, None]
    wu1 = w_up[:, :c1, 0, 0, 0]                                                 # (Co, c1)
    wu2 = w_up[:, c1:, 0, 0, 0]                                                 # (Co, c1)
    bu = b_up[:, None]

    # ----- per-sample tap validity masks (static, tiny) -----
    pos = np.arange(DHW)
    w_i = pos % W
    h_i = (pos // W) % H
    d_i = pos // HW
    sp_mask = jnp.asarray(np.stack(
        [((h_i + dh >= 0) & (h_i + dh < H) & (w_i + dw >= 0) & (w_i + dw < W))
         for dh, dw in sp_offsets]).astype(np.float32))                         # (9, DHW)
    tp_mask = jnp.asarray(np.stack(
        [((d_i + dd >= 0) & (d_i + dd < D)) for dd in tp_offsets]
    ).astype(np.float32))                                                       # (3, DHW)

    # ----- layout: NCDHW -> (N, C, D*H*W), a free contiguous reshape -----
    skip3 = skip_ncdhw.reshape(N, Ci, DHW)
    x3 = x_ncdhw.reshape(N, Ci, DHW)

    consts = (sp_mask, tp_mask, whs, whx, bh, wsp, bsp, wat, bat, wbt, bbt,
              wr1, wr2, br, wu1, wu2, bu)

    res3 = pl.pallas_call(
        _make_fused_kernel(sp_shifts, sp_trivial, tp_shifts, tp_trivial, c1, DHW),
        out_shape=jax.ShapeDtypeStruct((N, Co, DHW), jnp.float32),
        grid=(N,),
        in_specs=[_sample_spec(Ci, DHW), _sample_spec(Ci, DHW)]
                 + [_const_spec(c) for c in consts],
        out_specs=_sample_spec(Co, DHW),
        compiler_params=pltpu.CompilerParams(
            dimension_semantics=("parallel",),
            vmem_limit_bytes=_vmem_limit_bytes(Ci, c1, Co, DHW)),
    )(skip3, x3, *consts)

    return res3.reshape(N, Co, D, H, W)


# --------------------------------------------------------------------------
# Pure-JAX reference (faithful transcription of the PyTorch module, eval mode)
# --------------------------------------------------------------------------
def _cbr_ref(x, w, scale, bias, padding):
    y = lax.conv_general_dilated(
        x, w, window_strides=(1, 1, 1), padding=padding,
        dimension_numbers=("NCDHW", "OIDHW", "NCDHW"), precision=_PREC)
    y = y * scale[None, :, None, None, None] + bias[None, :, None, None, None]
    return jnp.maximum(y, 0.0)


def skip_connection_reference(skip, x, p):
    pw = [(0, 0)] * 3
    ps = [(0, 0), (1, 1), (1, 1)]
    pt = [(1, 1), (0, 0), (0, 0)]
    fea_skip = _cbr_ref(skip, p["w_skip"], *p["bn_skip"], pw)
    fea_x = _cbr_ref(x, p["w_in"], *p["bn_in"], pw)
    fea = jnp.concatenate([fea_skip, fea_x], axis=1)
    a = _cbr_ref(fea, p["w_a_s"], *p["bn_a_s"], ps)
    out_a = _cbr_ref(a, p["w_a_t"], *p["bn_a_t"], pt)
    b1 = _cbr_ref(fea, p["w_b_s"], *p["bn_b_s"], ps)
    b2 = _cbr_ref(fea, p["w_b_t"], *p["bn_b_t"], pt)
    b = jnp.concatenate([b1, b2], axis=1)
    out_b = _cbr_ref(b, p["w_redu"], *p["bn_redu"], pw)
    out = jnp.concatenate([out_a, out_b], axis=1)
    res = _cbr_ref(out, p["w_up"], *p["bn_up"], pw)
    return res


if __name__ == "__main__":
    # Small shapes consistent with the module: in_planes divisible by 16.
    N, in_planes, out_planes, D, H, W = 2, 32, 16, 4, 8, 8

    key = jax.random.PRNGKey(0)
    k_skip, k_x = jax.random.split(key)
    skip = jax.random.normal(k_skip, (N, in_planes, D, H, W), jnp.float32)
    x = jax.random.normal(k_x, (N, in_planes, D, H, W), jnp.float32)

    params = make_params(in_planes, out_planes, seed=0)

    fwd = jax.jit(skip_connection_forward)
    out = jax.block_until_ready(fwd(skip, x, params))

    ref = jax.block_until_ready(jax.jit(skip_connection_reference)(skip, x, params))

    assert out.shape == (N, out_planes, D, H, W), out.shape
    max_err = float(jnp.max(jnp.abs(out - ref)))
    assert jnp.allclose(out, ref, atol=1e-3, rtol=1e-3), f"mismatch vs reference: {max_err}"

    print("KERNEL_OK")
</pallas_src>

<mosaic_0001>
module attributes {stable_mosaic.version = 11 : i64} {
  func.func @kernel(%arg0: i32, %arg1: memref<1x32x256xf32, #tpu.memory_space<vmem>>, %arg2: memref<1x32x256xf32, #tpu.memory_space<vmem>>, %arg3: memref<9x256xf32, #tpu.memory_space<vmem>>, %arg4: memref<3x256xf32, #tpu.memory_space<vmem>>, %arg5: memref<4x32xf32, #tpu.memory_space<vmem>>, %arg6: memref<4x32xf32, #tpu.memory_space<vmem>>, %arg7: memref<4x1xf32, #tpu.memory_space<vmem>>, %arg8: memref<9x8x4xf32, #tpu.memory_space<vmem>>, %arg9: memref<8x1xf32, #tpu.memory_space<vmem>>, %arg10: memref<3x4x8xf32, #tpu.memory_space<vmem>>, %arg11: memref<4x1xf32, #tpu.memory_space<vmem>>, %arg12: memref<3x4x4xf32, #tpu.memory_space<vmem>>, %arg13: memref<4x1xf32, #tpu.memory_space<vmem>>, %arg14: memref<4x8xf32, #tpu.memory_space<vmem>>, %arg15: memref<4x4xf32, #tpu.memory_space<vmem>>, %arg16: memref<4x1xf32, #tpu.memory_space<vmem>>, %arg17: memref<16x4xf32, #tpu.memory_space<vmem>>, %arg18: memref<16x4xf32, #tpu.memory_space<vmem>>, %arg19: memref<16x1xf32, #tpu.memory_space<vmem>>, %arg20: memref<1x16x256xf32, #tpu.memory_space<vmem>>) attributes {dimension_semantics = [#tpu.dimension_semantics<parallel>], iteration_bounds = array<i64: 2>, scalar_prefetch = 0 : i64, scratch_operands = 0 : i64, tpu.core_type = #tpu.core_type<tc>, window_params = [{transform_indices = @transform_0, window_bounds = array<i64: 1, 32, 256>}, {transform_indices = @transform_1, window_bounds = array<i64: 1, 32, 256>}, {pipeline_mode = #tpu.pipeline_mode<synchronous>, transform_indices = @transform_2, window_bounds = array<i64: 9, 256>}, {pipeline_mode = #tpu.pipeline_mode<synchronous>, transform_indices = @transform_3, window_bounds = array<i64: 3, 256>}, {pipeline_mode = #tpu.pipeline_mode<synchronous>, transform_indices = @transform_4, window_bounds = array<i64: 4, 32>}, {pipeline_mode = #tpu.pipeline_mode<synchronous>, transform_indices = @transform_5, window_bounds = array<i64: 4, 32>}, {pipeline_mode = #tpu.pipeline_mode<synchronous>, transform_indices = @transform_6, window_bounds = array<i64: 4, 1>}, {pipeline_mode = #tpu.pipeline_mode<synchronous>, transform_indices = @transform_7, window_bounds = array<i64: 9, 8, 4>}, {pipeline_mode = #tpu.pipeline_mode<synchronous>, transform_indices = @transform_8, window_bounds = array<i64: 8, 1>}, {pipeline_mode = #tpu.pipeline_mode<synchronous>, transform_indices = @transform_9, window_bounds = array<i64: 3, 4, 8>}, {pipeline_mode = #tpu.pipeline_mode<synchronous>, transform_indices = @transform_10, window_bounds = array<i64: 4, 1>}, {pipeline_mode = #tpu.pipeline_mode<synchronous>, transform_indices = @transform_11, window_bounds = array<i64: 3, 4, 4>}, {pipeline_mode = #tpu.pipeline_mode<synchronous>, transform_indices = @transform_12, window_bounds = array<i64: 4, 1>}, {pipeline_mode = #tpu.pipeline_mode<synchronous>, transform_indices = @transform_13, window_bounds = array<i64: 4, 8>}, {pipeline_mode = #tpu.pipeline_mode<synchronous>, transform_indices = @transform_14, window_bounds = array<i64: 4, 4>}, {pipeline_mode = #tpu.pipeline_mode<synchronous>, transform_indices = @transform_15, window_bounds = array<i64: 4, 1>}, {pipeline_mode = #tpu.pipeline_mode<synchronous>, transform_indices = @transform_16, window_bounds = array<i64: 16, 4>}, {pipeline_mode = #tpu.pipeline_mode<synchronous>, transform_indices = @transform_17, window_bounds = array<i64: 16, 4>}, {pipeline_mode = #tpu.pipeline_mode<synchronous>, transform_indices = @transform_18, window_bounds = array<i64: 16, 1>}, {transform_indices = @transform_19, window_bounds = array<i64: 1, 16, 256>}]} {
    %c0 = arith.constant 0 : index
    %c0_0 = arith.constant 0 : index
    %c0_1 = arith.constant 0 : index
    %0 = vector.load %arg1[%c0, %c0_0, %c0_1] : memref<1x32x256xf32, #tpu.memory_space<vmem>>, vector<1x32x256xf32>
    %1 = vector.shape_cast %0 : vector<1x32x256xf32> to vector<32x256xf32>
    %c0_2 = arith.constant 0 : index
    %c0_3 = arith.constant 0 : index
    %c0_4 = arith.constant 0 : index
    %2 = vector.load %arg2[%c0_2, %c0_3, %c0_4] : memref<1x32x256xf32, #tpu.memory_space<vmem>>, vector<1x32x256xf32>
    %3 = vector.shape_cast %2 : vector<1x32x256xf32> to vector<32x256xf32>
    %c0_5 = arith.constant 0 : index
    %c0_6 = arith.constant 0 : index
    %4 = vector.load %arg3[%c0_5, %c0_6] : memref<9x256xf32, #tpu.memory_space<vmem>>, vector<9x256xf32>
    %c0_7 = arith.constant 0 : index
    %c0_8 = arith.constant 0 : index
    %5 = vector.load %arg4[%c0_7, %c0_8] : memref<3x256xf32, #tpu.memory_space<vmem>>, vector<3x256xf32>
    %c0_9 = arith.constant 0 : index
    %c0_10 = arith.constant 0 : index
    %6 = vector.load %arg5[%c0_9, %c0_10] : memref<4x32xf32, #tpu.memory_space<vmem>>, vector<4x32xf32>
    %cst = arith.constant dense<0.000000e+00> : vector<4x256xf32>
    %7 = tpu.matmul %6, %1, %cst {dimension_numbers = #tpu.dot_dimension_numbers<[1], [0], [0], [1], [0, 0, 1, 1], [], []>, precision = #tpu.contract_precision<fp32>} : vector<4x32xf32>, vector<32x256xf32>, vector<4x256xf32> -> vector<4x256xf32>
    %c0_11 = arith.constant 0 : index
    %c0_12 = arith.constant 0 : index
    %8 = vector.load %arg6[%c0_11, %c0_12] : memref<4x32xf32, #tpu.memory_space<vmem>>, vector<4x32xf32>
    %cst_13 = arith.constant dense<0.000000e+00> : vector<4x256xf32>
    %9 = tpu.matmul %8, %3, %cst_13 {dimension_numbers = #tpu.dot_dimension_numbers<[1], [0], [0], [1], [0, 0, 1, 1], [], []>, precision = #tpu.contract_precision<fp32>} : vector<4x32xf32>, vector<32x256xf32>, vector<4x256xf32> -> vector<4x256xf32>
    %10 = arith.addf %7, %9 : vector<4x256xf32>
    %c0_14 = arith.constant 0 : index
    %c0_15 = arith.constant 0 : index
    %11 = vector.load %arg7[%c0_14, %c0_15] : memref<4x1xf32, #tpu.memory_space<vmem>>, vector<4x1xf32>
    %12 = vector.broadcast %11 : vector<4x1xf32> to vector<4x256xf32>
    %13 = arith.addf %10, %12 : vector<4x256xf32>
    %cst_16 = arith.constant 0.000000e+00 : f32
    %14 = vector.broadcast %cst_16 : f32 to vector<4x256xf32>
    %15 = arith.maximumf %13, %14 : vector<4x256xf32>
    %cst_17 = arith.constant 0.000000e+00 : f32
    %16 = vector.broadcast %cst_17 : f32 to vector<8x256xf32>
    %c9_i32 = arith.constant 9 : i32
    %17 = tpu.dynamic_rotate %15 by %c9_i32 dim 1 : vector<4x256xf32>, i32 -> vector<4x256xf32>
    %18 = vector.extract_strided_slice %4 {offsets = [0, 0], sizes = [1, 256], strides = [1, 1]} : vector<9x256xf32> to vector<1x256xf32>
    %19 = vector.broadcast %18 : vector<1x256xf32> to vector<4x256xf32>
    %20 = arith.mulf %17, %19 : vector<4x256xf32>
    %c0_18 = arith.constant 0 : index
    %c0_19 = arith.constant 0 : index
    %c0_20 = arith.constant 0 : index
    %21 = vector.load %arg8[%c0_18, %c0_19, %c0_20] : memref<9x8x4xf32, #tpu.memory_space<vmem>>, vector<1x8x4xf32>
    %22 = vector.shape_cast %21 : vector<1x8x4xf32> to vector<8x4xf32>
    %cst_21 = arith.constant dense<0.000000e+00> : vector<8x256xf32>
    %23 = tpu.matmul %22, %20, %cst_21 {dimension_numbers = #tpu.dot_dimension_numbers<[1], [0], [0], [1], [0, 0, 1, 1], [], []>, precision = #tpu.contract_precision<fp32>} : vector<8x4xf32>, vector<4x256xf32>, vector<8x256xf32> -> vector<8x256xf32>
    %24 = arith.addf %16, %23 : vector<8x256xf32>
    %c8_i32 = arith.constant 8 : i32
    %25 = tpu.dynamic_rotate %15 by %c8_i32 dim 1 : vector<4x256xf32>, i32 -> vector<4x256xf32>
    %26 = vector.extract_strided_slice %4 {offsets = [1, 0], sizes = [1, 256], strides = [1, 1]} : vector<9x256xf32> to vector<1x256xf32>
    %27 = vector.broadcast %26 : vector<1x256xf32> to vector<4x256xf32>
    %28 = arith.mulf %25, %27 : vector<4x256xf32>
    %c1 = arith.constant 1 : index
    %c0_22 = arith.constant 0 : index
    %c0_23 = arith.constant 0 : index
    %29 = vector.load %arg8[%c1, %c0_22, %c0_23] : memref<9x8x4xf32, #tpu.memory_space<vmem>>, vector<1x8x4xf32>
    %30 = vector.shape_cast %29 : vector<1x8x4xf32> to vector<8x4xf32>
    %cst_24 = arith.constant dense<0.000000e+00> : vector<8x256xf32>
    %31 = tpu.matmul %30, %28, %cst_24 {dimension_numbers = #tpu.dot_dimension_numbers<[1], [0], [0], [1], [0, 0, 1, 1], [], []>, precision = #tpu.contract_precision<fp32>} : vector<8x4xf32>, vector<4x256xf32>, vector<8x256xf32> -> vector<8x256xf32>
    %32 = arith.addf %24, %31 : vector<8x256xf32>
    %c7_i32 = arith.constant 7 : i32
    %33 = tpu.dynamic_rotate %15 by %c7_i32 dim 1 : vector<4x256xf32>, i32 -> vector<4x256xf32>
    %34 = vector.extract_strided_slice %4 {offsets = [2, 0], sizes = [1, 256], strides = [1, 1]} : vector<9x256xf32> to vector<1x256xf32>
    %35 = vector.broadcast %34 : vector<1x256xf32> to vector<4x256xf32>
    %36 = arith.mulf %33, %35 : vector<4x256xf32>
    %c2 = arith.constant 2 : index
    %c0_25 = arith.constant 0 : index
    %c0_26 = arith.constant 0 : index
    %37 = vector.load %arg8[%c2, %c0_25, %c0_26] : memref<9x8x4xf32, #tpu.memory_space<vmem>>, vector<1x8x4xf32>
    %38 = vector.shape_cast %37 : vector<1x8x4xf32> to vector<8x4xf32>
    %cst_27 = arith.constant dense<0.000000e+00> : vector<8x256xf32>
    %39 = tpu.matmul %38, %36, %cst_27 {dimension_numbers = #tpu.dot_dimension_numbers<[1], [0], [0], [1], [0, 0, 1, 1], [], []>, precision = #tpu.contract_precision<fp32>} : vector<8x4xf32>, vector<4x256xf32>, vector<8x256xf32> -> vector<8x256xf32>
    %40 = arith.addf %32, %39 : vector<8x256xf32>
    %c1_i32 = arith.constant 1 : i32
    %41 = tpu.dynamic_rotate %15 by %c1_i32 dim 1 : vector<4x256xf32>, i32 -> vector<4x256xf32>
    %42 = vector.extract_strided_slice %4 {offsets = [3, 0], sizes = [1, 256], strides = [1, 1]} : vector<9x256xf32> to vector<1x256xf32>
    %43 = vector.broadcast %42 : vector<1x256xf32> to vector<4x256xf32>
    %44 = arith.mulf %41, %43 : vector<4x256xf32>
    %c3 = arith.constant 3 : index
    %c0_28 = arith.constant 0 : index
    %c0_29 = arith.constant 0 : index
    %45 = vector.load %arg8[%c3, %c0_28, %c0_29] : memref<9x8x4xf32, #tpu.memory_space<vmem>>, vector<1x8x4xf32>
    %46 = vector.shape_cast %45 : vector<1x8x4xf32> to vector<8x4xf32>
    %cst_30 = arith.constant dense<0.000000e+00> : vector<8x256xf32>
    %47 = tpu.matmul %46, %44, %cst_30 {dimension_numbers = #tpu.dot_dimension_numbers<[1], [0], [0], [1], [0, 0, 1, 1], [], []>, precision = #tpu.contract_precision<fp32>} : vector<8x4xf32>, vector<4x256xf32>, vector<8x256xf32> -> vector<8x256xf32>
    %48 = arith.addf %40, %47 : vector<8x256xf32>
    %c4 = arith.constant 4 : index
    %c0_31 = arith.constant 0 : index
    %c0_32 = arith.constant 0 : index
    %49 = vector.load %arg8[%c4, %c0_31, %c0_32] : memref<9x8x4xf32, #tpu.memory_space<vmem>>, vector<1x8x4xf32>
    %50 = vector.shape_cast %49 : vector<1x8x4xf32> to vector<8x4xf32>
    %cst_33 = arith.constant dense<0.000000e+00> : vector<8x256xf32>
    %51 = tpu.matmul %50, %15, %cst_33 {dimension_numbers = #tpu.dot_dimension_numbers<[1], [0], [0], [1], [0, 0, 1, 1], [], []>, precision = #tpu.contract_precision<fp32>} : vector<8x4xf32>, vector<4x256xf32>, vector<8x256xf32> -> vector<8x256xf32>
    %52 = arith.addf %48, %51 : vector<8x256xf32>
    %c255_i32 = arith.constant 255 : i32
    %53 = tpu.dynamic_rotate %15 by %c255_i32 dim 1 : vector<4x256xf32>, i32 -> vector<4x256xf32>
    %54 = vector.extract_strided_slice %4 {offsets = [5, 0], sizes = [1, 256], strides = [1, 1]} : vector<9x256xf32> to vector<1x256xf32>
    %55 = vector.broadcast %54 : vector<1x256xf32> to vector<4x256xf32>
    %56 = arith.mulf %53, %55 : vector<4x256xf32>
    %c5 = arith.constant 5 : index
    %c0_34 = arith.constant 0 : index
    %c0_35 = arith.constant 0 : index
    %57 = vector.load %arg8[%c5, %c0_34, %c0_35] : memref<9x8x4xf32, #tpu.memory_space<vmem>>, vector<1x8x4xf32>
    %58 = vector.shape_cast %57 : vector<1x8x4xf32> to vector<8x4xf32>
    %cst_36 = arith.constant dense<0.000000e+00> : vector<8x256xf32>
    %59 = tpu.matmul %58, %56, %cst_36 {dimension_numbers = #tpu.dot_dimension_numbers<[1], [0], [0], [1], [0, 0, 1, 1], [], []>, precision = #tpu.contract_precision<fp32>} : vector<8x4xf32>, vector<4x256xf32>, vector<8x256xf32> -> vector<8x256xf32>
    %60 = arith.addf %52, %59 : vector<8x256xf32>
    %c249_i32 = arith.constant 249 : i32
    %61 = tpu.dynamic_rotate %15 by %c249_i32 dim 1 : vector<4x256xf32>, i32 -> vector<4x256xf32>
    %62 = vector.extract_strided_slice %4 {offsets = [6, 0], sizes = [1, 256], strides = [1, 1]} : vector<9x256xf32> to vector<1x256xf32>
    %63 = vector.broadcast %62 : vector<1x256xf32> to vector<4x256xf32>
    %64 = arith.mulf %61, %63 : vector<4x256xf32>
    %c6 = arith.constant 6 : index
    %c0_37 = arith.constant 0 : index
    %c0_38 = arith.constant 0 : index
    %65 = vector.load %arg8[%c6, %c0_37, %c0_38] : memref<9x8x4xf32, #tpu.memory_space<vmem>>, vector<1x8x4xf32>
    %66 = vector.shape_cast %65 : vector<1x8x4xf32> to vector<8x4xf32>
    %cst_39 = arith.constant dense<0.000000e+00> : vector<8x256xf32>
    %67 = tpu.matmul %66, %64, %cst_39 {dimension_numbers = #tpu.dot_dimension_numbers<[1], [0], [0], [1], [0, 0, 1, 1], [], []>, precision = #tpu.contract_precision<fp32>} : vector<8x4xf32>, vector<4x256xf32>, vector<8x256xf32> -> vector<8x256xf32>
    %68 = arith.addf %60, %67 : vector<8x256xf32>
    %c248_i32 = arith.constant 248 : i32
    %69 = tpu.dynamic_rotate %15 by %c248_i32 dim 1 : vector<4x256xf32>, i32 -> vector<4x256xf32>
    %70 = vector.extract_strided_slice %4 {offsets = [7, 0], sizes = [1, 256], strides = [1, 1]} : vector<9x256xf32> to vector<1x256xf32>
    %71 = vector.broadcast %70 : vector<1x256xf32> to vector<4x256xf32>
    %72 = arith.mulf %69, %71 : vector<4x256xf32>
    %c7 = arith.constant 7 : index
    %c0_40 = arith.constant 0 : index
    %c0_41 = arith.constant 0 : index
    %73 = vector.load %arg8[%c7, %c0_40, %c0_41] : memref<9x8x4xf32, #tpu.memory_space<vmem>>, vector<1x8x4xf32>
    %74 = vector.shape_cast %73 : vector<1x8x4xf32> to vector<8x4xf32>
    %cst_42 = arith.constant dense<0.000000e+00> : vector<8x256xf32>
    %75 = tpu.matmul %74, %72, %cst_42 {dimension_numbers = #tpu.dot_dimension_numbers<[1], [0], [0], [1], [0, 0, 1, 1], [], []>, precision = #tpu.contract_precision<fp32>} : vector<8x4xf32>, vector<4x256xf32>, vector<8x256xf32> -> vector<8x256xf32>
    %76 = arith.addf %68, %75 : vector<8x256xf32>
    %c247_i32 = arith.constant 247 : i32
    %77 = tpu.dynamic_rotate %15 by %c247_i32 dim 1 : vector<4x256xf32>, i32 -> vector<4x256xf32>
    %78 = vector.extract_strided_slice %4 {offsets = [8, 0], sizes = [1, 256], strides = [1, 1]} : vector<9x256xf32> to vector<1x256xf32>
    %79 = vector.broadcast %78 : vector<1x256xf32> to vector<4x256xf32>
    %80 = arith.mulf %77, %79 : vector<4x256xf32>
    %c8 = arith.constant 8 : index
    %c0_43 = arith.constant 0 : index
    %c0_44 = arith.constant 0 : index
    %81 = vector.load %arg8[%c8, %c0_43, %c0_44] : memref<9x8x4xf32, #tpu.memory_space<vmem>>, vector<1x8x4xf32>
    %82 = vector.shape_cast %81 : vector<1x8x4xf32> to vector<8x4xf32>
    %cst_45 = arith.constant dense<0.000000e+00> : vector<8x256xf32>
    %83 = tpu.matmul %82, %80, %cst_45 {dimension_numbers = #tpu.dot_dimension_numbers<[1], [0], [0], [1], [0, 0, 1, 1], [], []>, precision = #tpu.contract_precision<fp32>} : vector<8x4xf32>, vector<4x256xf32>, vector<8x256xf32> -> vector<8x256xf32>
    %84 = arith.addf %76, %83 : vector<8x256xf32>
    %c0_46 = arith.constant 0 : index
    %c0_47 = arith.constant 0 : index
    %85 = vector.load %arg9[%c0_46, %c0_47] : memref<8x1xf32, #tpu.memory_space<vmem>>, vector<8x1xf32>
    %86 = vector.broadcast %85 : vector<8x1xf32> to vector<8x256xf32>
    %87 = arith.addf %84, %86 : vector<8x256xf32>
    %cst_48 = arith.constant 0.000000e+00 : f32
    %88 = vector.broadcast %cst_48 : f32 to vector<8x256xf32>
    %89 = arith.maximumf %87, %88 : vector<8x256xf32>
    %cst_49 = arith.constant 0.000000e+00 : f32
    %90 = vector.broadcast %cst_49 : f32 to vector<4x256xf32>
    %cst_50 = arith.constant 0.000000e+00 : f32
    %91 = vector.broadcast %cst_50 : f32 to vector<4x256xf32>
    %c0_51 = arith.constant 0 : index
    %c0_52 = arith.constant 0 : index
    %c0_53 = arith.constant 0 : index
    %92 = vector.load %arg10[%c0_51, %c0_52, %c0_53] : memref<3x4x8xf32, #tpu.memory_space<vmem>>, vector<1x4x8xf32>
    %93 = vector.shape_cast %92 : vector<1x4x8xf32> to vector<4x8xf32>
    %c64_i32 = arith.constant 64 : i32
    %94 = tpu.dynamic_rotate %89 by %c64_i32 dim 1 : vector<8x256xf32>, i32 -> vector<8x256xf32>
    %cst_54 = arith.constant dense<0.000000e+00> : vector<4x256xf32>
    %95 = tpu.matmul %93, %94, %cst_54 {dimension_numbers = #tpu.dot_dimension_numbers<[1], [0], [0], [1], [0, 0, 1, 1], [], []>, precision = #tpu.contract_precision<fp32>} : vector<4x8xf32>, vector<8x256xf32>, vector<4x256xf32> -> vector<4x256xf32>
    %c64_i32_55 = arith.constant 64 : i32
    %96 = tpu.dynamic_rotate %15 by %c64_i32_55 dim 1 : vector<4x256xf32>, i32 -> vector<4x256xf32>
    %97 = vector.extract_strided_slice %5 {offsets = [0, 0], sizes = [1, 256], strides = [1, 1]} : vector<3x256xf32> to vector<1x256xf32>
    %98 = vector.broadcast %97 : vector<1x256xf32> to vector<4x256xf32>
    %99 = arith.mulf %95, %98 : vector<4x256xf32>
    %100 = vector.broadcast %97 : vector<1x256xf32> to vector<4x256xf32>
    %101 = arith.mulf %96, %100 : vector<4x256xf32>
    %102 = arith.addf %90, %99 : vector<4x256xf32>
    %c0_56 = arith.constant 0 : index
    %c0_57 = arith.constant 0 : index
    %c0_58 = arith.constant 0 : index
    %103 = vector.load %arg12[%c0_56, %c0_57, %c0_58] : memref<3x4x4xf32, #tpu.memory_space<vmem>>, vector<1x4x4xf32>
    %104 = vector.shape_cast %103 : vector<1x4x4xf32> to vector<4x4xf32>
    %cst_59 = arith.constant dense<0.000000e+00> : vector<4x256xf32>
    %105 = tpu.matmul %104, %101, %cst_59 {dimension_numbers = #tpu.dot_dimension_numbers<[1], [0], [0], [1], [0, 0, 1, 1], [], []>, precision = #tpu.contract_precision<fp32>} : vector<4x4xf32>, vector<4x256xf32>, vector<4x256xf32> -> vector<4x256xf32>
    %106 = arith.addf %91, %105 : vector<4x256xf32>
    %c1_60 = arith.constant 1 : index
    %c0_61 = arith.constant 0 : index
    %c0_62 = arith.constant 0 : index
    %107 = vector.load %arg10[%c1_60, %c0_61, %c0_62] : memref<3x4x8xf32, #tpu.memory_space<vmem>>, vector<1x4x8xf32>
    %108 = vector.shape_cast %107 : vector<1x4x8xf32> to vector<4x8xf32>
    %cst_63 = arith.constant dense<0.000000e+00> : vector<4x256xf32>
    %109 = tpu.matmul %108, %89, %cst_63 {dimension_numbers = #tpu.dot_dimension_numbers<[1], [0], [0], [1], [0, 0, 1, 1], [], []>, precision = #tpu.contract_precision<fp32>} : vector<4x8xf32>, vector<8x256xf32>, vector<4x256xf32> -> vector<4x256xf32>
    %110 = arith.addf %102, %109 : vector<4x256xf32>
    %c1_64 = arith.constant 1 : index
    %c0_65 = arith.constant 0 : index
    %c0_66 = arith.constant 0 : index
    %111 = vector.load %arg12[%c1_64, %c0_65, %c0_66] : memref<3x4x4xf32, #tpu.memory_space<vmem>>, vector<1x4x4xf32>
    %112 = vector.shape_cast %111 : vector<1x4x4xf32> to vector<4x4xf32>
    %cst_67 = arith.constant dense<0.000000e+00> : vector<4x256xf32>
    %113 = tpu.matmul %112, %15, %cst_67 {dimension_numbers = #tpu.dot_dimension_numbers<[1], [0], [0], [1], [0, 0, 1, 1], [], []>, precision = #tpu.contract_precision<fp32>} : vector<4x4xf32>, vector<4x256xf32>, vector<4x256xf32> -> vector<4x256xf32>
    %114 = arith.addf %106, %113 : vector<4x256xf32>
    %c2_68 = arith.constant 2 : index
    %c0_69 = arith.constant 0 : index
    %c0_70 = arith.constant 0 : index
    %115 = vector.load %arg10[%c2_68, %c0_69, %c0_70] : memref<3x4x8xf32, #tpu.memory_space<vmem>>, vector<1x4x8xf32>
    %116 = vector.shape_cast %115 : vector<1x4x8xf32> to vector<4x8xf32>
    %c192_i32 = arith.constant 192 : i32
    %117 = tpu.dynamic_rotate %89 by %c192_i32 dim 1 : vector<8x256xf32>, i32 -> vector<8x256xf32>
    %cst_71 = arith.constant dense<0.000000e+00> : vector<4x256xf32>
    %118 = tpu.matmul %116, %117, %cst_71 {dimension_numbers = #tpu.dot_dimension_numbers<[1], [0], [0], [1], [0, 0, 1, 1], [], []>, precision = #tpu.contract_precision<fp32>} : vector<4x8xf32>, vector<8x256xf32>, vector<4x256xf32> -> vector<4x256xf32>
    %c192_i32_72 = arith.constant 192 : i32
    %119 = tpu.dynamic_rotate %15 by %c192_i32_72 dim 1 : vector<4x256xf32>, i32 -> vector<4x256xf32>
    %120 = vector.extract_strided_slice %5 {offsets = [2, 0], sizes = [1, 256], strides = [1, 1]} : vector<3x256xf32> to vector<1x256xf32>
    %121 = vector.broadcast %120 : vector<1x256xf32> to vector<4x256xf32>
    %122 = arith.mulf %118, %121 : vector<4x256xf32>
    %123 = vector.broadcast %120 : vector<1x256xf32> to vector<4x256xf32>
    %124 = arith.mulf %119, %123 : vector<4x256xf32>
    %125 = arith.addf %110, %122 : vector<4x256xf32>
    %c2_73 = arith.constant 2 : index
    %c0_74 = arith.constant 0 : index
    %c0_75 = arith.constant 0 : index
    %126 = vector.load %arg12[%c2_73, %c0_74, %c0_75] : memref<3x4x4xf32, #tpu.memory_space<vmem>>, vector<1x4x4xf32>
    %127 = vector.shape_cast %126 : vector<1x4x4xf32> to vector<4x4xf32>
    %cst_76 = arith.constant dense<0.000000e+00> : vector<4x256xf32>
    %128 = tpu.matmul %127, %124, %cst_76 {dimension_numbers = #tpu.dot_dimension_numbers<[1], [0], [0], [1], [0, 0, 1, 1], [], []>, precision = #tpu.contract_precision<fp32>} : vector<4x4xf32>, vector<4x256xf32>, vector<4x256xf32> -> vector<4x256xf32>
    %129 = arith.addf %114, %128 : vector<4x256xf32>
    %c0_77 = arith.constant 0 : index
    %c0_78 = arith.constant 0 : index
    %130 = vector.load %arg11[%c0_77, %c0_78] : memref<4x1xf32, #tpu.memory_space<vmem>>, vector<4x1xf32>
    %131 = vector.broadcast %130 : vector<4x1xf32> to vector<4x256xf32>
    %132 = arith.addf %125, %131 : vector<4x256xf32>
    %cst_79 = arith.constant 0.000000e+00 : f32
    %133 = vector.broadcast %cst_79 : f32 to vector<4x256xf32>
    %134 = arith.maximumf %132, %133 : vector<4x256xf32>
    %c0_80 = arith.constant 0 : index
    %c0_81 = arith.constant 0 : index
    %135 = vector.load %arg13[%c0_80, %c0_81] : memref<4x1xf32, #tpu.memory_space<vmem>>, vector<4x1xf32>
    %136 = vector.broadcast %135 : vector<4x1xf32> to vector<4x256xf32>
    %137 = arith.addf %129, %136 : vector<4x256xf32>
    %cst_82 = arith.constant 0.000000e+00 : f32
    %138 = vector.broadcast %cst_82 : f32 to vector<4x256xf32>
    %139 = arith.maximumf %137, %138 : vector<4x256xf32>
    %c0_83 = arith.constant 0 : index
    %c0_84 = arith.constant 0 : index
    %140 = vector.load %arg14[%c0_83, %c0_84] : memref<4x8xf32, #tpu.memory_space<vmem>>, vector<4x8xf32>
    %cst_85 = arith.constant dense<0.000000e+00> : vector<4x256xf32>
    %141 = tpu.matmul %140, %89, %cst_85 {dimension_numbers = #tpu.dot_dimension_numbers<[1], [0], [0], [1], [0, 0, 1, 1], [], []>, precision = #tpu.contract_precision<fp32>} : vector<4x8xf32>, vector<8x256xf32>, vector<4x256xf32> -> vector<4x256xf32>
    %c0_86 = arith.constant 0 : index
    %c0_87 = arith.constant 0 : index
    %142 = vector.load %arg15[%c0_86, %c0_87] : memref<4x4xf32, #tpu.memory_space<vmem>>, vector<4x4xf32>
    %cst_88 = arith.constant dense<0.000000e+00> : vector<4x256xf32>
    %143 = tpu.matmul %142, %139, %cst_88 {dimension_numbers = #tpu.dot_dimension_numbers<[1], [0], [0], [1], [0, 0, 1, 1], [], []>, precision = #tpu.contract_precision<fp32>} : vector<4x4xf32>, vector<4x256xf32>, vector<4x256xf32> -> vector<4x256xf32>
    %144 = arith.addf %141, %143 : vector<4x256xf32>
    %c0_89 = arith.constant 0 : index
    %c0_90 = arith.constant 0 : index
    %145 = vector.load %arg16[%c0_89, %c0_90] : memref<4x1xf32, #tpu.memory_space<vmem>>, vector<4x1xf32>
    %146 = vector.broadcast %145 : vector<4x1xf32> to vector<4x256xf32>
    %147 = arith.addf %144, %146 : vector<4x256xf32>
    %cst_91 = arith.constant 0.000000e+00 : f32
    %148 = vector.broadcast %cst_91 : f32 to vector<4x256xf32>
    %149 = arith.maximumf %147, %148 : vector<4x256xf32>
    %c0_92 = arith.constant 0 : index
    %c0_93 = arith.constant 0 : index
    %150 = vector.load %arg17[%c0_92, %c0_93] : memref<16x4xf32, #tpu.memory_space<vmem>>, vector<16x4xf32>
    %cst_94 = arith.constant dense<0.000000e+00> : vector<16x256xf32>
    %151 = tpu.matmul %150, %134, %cst_94 {dimension_numbers = #tpu.dot_dimension_numbers<[1], [0], [0], [1], [0, 0, 1, 1], [], []>, precision = #tpu.contract_precision<fp32>} : vector<16x4xf32>, vector<4x256xf32>, vector<16x256xf32> -> vector<16x256xf32>
    %c0_95 = arith.constant 0 : index
    %c0_96 = arith.constant 0 : index
    %152 = vector.load %arg18[%c0_95, %c0_96] : memref<16x4xf32, #tpu.memory_space<vmem>>, vector<16x4xf32>
    %cst_97 = arith.constant dense<0.000000e+00> : vector<16x256xf32>
    %153 = tpu.matmul %152, %149, %cst_97 {dimension_numbers = #tpu.dot_dimension_numbers<[1], [0], [0], [1], [0, 0, 1, 1], [], []>, precision = #tpu.contract_precision<fp32>} : vector<16x4xf32>, vector<4x256xf32>, vector<16x256xf32> -> vector<16x256xf32>
    %154 = arith.addf %151, %153 : vector<16x256xf32>
    %c0_98 = arith.constant 0 : index
    %c0_99 = arith.constant 0 : index
    %155 = vector.load %arg19[%c0_98, %c0_99] : memref<16x1xf32, #tpu.memory_space<vmem>>, vector<16x1xf32>
    %156 = vector.broadcast %155 : vector<16x1xf32> to vector<16x256xf32>
    %157 = arith.addf %154, %156 : vector<16x256xf32>
    %cst_100 = arith.constant 0.000000e+00 : f32
    %158 = vector.broadcast %cst_100 : f32 to vector<16x256xf32>
    %159 = arith.maximumf %157, %158 : vector<16x256xf32>
    %c0_101 = arith.constant 0 : index
    %c0_102 = arith.constant 0 : index
    %c0_103 = arith.constant 0 : index
    %160 = vector.load %arg20[%c0_101, %c0_102, %c0_103] : memref<1x16x256xf32, #tpu.memory_space<vmem>>, vector<1x16x256xf32>
    %161 = vector.shape_cast %160 : vector<1x16x256xf32> to vector<16x256xf32>
    %162 = vector.shape_cast %159 : vector<16x256xf32> to vector<1x16x256xf32>
    tpu.vector_store %arg20[%c0_101, %c0_102, %c0_103], %162 {strides = array<i32>} : memref<1x16x256xf32, #tpu.memory_space<vmem>>, vector<1x16x256xf32>,
    return
  }
  func.func @transform_0(%arg0: i32) -> (i32, i32, i32) {
    %c0_i32 = arith.constant 0 : i32
    %c0_i32_0 = arith.constant 0 : i32
    %c0_i32_1 = arith.constant 0 : i32
    return %arg0, %c0_i32, %c0_i32_0 : i32, i32, i32
  }
  func.func @transform_1(%arg0: i32) -> (i32, i32, i32) {
    %c0_i32 = arith.constant 0 : i32
    %c0_i32_0 = arith.constant 0 : i32
    %c0_i32_1 = arith.constant 0 : i32
    return %arg0, %c0_i32, %c0_i32_0 : i32, i32, i32
  }
  func.func @transform_2(%arg0: i32) -> (i32, i32) {
    %c0_i32 = arith.constant 0 : i32
    %c0_i32_0 = arith.constant 0 : i32
    %c0_i32_1 = arith.constant 0 : i32
    return %c0_i32, %c0_i32_0 : i32, i32
  }
  func.func @transform_3(%arg0: i32) -> (i32, i32) {
    %c0_i32 = arith.constant 0 : i32
    %c0_i32_0 = arith.constant 0 : i32
    %c0_i32_1 = arith.constant 0 : i32
    return %c0_i32, %c0_i32_0 : i32, i32
  }
  func.func @transform_4(%arg0: i32) -> (i32, i32) {
    %c0_i32 = arith.constant 0 : i32
    %c0_i32_0 = arith.constant 0 : i32
    %c0_i32_1 = arith.constant 0 : i32
    return %c0_i32, %c0_i32_0 : i32, i32
  }
  func.func @transform_5(%arg0: i32) -> (i32, i32) {
    %c0_i32 = arith.constant 0 : i32
    %c0_i32_0 = arith.constant 0 : i32
    %c0_i32_1 = arith.constant 0 : i32
    return %c0_i32, %c0_i32_0 : i32, i32
  }
  func.func @transform_6(%arg0: i32) -> (i32, i32) {
    %c0_i32 = arith.constant 0 : i32
    %c0_i32_0 = arith.constant 0 : i32
    %c0_i32_1 = arith.constant 0 : i32
    return %c0_i32, %c0_i32_0 : i32, i32
  }
  func.func @transform_7(%arg0: i32) -> (i32, i32, i32) {
    %c0_i32 = arith.constant 0 : i32
    %c0_i32_0 = arith.constant 0 : i32
    %c0_i32_1 = arith.constant 0 : i32
    %c0_i32_2 = arith.constant 0 : i32
    return %c0_i32, %c0_i32_0, %c0_i32_1 : i32, i32, i32
  }
  func.func @transform_8(%arg0: i32) -> (i32, i32) {
    %c0_i32 = arith.constant 0 : i32
    %c0_i32_0 = arith.constant 0 : i32
    %c0_i32_1 = arith.constant 0 : i32
    return %c0_i32, %c0_i32_0 : i32, i32
  }
  func.func @transform_9(%arg0: i32) -> (i32, i32, i32) {
    %c0_i32 = arith.constant 0 : i32
    %c0_i32_0 = arith.constant 0 : i32
    %c0_i32_1 = arith.constant 0 : i32
    %c0_i32_2 = arith.constant 0 : i32
    return %c0_i32, %c0_i32_0, %c0_i32_1 : i32, i32, i32
  }
  func.func @transform_10(%arg0: i32) -> (i32, i32) {
    %c0_i32 = arith.constant 0 : i32
    %c0_i32_0 = arith.constant 0 : i32
    %c0_i32_1 = arith.constant 0 : i32
    return %c0_i32, %c0_i32_0 : i32, i32
  }
  func.func @transform_11(%arg0: i32) -> (i32, i32, i32) {
    %c0_i32 = arith.constant 0 : i32
    %c0_i32_0 = arith.constant 0 : i32
    %c0_i32_1 = arith.constant 0 : i32
    %c0_i32_2 = arith.constant 0 : i32
    return %c0_i32, %c0_i32_0, %c0_i32_1 : i32, i32, i32
  }
  func.func @transform_12(%arg0: i32) -> (i32, i32) {
    %c0_i32 = arith.constant 0 : i32
    %c0_i32_0 = arith.constant 0 : i32
    %c0_i32_1 = arith.constant 0 : i32
    return %c0_i32, %c0_i32_0 : i32, i32
  }
  func.func @transform_13(%arg0: i32) -> (i32, i32) {
    %c0_i32 = arith.constant 0 : i32
    %c0_i32_0 = arith.constant 0 : i32
    %c0_i32_1 = arith.constant 0 : i32
    return %c0_i32, %c0_i32_0 : i32, i32
  }
  func.func @transform_14(%arg0: i32) -> (i32, i32) {
    %c0_i32 = arith.constant 0 : i32
    %c0_i32_0 = arith.constant 0 : i32
    %c0_i32_1 = arith.constant 0 : i32
    return %c0_i32, %c0_i32_0 : i32, i32
  }
  func.func @transform_15(%arg0: i32) -> (i32, i32) {
    %c0_i32 = arith.constant 0 : i32
    %c0_i32_0 = arith.constant 0 : i32
    %c0_i32_1 = arith.constant 0 : i32
    return %c0_i32, %c0_i32_0 : i32, i32
  }
  func.func @transform_16(%arg0: i32) -> (i32, i32) {
    %c0_i32 = arith.constant 0 : i32
    %c0_i32_0 = arith.constant 0 : i32
    %c0_i32_1 = arith.constant 0 : i32
    return %c0_i32, %c0_i32_0 : i32, i32
  }
  func.func @transform_17(%arg0: i32) -> (i32, i32) {
    %c0_i32 = arith.constant 0 : i32
    %c0_i32_0 = arith.constant 0 : i32
    %c0_i32_1 = arith.constant 0 : i32
    return %c0_i32, %c0_i32_0 : i32, i32
  }
  func.func @transform_18(%arg0: i32) -> (i32, i32) {
    %c0_i32 = arith.constant 0 : i32
    %c0_i32_0 = arith.constant 0 : i32
    %c0_i32_1 = arith.constant 0 : i32
    return %c0_i32, %c0_i32_0 : i32, i32
  }
  func.func @transform_19(%arg0: i32) -> (i32, i32, i32) {
    %c0_i32 = arith.constant 0 : i32
    %c0_i32_0 = arith.constant 0 : i32
    %c0_i32_1 = arith.constant 0 : i32
    return %arg0, %c0_i32, %c0_i32_0 : i32, i32, i32
  }
}

</mosaic_0001>

<bundles_post_ra>
// kernel: skip_connection_forward.1
= control target key start
LH: loop header
LB: loop body
LE: loop exit
PB: predicated region body
PF: predicated region fallthrough
CT: control target
= control target key end

     0   :  { %s12823_s0 = inlined_call_operand.vmem [shape: f32[2,32,256], index: 0, kind: input, shape index: {}]   ;;  %s12824_s1 = inlined_call_operand.vmem [shape: f32[2,32,256], index: 1, kind: input, shape index: {}]   ;;  %s12825_s2 = inlined_call_operand.vmem [shape: f32[9,256], index: 2, kind: input, shape index: {}]   ;;  %s12826_s3 = inlined_call_operand.vmem [shape: f32[3,256], index: 3, kind: input, shape index: {}]   ;;  %s12827_s4 = inlined_call_operand.vmem [shape: f32[4,32], index: 4, kind: input, shape index: {}]   ;;  %s12828_s5 = inlined_call_operand.vmem [shape: f32[4,32], index: 5, kind: input, shape index: {}]   ;;  %s12829_s6 = inlined_call_operand.vmem [shape: f32[4,1], index: 6, kind: input, shape index: {}]   ;;  %s12830_s7 = inlined_call_operand.vmem [shape: f32[9,8,4], index: 7, kind: input, shape index: {}]   ;;  %s12831_s8 = inlined_call_operand.vmem [shape: f32[8,1], index: 8, kind: input, shape index: {}]   ;;  %s12832_s9 = inlined_call_operand.vmem [shape: f32[3,4,8], index: 9, kind: input, shape index: {}]   ;;  %s12833_s10 = inlined_call_operand.vmem [shape: f32[4,1], index: 10, kind: input, shape index: {}]   ;;  %s12834_s11 = inlined_call_operand.vmem [shape: f32[3,4,4], index: 11, kind: input, shape index: {}]   ;;  %s12835_s12 = inlined_call_operand.vmem [shape: f32[4,1], index: 12, kind: input, shape index: {}]   ;;  %s12836_s13 = inlined_call_operand.vmem [shape: f32[4,8], index: 13, kind: input, shape index: {}]   ;;  %s12837_s14 = inlined_call_operand.vmem [shape: f32[4,4], index: 14, kind: input, shape index: {}]   ;;  %s12838_s15 = inlined_call_operand.vmem [shape: f32[4,1], index: 15, kind: input, shape index: {}]   ;;  %s12839_s16 = inlined_call_operand.vmem [shape: f32[16,4], index: 16, kind: input, shape index: {}]   ;;  %s12840_s17 = inlined_call_operand.vmem [shape: f32[16,4], index: 17, kind: input, shape index: {}]   ;;  %s12841_s18 = inlined_call_operand.vmem [shape: f32[16,1], index: 18, kind: input, shape index: {}]   ;;  %s12842_s19 = inlined_call_operand.vmem [shape: f32[2,16,256], index: 19, kind: output, shape index: {}]  }
   0x1   :  { %12866 = sst [smem:[#allocation31_spill]] %s12823_s0  ;;  %s11384_s0 = smov 0  }
   0x2   :  { %12867 = sst [smem:[#allocation32_spill]] %s12824_s1 }
   0x3   :  { %12868 = sst [smem:[#allocation33_spill]] %s12825_s2 }
   0x4   :  { %12869 = sst [smem:[#allocation34_spill]] %s12826_s3 }
   0x5 LB: > { %s11214_s30 = sadd.s32 4294967295, %s11271_s0   ;;  %p11218_p0 = scmp.ge.s32.totalorder %s11271_s0, 1  ;;  %s11271_s0 = sphi %s11384_s0, %s29_s0  }
   0x6   : > { %p547_p1 = scmp.lt.s32.totalorder %s11271_s0, 3 }
   0x8   : > { %p548_p2 = pnand %p11218_p0, %p547_p1 }
   0xa   : > { %551 = sbr.rel (%p548_p2) target bundleno = 1622 (0x656), region = 96 }
   0xf   : > { %p608_p3 = scmp.lt.s32.totalorder %s11214_s30, 1  ;;  %v645_v0 = vld [vmem:[%s12828_s5] sm:$0xf]  ;;  %v12844_v1 = vmov 0.0   ;;  %vm646_vm0 = vcmask 261120   ;;  %v11274_v4 = vmov 0  }
  0x10   : > { %722 = vmatprep.mubr.f32.mxu0 %v12844_v1  ;;  %838 = vmatprep.mubr.f32.mxu1 %v12844_v1  ;;  %v1739_v2 = vld [vmem:[%s12829_s6] sm:$0xf]  ;;  %v648_v3 = vsel %vm646_vm0, %v645_v0, 0  ;;  %s12870_s25 = sld [smem:[#allocation32_spill]]  ;;  %s11275_s1 = smov 8   ;;  %vm1788_vm1 = vcmask 31744  }
  0x11   : > { %s12934_s30 = smov (!%p608_p3, %s11214_s30), 1  ;;  %11263 = vset.pattern.permute.xlu0 %v11274_v4  ;;  %11264 = vset.pattern.permute.xlu1 %v11274_v4  ;;  %v11403_v5 = vand.u32 4294901760, %v648_v3  ;;  %s12871_s28 = sld [smem:[#allocation31_spill]]  ;;  %v644_v58 = vld [vmem:[%s12827_s4] sm:$0xf]  ;;  %vm1792_vm4 = vcmask 1043456  }
  0x12   : > { %1742 = vperm.xlu0 %11263, %v1739_v2   ;;  %s11241_s2 = sshll.u32 %s12934_s30, 6  ;;  %v1194_v60 = vsel %vm646_vm0, %v644_v58, 0  ;;  %s11276_s22 = smov 9   ;;  %vm6204_vm11 = vcmask 64512  }
  0x13   : > { %v11412_v6 = vsub.f32 %v648_v3, %v11403_v5  ;;  %v11526_v2 = vand.u32 4294901760, %v1194_v60  ;;  %s11278_s23 = smov 1   ;;  %s11279_s24 = smov 127  }
  0x14   : > { %s11282_s26 = smov 119   ;;  %s11283_s21 = smov 64  }
  0x15   : > { %v725_v21 = vand.u32 4294901760, %v11412_v6 }
  0x16   : > { %s617_s3 = scalar_lea.vmem %s12870_s25, %s11241_s2  ;;  %s11280_s25 = smov 121  }
  0x17   : > { %v638_v7 = vld [vmem:[%s617_s3 + $0x38] sm:$0xff]  ;;  %v637_v8 = vld [vmem:[%s617_s3 + $0x30] sm:$0xff]  ;;  %v636_v9 = vld [vmem:[%s617_s3 + $0x28] sm:$0xff]  ;;  %v726_v27 = vsub.f32 %v11412_v6, %v725_v21  ;;  %s11505_s29 = scalar_lea.vmem %s12871_s28, %s11241_s2  ;;  %s11277_s2 = smov 7  }
  0x18   : > { %v11414_v10 = vand.u32 4294901760, %v638_v7  ;;  %v11416_v11 = vand.u32 4294901760, %v637_v8  ;;  %v11418_v12 = vand.u32 4294901760, %v636_v9  ;;  %v635_v13 = vld [vmem:[%s617_s3 + $0x20] sm:$0xff]  ;;  %v634_v14 = vld [vmem:[%s617_s3 + $0x18] sm:$0xff]  ;;  %v633_v15 = vld [vmem:[%s617_s3 + $0x10] sm:$0xff] }
  0x19   : > { %v11420_v16 = vand.u32 4294901760, %v635_v13  ;;  %v11422_v17 = vand.u32 4294901760, %v634_v14  ;;  %v11424_v18 = vand.u32 4294901760, %v633_v15  ;;  %v632_v19 = vld [vmem:[%s617_s3 + $0x8] sm:$0xff]  ;;  %v631_v20 = vld [vmem:[%s617_s3] sm:$0xff]  ;;  %v727_v35 = vand.u32 4294901760, %v726_v27 }
  0x1a   : > { %675 = vmatprep.subr.mxu0 %v11414_v10  ;;  %v11428_v22 = vand.u32 4294901760, %v632_v19  ;;  %v11431_v23 = vsub.f32 %v638_v7, %v11414_v10  ;;  %v11433_v24 = vand.u32 4294901760, %v631_v20  ;;  %v11436_v25 = vsub.f32 %v637_v8, %v11416_v11  ;;  %v630_v59 = vld [vmem:[%s11505_s29 + $0x38] sm:$0xff]  ;;  %v629_v61 = vld [vmem:[%s11505_s29 + $0x30] sm:$0xff]  ;;  %v628_v63 = vld [vmem:[%s11505_s29 + $0x28] sm:$0xff]  ;;  %s11281_s3 = smov 120  }
  0x1b   : > { %677 = vmatpush1.msra.mxu0 %v11416_v11  ;;  %v11440_v26 = vsub.f32 %v636_v9, %v11418_v12  ;;  %v11446_v28 = vsub.f32 %v635_v13, %v11420_v16  ;;  %v11449_v29 = vsub.f32 %v634_v14, %v11422_v17  ;;  %v11455_v32 = vsub.f32 %v633_v15, %v11424_v18  ;;  %v627_v0 = vld [vmem:[%s11505_s29 + $0x20] sm:$0xff]  ;;  %v626_v4 = vld [vmem:[%s11505_s29 + $0x18] sm:$0xff]  ;;  %v625_v8 = vld [vmem:[%s11505_s29 + $0x10] sm:$0xff] }
  0x1c   : > { %679 = vmatprep.subr.mxu0 %v11418_v12  ;;  %v760_v30 = vand.u32 4294901760, %v11431_v23  ;;  %v766_v31 = vand.u32 4294901760, %v11436_v25  ;;  %v11458_v33 = vsub.f32 %v632_v19, %v11428_v22  ;;  %v11484_v45 = vsub.f32 %v631_v20, %v11433_v24  ;;  %v624_v13 = vld [vmem:[%s11505_s29 + $0x8] sm:$0xff]  ;;  %v623_v19 = vld [vmem:[%s11505_s29] sm:$0xff] }
  0x1d   : > { %681 = vmatpush1.msra.mxu0 %v11420_v16  ;;  %v772_v34 = vand.u32 4294901760, %v11440_v26  ;;  %v778_v36 = vand.u32 4294901760, %v11446_v28  ;;  %v784_v37 = vand.u32 4294901760, %v11449_v29  ;;  %v790_v40 = vand.u32 4294901760, %v11455_v32 }
  0x1e   : > { %683 = vmatprep.subr.mxu0 %v11422_v17  ;;  %v761_v38 = vsub.f32 %v11431_v23, %v760_v30  ;;  %v767_v39 = vsub.f32 %v11436_v25, %v766_v31  ;;  %v796_v41 = vand.u32 4294901760, %v11458_v33  ;;  %v802_v52 = vand.u32 4294901760, %v11484_v45 }
  0x1f   : > { %685 = vmatpush1.msra.mxu0 %v11424_v18  ;;  %v773_v42 = vsub.f32 %v11440_v26, %v772_v34  ;;  %v779_v43 = vsub.f32 %v11446_v28, %v778_v36  ;;  %v785_v44 = vsub.f32 %v11449_v29, %v784_v37  ;;  %v791_v48 = vsub.f32 %v11455_v32, %v790_v40 }
  0x20   : > { %687 = vmatprep.subr.mxu0 %v11428_v22  ;;  %v762_v46 = vand.u32 4294901760, %v761_v38  ;;  %v768_v47 = vand.u32 4294901760, %v767_v39  ;;  %v797_v49 = vsub.f32 %v11458_v33, %v796_v41  ;;  %v803_v55 = vsub.f32 %v11484_v45, %v802_v52 }
  0x21   : > { %689 = vmatpush1.msra.mxu0 %v11433_v24  ;;  %v774_v50 = vand.u32 4294901760, %v773_v42  ;;  %v780_v51 = vand.u32 4294901760, %v779_v43  ;;  %v786_v53 = vand.u32 4294901760, %v785_v44  ;;  %v792_v54 = vand.u32 4294901760, %v791_v48 }
  0x22   : > { %763 = vmatprep.subr.mxu1 %v762_v46  ;;  %872 = vmatprep.subr.mxu0 %v11431_v23  ;;  %v798_v56 = vand.u32 4294901760, %v797_v49  ;;  %v804_v57 = vand.u32 4294901760, %v803_v55  ;;  %v11520_v62 = vand.u32 4294901760, %v630_v59  ;;  %v11530_v3 = vand.u32 4294901760, %v629_v61 }
  0x23   : > { %769 = vmatpush1.msra.mxu1 %v768_v47  ;;  %728 = vmatmul.mubr.f32.vlgmr.msra.gmra.mxu0 %v727_v35  ;;  %v11536_v7 = vand.u32 4294901760, %v628_v63  ;;  %v11542_v9 = vand.u32 4294901760, %v627_v0  ;;  %v11551_v15 = vand.u32 4294901760, %v626_v4  ;;  %v11560_v23 = vand.u32 4294901760, %v625_v8 }
  0x24   : > { %775 = vmatprep.subr.mxu1 %v774_v50  ;;  %875 = vmatpush1.msra.mxu0 %v11436_v25  ;;  %v11546_v14 = vsub.f32 %v630_v59, %v11520_v62  ;;  %v11558_v20 = vsub.f32 %v629_v61, %v11530_v3  ;;  %v11563_v25 = vsub.f32 %v1194_v60, %v11526_v2 }
  0x25   : > { %781 = vmatpush1.msra.mxu1 %v780_v51  ;;  %878 = vmatprep.subr.mxu0 %v11440_v26  ;;  %v11568_v26 = vand.u32 4294901760, %v624_v13  ;;  %v11571_v27 = vsub.f32 %v628_v63, %v11536_v7 }
  0x26   : > { %787 = vmatprep.subr.mxu1 %v786_v53  ;;  %881 = vmatpush1.msra.mxu0 %v11446_v28  ;;  %v11576_v28 = vsub.f32 %v627_v0, %v11542_v9  ;;  %v1312_v35 = vand.u32 4294901760, %v11558_v20 }
  0x27   : > { %793 = vmatpush1.msra.mxu1 %v792_v54  ;;  %884 = vmatprep.subr.mxu0 %v11449_v29  ;;  %v11586_v29 = vsub.f32 %v626_v4, %v11551_v15 }
  0x28   : > { %799 = vmatprep.subr.mxu1 %v798_v56  ;;  %887 = vmatpush1.msra.mxu0 %v11455_v32 }
  0x29   : > { %805 = vmatpush1.msra.mxu1 %v804_v57  ;;  %890 = vmatprep.subr.mxu0 %v11458_v33  ;;  %v1324_v33 = vand.u32 4294901760, %v11576_v28 }
  0x2a   : > { %840 = vmatmul.mubr.f32.vlgmr.msra.gmra.mxu1 %v11403_v5  ;;  %960 = vmatprep.subr.mxu1 %v11414_v10 }
  0x2b   : > { %893 = vmatpush1.msra.mxu0 %v11484_v45  ;;  %926 = vmatprep.mubr.f32.mxu0 %v12844_v1 }
  0x2c   : > { %962 = vmatpush1.msra.mxu1 %v11416_v11  ;;  %929 = vmatmul.mubr.f32.vlgmr.msra.gmra.mxu0 %v11412_v6  ;;  %v1318_v6 = vand.u32 4294901760, %v11571_v27 }
  0x2d   : > { %964 = vmatprep.subr.mxu1 %v11418_v12  ;;  %1044 = vmatprep.subr.mxu0 %v760_v30  ;;  %v1306_v30 = vand.u32 4294901760, %v11546_v14 }
  0x2e   : > { %966 = vmatpush1.msra.mxu1 %v11420_v16  ;;  %1048 = vmatpush1.msra.mxu0 %v766_v31  ;;  %v11579_v31 = vand.u32 4294901760, %v623_v19 }
  0x2f   : > { %968 = vmatprep.subr.mxu1 %v11422_v17  ;;  %1052 = vmatprep.subr.mxu0 %v772_v34  ;;  %v11592_v34 = vsub.f32 %v625_v8, %v11560_v23 }
  0x30   : > { %970 = vmatpush1.msra.mxu1 %v11424_v18  ;;  %1056 = vmatpush1.msra.mxu0 %v778_v36  ;;  %v1271_v36 = vand.u32 4294901760, %v11563_v25  ;;  %v11609_v32 = vsub.f32 %v623_v19, %v11579_v31 }
  0x31   : > { %972 = vmatprep.subr.mxu1 %v11428_v22  ;;  %1060 = vmatprep.subr.mxu0 %v784_v37  ;;  %v1330_v37 = vand.u32 4294901760, %v11586_v29  ;;  %v1336_v39 = vand.u32 4294901760, %v11592_v34 }
  0x32   : > { %974 = vmatpush1.msra.mxu1 %v11433_v24  ;;  %1007 = vmatprep.mubr.f32.mxu1 %v12844_v1  ;;  %v1272_v38 = vsub.f32 %v11563_v25, %v1271_v36  ;;  %v1348_v42 = vand.u32 4294901760, %v11609_v32 }
  0x33   : > { %1064 = vmatpush1.msra.mxu0 %v790_v40  ;;  %1011 = vmatmul.mubr.f32.vlgmr.msra.gmra.mxu1 %v725_v21  ;;  %v11601_v21 = vsub.f32 %v624_v13, %v11568_v26  ;;  %v1337_v44 = vsub.f32 %v11592_v34, %v1336_v39 }
  0x34   : > { %1068 = vmatprep.subr.mxu0 %v796_v41  ;;  %1138 = vmatprep.subr.mxu1 %v11414_v10  ;;  %v1307_v10 = vsub.f32 %v11546_v14, %v1306_v30  ;;  %v1325_v41 = vsub.f32 %v11576_v28, %v1324_v33  ;;  %v1273_v43 = vand.u32 4294901760, %v1272_v38  ;;  %v1349_v46 = vsub.f32 %v11609_v32, %v1348_v42 }
  0x35   : > { %1072 = vmatpush1.msra.mxu0 %v802_v52  ;;  %1105 = vmatprep.mubr.f32.mxu0 %v12844_v1  ;;  %v1338_v48 = vand.u32 4294901760, %v1337_v44 }
  0x36   : > { %1140 = vmatpush1.msra.mxu1 %v11416_v11  ;;  %1107 = vmatmul.mubr.f32.vlgmr.msra.gmra.mxu0 %v11403_v5  ;;  %v1313_v11 = vsub.f32 %v11558_v20, %v1312_v35  ;;  %v1308_v40 = vand.u32 4294901760, %v1307_v10  ;;  %v1350_v49 = vand.u32 4294901760, %v1349_v46 }
  0x37   : > { %1142 = vmatprep.subr.mxu1 %v11418_v12  ;;  %1221 = vmatprep.subr.mxu0 %v11520_v62  ;;  %v1319_v12 = vsub.f32 %v11571_v27, %v1318_v6 }
  0x38   : > { %1144 = vmatpush1.msra.mxu1 %v11420_v16  ;;  %1223 = vmatpush1.msra.mxu0 %v11530_v3  ;;  %v1342_v16 = vand.u32 4294901760, %v11601_v21 }
  0x39   : > { %1146 = vmatprep.subr.mxu1 %v11422_v17  ;;  %1225 = vmatprep.subr.mxu0 %v11536_v7  ;;  %v1331_v17 = vsub.f32 %v11586_v29, %v1330_v37 }
  0x3a   : > { %1148 = vmatpush1.msra.mxu1 %v11424_v18  ;;  %1227 = vmatpush1.msra.mxu0 %v11542_v9  ;;  %v1314_v18 = vand.u32 4294901760, %v1313_v11  ;;  %v1343_v45 = vsub.f32 %v11601_v21, %v1342_v16 }
  0x3b   : > { %1150 = vmatprep.subr.mxu1 %v11428_v22  ;;  %1229 = vmatprep.subr.mxu0 %v11551_v15  ;;  %v1320_v22 = vand.u32 4294901760, %v1319_v12  ;;  %v1332_v47 = vand.u32 4294901760, %v1331_v17  ;;  %v11225_v17 = vld [vmem:[%s12830_s7 + $0x8] sm:$0xff] }
  0x3c   : > { %1152 = vmatpush1.msra.mxu1 %v11433_v24  ;;  %1185 = vmatprep.mubr.f32.mxu1 %v12844_v1  ;;  %v1326_v24 = vand.u32 4294901760, %v1325_v41 }
  0x3d   : > { %1231 = vmatpush1.msra.mxu0 %v11560_v23  ;;  %1187 = vmatmul.mubr.f32.vlgmr.msra.gmra.mxu1 %v11403_v5  ;;  %v1344_v5 = vand.u32 4294901760, %v1343_v45 }
  0x3e   : > { %1233 = vmatprep.subr.mxu0 %v11568_v26  ;;  %1309 = vmatprep.subr.mxu1 %v1308_v40 }
  0x3f   : > { %1235 = vmatpush1.msra.mxu0 %v11579_v31  ;;  %1268 = vmatprep.mubr.f32.mxu0 %v12844_v1 }
  0x40   : > { %1315 = vmatpush1.msra.mxu1 %v1314_v18  ;;  %1274 = vmatmul.mubr.f32.vlgmr.msra.gmra.mxu0 %v1273_v43  ;;  %v1790_v18 = vsel %vm1788_vm1, %v11225_v17, 0  ;;  %v1753_v43 = vlaneseq }
  0x41   : > { %1321 = vmatprep.subr.mxu1 %v1320_v22  ;;  %1418 = vmatprep.subr.mxu0 %v11546_v14  ;;  %v11730_v44 = vand.u32 4294901760, %v1790_v18 }
  0x42   : > { %1327 = vmatpush1.msra.mxu1 %v1326_v24  ;;  %1421 = vmatpush1.msra.mxu0 %v11558_v20  ;;  %v11732_v22 = vshrl.u32 %v1753_v43, 7  ;;  %v11737_v24 = vand.u32 127, %v1753_v43 }
  0x43   : > { %1333 = vmatprep.subr.mxu1 %v1332_v47  ;;  %1424 = vmatprep.subr.mxu0 %v11571_v27  ;;  %v11735_v45 = vsub.f32 %v1790_v18, %v11730_v44  ;;  %v6186_v47 = vld [vmem:[%s12831_s8] sm:$0xff] }
  0x44   : > { %1339 = vmatpush1.msra.mxu1 %v1338_v48  ;;  %1427 = vmatpush1.msra.mxu0 %v11576_v28  ;;  %12874 = vst [vmem:[#allocation4_spill] sm:$0xff] %v11732_v22  ;;  %12875 = vst [vmem:[#allocation5_spill] sm:$0xff] %v11737_v24  ;;  %v1778_v46 = vsub.s32 1, %v11732_v22  ;;  %vm1773_vm2 = vcmp.lt.s32.totalorder %v11737_v24, 8  ;;  %vm1755_vm3 = vcmp.lt.s32.totalorder %v11737_v24, 9  ;;  %vm2742_vm5 = vcmp.lt.s32.totalorder %v11737_v24, 7 }
  0x45   : > { %1345 = vmatprep.subr.mxu1 %v1344_v5  ;;  %1430 = vmatprep.subr.mxu0 %v11586_v29  ;;  %vm3237_vm6 = vcmp.lt.s32.totalorder %v11737_v24, 1  ;;  %vm4210_vm7 = vcmp.lt.s32.totalorder %v11737_v24, 127  ;;  %vm4705_vm8 = vcmp.lt.s32.totalorder %v11737_v24, 121  ;;  %vm5200_vm9 = vcmp.lt.s32.totalorder %v11737_v24, 120 }
  0x46   : > { %1351 = vmatpush1.msra.mxu1 %v1350_v49  ;;  %1384 = vmatprep.mubr.f32.mxu1 %v12844_v1  ;;  %v1868_v49 = vand.u32 4294901760, %v11735_v45  ;;  %vm5695_vm10 = vcmp.lt.s32.totalorder %v11737_v24, 119 }
  0x47   : > { %1433 = vmatpush1.msra.mxu0 %v11592_v34  ;;  %1386 = vmatmul.mubr.f32.vlgmr.msra.gmra.mxu1 %v11526_v2 }
  0x48   : > { %1436 = vmatprep.subr.mxu0 %v11601_v21  ;;  %1506 = vmatprep.subr.mxu1 %v11520_v62 }
  0x49   : > { %1439 = vmatpush1.msra.mxu0 %v11609_v32  ;;  %1472 = vmatprep.mubr.f32.mxu0 %v12844_v1 }
  0x4a   : > { %1508 = vmatpush1.msra.mxu1 %v11530_v3  ;;  %1475 = vmatmul.mubr.f32.vlgmr.msra.gmra.mxu0 %v11563_v25 }
  0x4b   : > { %1510 = vmatprep.subr.mxu1 %v11536_v7  ;;  %1590 = vmatprep.subr.mxu0 %v1306_v30 }
  0x4c   : > { %1512 = vmatpush1.msra.mxu1 %v11542_v9  ;;  %1594 = vmatpush1.msra.mxu0 %v1312_v35 }
  0x4d   : > { %1514 = vmatprep.subr.mxu1 %v11551_v15  ;;  %1598 = vmatprep.subr.mxu0 %v1318_v6 }
  0x4e   : > { %1516 = vmatpush1.msra.mxu1 %v11560_v23  ;;  %1602 = vmatpush1.msra.mxu0 %v1324_v33 }
  0x4f   : > { %1518 = vmatprep.subr.mxu1 %v11568_v26  ;;  %1606 = vmatprep.subr.mxu0 %v1330_v37 }
  0x50   : > { %1520 = vmatpush1.msra.mxu1 %v11579_v31  ;;  %1553 = vmatprep.mubr.f32.mxu1 %v12844_v1 }
  0x51   : > { %1610 = vmatpush1.msra.mxu0 %v1336_v39  ;;  %1557 = vmatmul.mubr.f32.vlgmr.msra.gmra.mxu1 %v1271_v36 }
  0x52   : > { %1614 = vmatprep.subr.mxu0 %v1342_v16  ;;  %1684 = vmatprep.subr.mxu1 %v11520_v62 }
  0x53   : > { %1618 = vmatpush1.msra.mxu0 %v1348_v42  ;;  %1651 = vmatprep.mubr.f32.mxu0 %v12844_v1 }
  0x54   : > { %1686 = vmatpush1.msra.mxu1 %v11530_v3  ;;  %1653 = vmatmul.mubr.f32.vlgmr.msra.gmra.mxu0 %v11526_v2 }
  0x55   : > { %1688 = vmatprep.subr.mxu1 %v11536_v7  ;;  %1731 = vmatprep.mubr.f32.mxu1 %v12844_v1 }
  0x56   : > { %1690 = vmatpush1.msra.mxu1 %v11542_v9  ;;  %1865 = vmatprep.mubr.f32.mxu0 %v12844_v1 }
  0x57   : > { %1692 = vmatprep.subr.mxu1 %v11551_v15 }
  0x58   : > { %1694 = vmatpush1.msra.mxu1 %v11560_v23 }
  0x59   : > { %1696 = vmatprep.subr.mxu1 %v11568_v26 }
  0x5a   : > { %1698 = vmatpush1.msra.mxu1 %v11579_v31 }
  0x5b   : > { %1733 = vmatmul.mubr.f32.vlgmr.msra.gmra.mxu1 %v11526_v2 }
  0x5c   : > { %1951 = vmatprep.mubr.f32.mxu1 %v12844_v1 }
  0x8d   : > { %v1743_v37 = vpop.permute.xlu0 %1742 }
  0xe3   : > { %v729_v50 = vpop.f32.mrf.mxu0 }
  0xe5   : > { %v731_v51 = vpop.f32.mrf.mxu0 }
  0xea   : > { %v841_v52 = vpop.f32.mrf.mxu1 }
  0xeb   : > { %v842_v55 = vadd.f32 %v841_v52, %v729_v50  ;;  %v1768_v50 = vld [vmem:[%s12830_s7] sm:$0xff] }
  0xec   : > { %v843_v53 = vpop.f32.mrf.mxu1  ;;  %v930_v54 = vpop.f32.mrf.mxu0 }
  0xed   : > { %v844_v57 = vadd.f32 %v843_v53, %v731_v51  ;;  %v931_v59 = vadd.f32 %v930_v54, %v842_v55  ;;  %v11758_v51 = vsub.s32 0, %v11732_v22  ;;  %v2265_v55 = vsel %vm1788_vm1, %v1768_v50, 0 }
  0xee   : > { %v932_v58 = vpop.f32.mrf.mxu0 }
  0xef   : > { %v933_v62 = vadd.f32 %v932_v58, %v844_v57  ;;  %12877 = vst [vmem:[#allocation6_spill] sm:$0xff] %v11758_v51  ;;  %v1869_v57 = vsub.f32 %v11735_v45, %v1868_v49 }
  0xf3   : > { %v1012_v56 = vpop.f32.mrf.mxu1 }
  0xf4   : > { %v1013_v63 = vadd.f32 %v1012_v56, %v931_v59 }
  0xf5   : > { %v1014_v60 = vpop.f32.mrf.mxu1 }
  0xf6   : > { %v1108_v61 = vpop.f32.mrf.mxu0  ;;  %v1015_v3 = vadd.f32 %v1014_v60, %v933_v62 }
  0xf7   : > { %v1109_v2 = vadd.f32 %v1108_v61, %v1013_v63 }
  0xf8   : > { %v1110_v4 = vpop.f32.mrf.mxu0 }
  0xf9   : > { %v1111_v9 = vadd.f32 %v1110_v4, %v1015_v3  ;;  %v11772_v3 = vand.u32 4294901760, %v2265_v55  ;;  %v11775_v4 = vsub.s32 2, %v11732_v22 }
  0xfb   : > { %12878 = vst [vmem:[#allocation7_spill] sm:$0xff] %v11775_v4 }
  0xfd   : > { %v1188_v0 = vpop.f32.mrf.mxu1 }
  0xfe   : > { %v1189_v13 = vadd.f32 %v1188_v0, %v1109_v2 }
  0xff   : > { %v1190_v7 = vpop.f32.mrf.mxu1 }
 0x100   : > { %v1275_v8 = vpop.f32.mrf.mxu0  ;;  %v1191_v15 = vadd.f32 %v1190_v7, %v1111_v9  ;;  %v1870_v9 = vand.u32 4294901760, %v1869_v57 }
 0x101   : > { %v1276_v20 = vadd.f32 %v1275_v8, %v1189_v13 }
 0x102   : > { %v1277_v19 = vpop.f32.mrf.mxu0 }
 0x103   : > { %v1278_v26 = vadd.f32 %v1277_v19, %v1191_v15 }
 0x107   : > { %v1387_v14 = vpop.f32.mrf.mxu1 }
 0x108   : > { %v1388_v27 = vadd.f32 %v1387_v14, %v1276_v20 }
 0x109   : > { %v1389_v23 = vpop.f32.mrf.mxu1 }
 0x10a   : > { %v1476_v25 = vpop.f32.mrf.mxu0  ;;  %v1390_v30 = vadd.f32 %v1389_v23, %v1278_v26 }
 0x10b   : > { %v1477_v29 = vadd.f32 %v1476_v25, %v1388_v27  ;;  %v11789_v25 = vsub.f32 %v2265_v55, %v11772_v3 }
 0x10c   : > { %v1478_v31 = vpop.f32.mrf.mxu0 }
 0x10d   : > { %v1479_v36 = vadd.f32 %v1478_v31, %v1390_v30  ;;  %v11226_v30 = vld [vmem:[%s12830_s7 + $0x10] sm:$0xff] }
 0x111   : > { %v1558_v28 = vpop.f32.mrf.mxu1 }
 0x112   : > { %v1559_v6 = vadd.f32 %v1558_v28, %v1477_v29 }
 0x113   : > { %v1560_v34 = vpop.f32.mrf.mxu1 }
 0x114   : > { %v1654_v35 = vpop.f32.mrf.mxu0  ;;  %v1561_v21 = vadd.f32 %v1560_v34, %v1479_v36 }
 0x115   : > { %v1655_v32 = vadd.f32 %v1654_v35, %v1559_v6 }
 0x116   : > { %v1656_v10 = vpop.f32.mrf.mxu0 }
 0x117   : > { %v1657_v11 = vadd.f32 %v1656_v10, %v1561_v21 }
 0x11b   : > { %v1734_v33 = vpop.f32.mrf.mxu1 }
 0x11c   : > { %v1735_v38 = vadd.f32 %v1734_v33, %v1655_v32 }
 0x11d   : > { %v1736_v39 = vpop.f32.mrf.mxu1 }
 0x11e   : > { %v1745_v12 = vadd.f32 %v1743_v37, %v1735_v38  ;;  %v1737_v16 = vadd.f32 %v1736_v39, %v1657_v11  ;;  %v2758_v11 = vsel %vm1788_vm1, %v11226_v30, 0 }
 0x11f   : > { %v11820_v18 = vand.u32 4294901760, %v2758_v11 }
 0x120   : > { %v11706_v40 = vmax.f32 %v1745_v12, 0.0  ;;  %v1746_v41 = vadd.f32 %v1743_v37, %v1737_v16  ;;  %v2342_v37 = vand.u32 4294901760, %v11789_v25 }
 0x121   : > { %v11833_v57 = vsub.f32 %v2758_v11, %v11820_v18 }
 0x122   : > { %12872 = vst [vmem:[#allocation2_spill] sm:$0xff] %v11706_v40  ;;  %v11708_v42 = vmax.f32 %v1746_v41, 0.0  ;;  %1769 = vrot.lane.b32.xlu0 %v11706_v40, %s11275_s1  ;;  %v2343_v50 = vsub.f32 %v11789_v25, %v2342_v37 }
 0x124   : > { %12873 = vst [vmem:[#allocation3_spill] sm:$0xff] %v11708_v42  ;;  %1771 = vrot.lane.b32.xlu1 %v11708_v42, %s11275_s1 }
 0x126   : > { %1751 = vrot.lane.b32.xlu0 %v11708_v42, %s11276_s22 }
 0x128   : > { %1749 = vrot.lane.b32.xlu1 %v11706_v40, %s11276_s22  ;;  %s12876_s22 = sld [smem:[#allocation33_spill]] }
 0x12a   : > { %2740 = vrot.lane.b32.xlu0 %v11708_v42, %s11277_s2 }
 0x12c   : > { %2738 = vrot.lane.b32.xlu1 %v11706_v40, %s11277_s2  ;;  %s11243_s2 = sshll.u32 %s12934_s30, 5 }
 0x12e   : > { %3235 = vrot.lane.b32.xlu0 %v11708_v42, %s11278_s23  ;;  %v11746_v48 = vld [vmem:[%s12876_s22] sm:$0xff]  ;;  %v11751_v5 = vld [vmem:[%s12876_s22 + $0x8] sm:$0xff] }
 0x12f   : > { %v1779_v53 = vrot.slane %v11746_v48, %v1778_v46  ;;  %v1783_v54 = vrot.slane %v11751_v5, %v1778_v46  ;;  %v1761_v60 = vrot.slane %v11746_v48, %v11758_v51  ;;  %v1765_v0 = vrot.slane %v11751_v5, %v11758_v51 }
 0x130   : > { %3233 = vrot.lane.b32.xlu1 %v11706_v40, %s11278_s23  ;;  %v2752_v27 = vrot.slane %v11751_v5, %v11775_v4  ;;  %v2748_v21 = vrot.slane %v11746_v48, %v11775_v4 }
 0x132   : > { %4208 = vrot.lane.b32.xlu0 %v11708_v42, %s11279_s24 }
 0x134   : > { %4206 = vrot.lane.b32.xlu1 %v11706_v40, %s11279_s24 }
 0x136   : > { %4703 = vrot.lane.b32.xlu0 %v11708_v42, %s11280_s25 }
 0x138   : > { %4701 = vrot.lane.b32.xlu1 %v11706_v40, %s11280_s25  ;;  %s622_s25 = scalar_lea.vmem %s12842_s19, %s11243_s2 }
 0x13a   : > { %5198 = vrot.lane.b32.xlu0 %v11708_v42, %s11281_s3 }
 0x13c   : > { %5196 = vrot.lane.b32.xlu1 %v11706_v40, %s11281_s3 }
 0x13e   : > { %5693 = vrot.lane.b32.xlu0 %v11708_v42, %s11282_s26 }
 0x140   : > { %5691 = vrot.lane.b32.xlu1 %v11706_v40, %s11282_s26  ;;  %s12921_s26 = sld [smem:[#allocation34_spill]] }
 0x144   : > { %6189 = vperm.xlu1 %11264, %v6186_v47  }
 0x194   : > { %v1770_v52 = vpop.permute.xlu0 %1769 }
 0x196   : > { %v1772_v56 = vpop.permute.xlu1 %1771 }
 0x197   : > { %v1774_v58 = vsel %vm1773_vm2, %v1770_v52, %v1772_v56  ;;  %v1775_v59 = vsel %vm1773_vm2, %v1772_v56, %v1770_v52 }
 0x198   : > { %v1784_v61 = vmul.f32 %v1779_v53, %v1775_v59  ;;  %v1785_v62 = vmul.f32 %v1783_v54, %v1774_v58  ;;  %v1752_v63 = vpop.permute.xlu0 %1751  ;;  %v3242_v53 = vsub.s32 3, %v11732_v22 }
 0x19a   : > { %v1794_v2 = vsel %vm1792_vm4, %v1784_v61, 0  ;;  %v1797_v7 = vsel %vm1792_vm4, %v1785_v62, 0  ;;  %v1750_v8 = vpop.permute.xlu1 %1749 }
 0x19b   : > { %v11779_v13 = vand.u32 4294901760, %v1797_v7  ;;  %v11781_v14 = vand.u32 4294901760, %v1794_v2  ;;  %v1756_v15 = vsel %vm1755_vm3, %v1750_v8, %v1752_v63  ;;  %v1757_v19 = vsel %vm1755_vm3, %v1752_v63, %v1750_v8 }
 0x19c   : > { %v1766_v20 = vmul.f32 %v1761_v60, %v1757_v19  ;;  %v1767_v23 = vmul.f32 %v1765_v0, %v1756_v15  ;;  %v2741_v34 = vpop.permute.xlu0 %2740  ;;  %v2344_v60 = vand.u32 4294901760, %v2343_v50  ;;  %v3247_v63 = vrot.slane %v11751_v5, %v3242_v53 }
 0x19d   : > { %v1914_v26 = vsub.f32 %v1794_v2, %v11781_v14  ;;  %1830 = vmatprep.subr.mxu0 %v11779_v13  ;;  %v1908_v28 = vsub.f32 %v1797_v7, %v11779_v13  ;;  %v11227_v2 = vld [vmem:[%s12830_s7 + $0x18] sm:$0xff]  ;;  %v3243_v15 = vrot.slane %v11746_v48, %v3242_v53 }
 0x19e   : > { %v2268_v31 = vsel %vm1792_vm4, %v1766_v20, 0  ;;  %v2271_v29 = vsel %vm1792_vm4, %v1767_v23, 0  ;;  %v2739_v35 = vpop.permute.xlu1 %2738  ;;  %1832 = vmatpush1.msra.mxu0 %v11781_v14 }
 0x19f   : > { %v11802_v36 = vand.u32 4294901760, %v2271_v29  ;;  %v11804_v6 = vand.u32 4294901760, %v2268_v31  ;;  %v2743_v10 = vsel %vm2742_vm5, %v2739_v35, %v2741_v34  ;;  %1871 = vmatmul.mubr.f32.vlgmr.msra.gmra.mxu0 %v1870_v9  ;;  %1991 = vmatprep.subr.mxu0 %v1908_v28  ;;  %v1909_v32 = vand.u32 4294901760, %v1908_v28 }
 0x1a0   : > { %1994 = vmatpush1.msra.mxu0 %v1914_v26  ;;  %2027 = vmatprep.mubr.f32.mxu0 %v12844_v1  ;;  %v1915_v33 = vand.u32 4294901760, %v1914_v26  ;;  %v2744_v38 = vsel %vm2742_vm5, %v2741_v34, %v2739_v35  ;;  %v2754_v39 = vmul.f32 %v2752_v27, %v2743_v10  ;;  %v3236_v62 = vpop.permute.xlu0 %3235  ;;  %v2835_v9 = vand.u32 4294901760, %v11833_v57 }
 0x1a1   : > { %v2382_v12 = vsub.f32 %v2271_v29, %v11802_v36  ;;  %2145 = vmatprep.subr.mxu0 %v1909_v32  ;;  %v1910_v16 = vsub.f32 %v1908_v28, %v1909_v32  ;;  %v11817_v17 = vsub.f32 %v2268_v31, %v11804_v6  ;;  %v2753_v43 = vmul.f32 %v2748_v21, %v2744_v38  ;;  %v11228_v32 = vld [vmem:[%s12830_s7 + $0x20] sm:$0xff] }
 0x1a2   : > { %v1916_v41 = vsub.f32 %v1914_v26, %v1915_v33  ;;  %v2764_v52 = vsel %vm1792_vm4, %v2754_v39, 0  ;;  %v3234_v55 = vpop.permute.xlu1 %3233  ;;  %v3253_v26 = vsel %vm1788_vm1, %v11227_v2, 0 }
 0x1a3   : > { %2030 = vmatmul.mubr.f32.vlgmr.msra.gmra.mxu0 %v11735_v45  ;;  %v1911_v46 = vand.u32 4294901760, %v1910_v16  ;;  %v2383_v54 = vand.u32 4294901760, %v2382_v12  ;;  %v2389_v56 = vand.u32 4294901760, %v11817_v17  ;;  %v2761_v58 = vsel %vm1792_vm4, %v2753_v43, 0 }
 0x1a4   : > { %2149 = vmatpush1.msra.mxu0 %v1915_v33  ;;  %v1917_v47 = vand.u32 4294901760, %v1916_v41  ;;  %2182 = vmatprep.mubr.f32.mxu0 %v12844_v1  ;;  %v11836_v59 = vand.u32 4294901760, %v2764_v52  ;;  %v3238_v0 = vsel %vm3237_vm6, %v3234_v55, %v3236_v62  ;;  %v11849_v7 = vand.u32 4294901760, %v2761_v58 }
 0x1a5   : > { %2304 = vmatprep.subr.mxu0 %v11802_v36  ;;  %1912 = vmatprep.subr.mxu1 %v1911_v46  ;;  %v2384_v61 = vsub.f32 %v2382_v12, %v2383_v54  ;;  %v2390_v8 = vsub.f32 %v11817_v17, %v2389_v56  ;;  %v3239_v20 = vsel %vm3237_vm6, %v3236_v62, %v3234_v55  ;;  %v11872_v30 = vand.u32 4294901760, %v3253_v26  ;;  %v4209_v55 = vpop.permute.xlu0 %4208 }
 0x1a6   : > { %1918 = vmatpush1.msra.mxu1 %v1917_v47  ;;  %v2875_v19 = vsub.f32 %v2764_v52, %v11836_v59  ;;  %v3249_v23 = vmul.f32 %v3247_v63, %v3238_v0  ;;  %v2881_v27 = vsub.f32 %v2761_v58, %v11849_v7  ;;  %v3248_v28 = vmul.f32 %v3243_v15, %v3239_v20  ;;  %v11229_v58 = vld [vmem:[%s12830_s7 + $0x28] sm:$0xff] }
 0x1a7   : > { %2184 = vmatmul.mubr.f32.vlgmr.msra.gmra.mxu0 %v11730_v44  ;;  %1953 = vmatmul.mubr.f32.vlgmr.msra.gmra.mxu1 %v11730_v44  ;;  %v2391_v45 = vand.u32 4294901760, %v2390_v8  ;;  %v11885_v10 = vsub.f32 %v3253_v26, %v11872_v30  ;;  %v3737_v43 = vsel %vm1792_vm4, %v11708_v42, 0  ;;  %v3734_v47 = vsel %vm1792_vm4, %v11706_v40, 0 }
 0x1a8   : > { %2067 = vmatprep.subr.mxu1 %v11779_v13  ;;  %2306 = vmatpush1.msra.mxu0 %v11804_v6  ;;  %v3259_v31 = vsel %vm1792_vm4, %v3249_v23, 0  ;;  %v2882_v34 = vand.u32 4294901760, %v2881_v27  ;;  %v11928_v53 = vand.u32 4294901760, %v3737_v43  ;;  %v11946_v63 = vand.u32 4294901760, %v3734_v47 }
 0x1a9   : > { %2069 = vmatpush1.msra.mxu1 %v11781_v14  ;;  %2465 = vmatprep.subr.mxu0 %v2382_v12  ;;  %v11880_v35 = vand.u32 4294901760, %v3259_v31  ;;  %v3731_v12 = vsel %vm1788_vm1, %v11228_v32, 0  ;;  %v4226_v8 = vsel %vm1788_vm1, %v11229_v58, 0  ;;  %v11230_v32 = vld [vmem:[%s12830_s7 + $0x30] sm:$0xff] }
 0x1aa   : > { %2221 = vmatprep.subr.mxu1 %v11779_v13  ;;  %2102 = vmatprep.mubr.f32.mxu1 %v12844_v1  ;;  %v2385_v13 = vand.u32 4294901760, %v2384_v61  ;;  %v2883_v11 = vsub.f32 %v2881_v27, %v2882_v34  ;;  %v11913_v41 = vand.u32 4294901760, %v3731_v12  ;;  %12879 = vst [vmem:[#allocation8_spill] sm:$0xff] %v11928_v53  ;;  %12880 = vst [vmem:[#allocation9_spill] sm:$0xff] %v11946_v63 }
 0x1ab   : > { %2339 = vmatprep.mubr.f32.mxu0 %v12844_v1  ;;  %2106 = vmatmul.mubr.f32.vlgmr.msra.gmra.mxu1 %v1868_v49  ;;  %v2836_v49 = vsub.f32 %v11833_v57, %v2835_v9  ;;  %v3370_v39 = vsub.f32 %v3259_v31, %v11880_v35  ;;  %v11951_v2 = vsub.f32 %v3737_v43, %v11928_v53 }
 0x1ac   : > { %2345 = vmatmul.mubr.f32.vlgmr.msra.gmra.mxu0 %v2344_v60  ;;  %2223 = vmatpush1.msra.mxu1 %v11781_v14  ;;  %v2876_v14 = vand.u32 4294901760, %v2875_v19 }
 0x1ad   : > { %2468 = vmatpush1.msra.mxu0 %v11817_v17  ;;  %2386 = vmatprep.subr.mxu1 %v2385_v13  ;;  %v2837_v29 = vand.u32 4294901760, %v2836_v49  ;;  %v4215_v17 = vsub.s32 5, %v11732_v22  ;;  %12881 = vst [vmem:[#allocation10_spill] sm:$0xff] %v11951_v2  ;;  %v11972_v23 = vand.u32 4294901760, %v11951_v2 }
 0x1ae   : > { %2619 = vmatprep.subr.mxu0 %v2383_v54  ;;  %2256 = vmatprep.mubr.f32.mxu1 %v12844_v1  ;;  %v2877_v21 = vsub.f32 %v2875_v19, %v2876_v14  ;;  %v11931_v54 = vsub.f32 %v3731_v12, %v11913_v41 }
 0x1af   : > { %2501 = vmatprep.mubr.f32.mxu0 %v12844_v1  ;;  %2258 = vmatmul.mubr.f32.vlgmr.msra.gmra.mxu1 %v11730_v44  ;;  %v3256_v44 = vsel %vm1792_vm4, %v3248_v28, 0  ;;  %v4216_v61 = vrot.slane %v11746_v48, %v4215_v17  ;;  %12883 = vst [vmem:[#allocation12_spill] sm:$0xff] %v11972_v23 }
 0x1b0   : > { %2504 = vmatmul.mubr.f32.vlgmr.msra.gmra.mxu0 %v11789_v25  ;;  %2392 = vmatpush1.msra.mxu1 %v2391_v45  ;;  %v11893_v33 = vand.u32 4294901760, %v3256_v44  ;;  %v2878_v38 = vand.u32 4294901760, %v2877_v21  ;;  %v2884_v25 = vand.u32 4294901760, %v2883_v11 }
 0x1b1   : > { %2623 = vmatpush1.msra.mxu0 %v2389_v56  ;;  %2541 = vmatprep.subr.mxu1 %v11802_v36  ;;  %v4220_v56 = vrot.slane %v11751_v5, %v4215_v17 }
 0x1b2   : > { %2797 = vmatprep.subr.mxu0 %v11836_v59  ;;  %2425 = vmatprep.mubr.f32.mxu1 %v12844_v1  ;;  %v11904_v16 = vsub.f32 %v3256_v44, %v11893_v33 }
 0x1b3   : > { %2656 = vmatprep.mubr.f32.mxu0 %v12844_v1  ;;  %2427 = vmatmul.mubr.f32.vlgmr.msra.gmra.mxu1 %v11772_v3 }
 0x1b4   : > { %2658 = vmatmul.mubr.f32.vlgmr.msra.gmra.mxu0 %v11772_v3  ;;  %2543 = vmatpush1.msra.mxu1 %v11804_v6  ;;  %v3377_v46 = vand.u32 4294901760, %v11904_v16 }
 0x1b5   : > { %2799 = vmatpush1.msra.mxu0 %v11849_v7  ;;  %2695 = vmatprep.subr.mxu1 %v11802_v36  ;;  %v3330_v36 = vand.u32 4294901760, %v11885_v10 }
 0x1b6   : > { %2958 = vmatprep.subr.mxu0 %v2875_v19  ;;  %2576 = vmatprep.mubr.f32.mxu1 %v12844_v1  ;;  %v3378_v62 = vsub.f32 %v11904_v16, %v3377_v46  ;;  %v11964_v19 = vand.u32 4294901760, %v4226_v8 }
 0x1b7   : > { %2832 = vmatprep.mubr.f32.mxu0 %v12844_v1  ;;  %2580 = vmatmul.mubr.f32.vlgmr.msra.gmra.mxu1 %v2342_v37  ;;  %v3371_v37 = vand.u32 4294901760, %v3370_v39 }
 0x1b8   : > { %2838 = vmatmul.mubr.f32.vlgmr.msra.gmra.mxu0 %v2837_v29  ;;  %2697 = vmatpush1.msra.mxu1 %v11804_v6  ;;  %v3331_v6 = vsub.f32 %v11885_v10, %v3330_v36  ;;  %v11987_v49 = vsub.f32 %v4226_v8, %v11964_v19  ;;  %v3850_v29 = vsub.f32 %v11951_v2, %v11972_v23 }
 0x1b9   : > { %2961 = vmatpush1.msra.mxu0 %v2881_v27  ;;  %2879 = vmatprep.subr.mxu1 %v2878_v38  ;;  %v3372_v52 = vsub.f32 %v3370_v39, %v3371_v37  ;;  %v11976_v27 = vsub.s32 6, %v11732_v22 }
 0x1ba   : > { %3112 = vmatprep.subr.mxu0 %v2876_v14  ;;  %2730 = vmatprep.mubr.f32.mxu1 %v12844_v1  ;;  %v3332_v50 = vand.u32 4294901760, %v3331_v6  ;;  %v12018_v12 = vand.u32 4294901760, %v3850_v29 }
 0x1bb   : > { %2994 = vmatprep.mubr.f32.mxu0 %v12844_v1  ;;  %2732 = vmatmul.mubr.f32.vlgmr.msra.gmra.mxu1 %v11772_v3  ;;  %v4207_v3 = vpop.permute.xlu1 %4206  ;;  %v3373_v0 = vand.u32 4294901760, %v3372_v52  ;;  %12884 = vst [vmem:[#allocation13_spill] sm:$0xff] %v11976_v27  ;;  %v4715_v44 = vrot.slane %v11751_v5, %v11976_v27 }
 0x1bc   : > { %2997 = vmatmul.mubr.f32.vlgmr.msra.gmra.mxu0 %v11833_v57  ;;  %2885 = vmatpush1.msra.mxu1 %v2884_v25  ;;  %v4212_v60 = vsel %vm4210_vm7, %v4209_v55, %v4207_v3  ;;  %v4211_v15 = vsel %vm4210_vm7, %v4207_v3, %v4209_v55  ;;  %v3379_v57 = vand.u32 4294901760, %v3378_v62  ;;  %12886 = vst [vmem:[#allocation15_spill] sm:$0xff] %v12018_v12 }
 0x1bd   : > { %3116 = vmatpush1.msra.mxu0 %v2882_v34  ;;  %3034 = vmatprep.subr.mxu1 %v11836_v59  ;;  %v4222_v13 = vmul.f32 %v4220_v56, %v4212_v60  ;;  %v4221_v20 = vmul.f32 %v4216_v61, %v4211_v15  ;;  %v4704_v34 = vpop.permute.xlu0 %4703 }
 0x1be   : > { %3292 = vmatprep.subr.mxu0 %v11880_v35  ;;  %2918 = vmatprep.mubr.f32.mxu1 %v12844_v1 }
 0x1bf   : > { %3149 = vmatprep.mubr.f32.mxu0 %v12844_v1  ;;  %2920 = vmatmul.mubr.f32.vlgmr.msra.gmra.mxu1 %v11820_v18  ;;  %v4232_v26 = vsel %vm1792_vm4, %v4222_v13, 0  ;;  %v4229_v28 = vsel %vm1792_vm4, %v4221_v20, 0 }
 0x1c0   : > { %3151 = vmatmul.mubr.f32.vlgmr.msra.gmra.mxu0 %v11820_v18  ;;  %3036 = vmatpush1.msra.mxu1 %v11849_v7  ;;  %v11990_v14 = vand.u32 4294901760, %v4232_v26  ;;  %v12007_v11 = vand.u32 4294901760, %v4229_v28 }
 0x1c1   : > { %3294 = vmatpush1.msra.mxu0 %v11893_v33  ;;  %3188 = vmatprep.subr.mxu1 %v11836_v59  ;;  %v3808_v59 = vand.u32 4294901760, %v11931_v54  ;;  %v5199_v61 = vpop.permute.xlu0 %5198 }
 0x1c2   : > { %3453 = vmatprep.subr.mxu0 %v3370_v39  ;;  %3069 = vmatprep.mubr.f32.mxu1 %v12844_v1  ;;  %v4303_v39 = vand.u32 4294901760, %v11987_v49 }
 0x1c3   : > { %3327 = vmatprep.mubr.f32.mxu0 %v12844_v1  ;;  %3073 = vmatmul.mubr.f32.vlgmr.msra.gmra.mxu1 %v2835_v9  ;;  %v11962_v9 = vsub.f32 %v3734_v47, %v11946_v63  ;;  %v5205_v47 = vsub.s32 7, %v11732_v22 }
 0x1c4   : > { %3333 = vmatmul.mubr.f32.vlgmr.msra.gmra.mxu0 %v3332_v50  ;;  %3190 = vmatpush1.msra.mxu1 %v11849_v7  ;;  %v3809_v7 = vsub.f32 %v11931_v54, %v3808_v59 }
 0x1c5   : > { %3456 = vmatpush1.msra.mxu0 %v11904_v16  ;;  %3374 = vmatprep.subr.mxu1 %v3373_v0  ;;  %12882 = vst [vmem:[#allocation11_spill] sm:$0xff] %v11962_v9  ;;  %v11984_v45 = vand.u32 4294901760, %v11962_v9  ;;  %v4343_v16 = vsub.f32 %v4232_v26, %v11990_v14  ;;  %v5210_v62 = vrot.slane %v11751_v5, %v5205_v47  ;;  %v11231_v0 = vld [vmem:[%s12830_s7 + $0x38] sm:$0xff] }
 0x1c6   : > { %3607 = vmatprep.subr.mxu0 %v3371_v37  ;;  %3223 = vmatprep.mubr.f32.mxu1 %v12844_v1  ;;  %v3810_v31 = vand.u32 4294901760, %v3809_v7  ;;  %v4721_v37 = vsel %vm1788_vm1, %v11230_v32, 0  ;;  %v5206_v13 = vrot.slane %v11746_v48, %v5205_v47  ;;  %v5216_v26 = vsel %vm1788_vm1, %v11231_v0, 0 }
 0x1c7   : > { %3489 = vmatprep.mubr.f32.mxu0 %v12844_v1  ;;  %3225 = vmatmul.mubr.f32.vlgmr.msra.gmra.mxu1 %v11820_v18  ;;  %v4702_v18 = vpop.permute.xlu1 %4701  ;;  %12885 = vst [vmem:[#allocation14_spill] sm:$0xff] %v11984_v45  ;;  %v3856_v38 = vsub.f32 %v11962_v9, %v11984_v45  ;;  %v4344_v43 = vand.u32 4294901760, %v4343_v16  ;;  %v12040_v3 = vand.u32 4294901760, %v4721_v37 }
 0x1c8   : > { %3492 = vmatmul.mubr.f32.vlgmr.msra.gmra.mxu0 %v11885_v10  ;;  %3380 = vmatpush1.msra.mxu1 %v3379_v57  ;;  %v4707_v21 = vsel %vm4705_vm8, %v4704_v34, %v4702_v18  ;;  %v4706_v25 = vsel %vm4705_vm8, %v4702_v18, %v4704_v34  ;;  %v12029_v10 = vsub.f32 %v4229_v28, %v12007_v11  ;;  %v12089_v28 = vand.u32 4294901760, %v5216_v26 }
 0x1c9   : > { %3611 = vmatpush1.msra.mxu0 %v3377_v46  ;;  %3529 = vmatprep.subr.mxu1 %v11880_v35  ;;  %v4717_v6 = vmul.f32 %v4715_v44, %v4707_v21  ;;  %v4345_v58 = vsub.f32 %v4343_v16, %v4344_v43  ;;  %v12058_v60 = vsub.f32 %v4721_v37, %v12040_v3  ;;  %v11233_v37 = vld [vmem:[%s12876_s22 + $0x18] ss:$0 sm:$0xff] }
 0x1ca   : > { %3770 = vmatprep.subr.mxu0 %v11928_v53  ;;  %3413 = vmatprep.mubr.f32.mxu1 %v12844_v1  ;;  %v4350_v52 = vand.u32 4294901760, %v12029_v10  ;;  %v12104_v32 = vsub.f32 %v5216_v26, %v12089_v28 }
 0x1cb   : > { %3644 = vmatprep.mubr.f32.mxu0 %v12844_v1  ;;  %3415 = vmatmul.mubr.f32.vlgmr.msra.gmra.mxu1 %v11872_v30  ;;  %v4727_v46 = vsel %vm1792_vm4, %v4717_v6, 0  ;;  %v4346_v57 = vand.u32 4294901760, %v4345_v58  ;;  %v4798_v7 = vand.u32 4294901760, %v12058_v60  ;;  %v5694_v6 = vpop.permute.xlu0 %5693 }
 0x1cc   : > { %3646 = vmatmul.mubr.f32.vlgmr.msra.gmra.mxu0 %v11872_v30  ;;  %3531 = vmatpush1.msra.mxu1 %v11893_v33  ;;  %v12053_v56 = vand.u32 4294901760, %v4727_v46  ;;  %v4351_v5 = vsub.f32 %v12029_v10, %v4350_v52 }
 0x1cd   : > { %3772 = vmatpush1.msra.mxu0 %v11946_v63  ;;  %3683 = vmatprep.subr.mxu1 %v11880_v35  ;;  %v4711_v35 = vrot.slane %v11746_v48, %v11976_v27  ;;  %v4799_v29 = vsub.f32 %v12058_v60, %v4798_v7 }
 0x1ce   : > { %3931 = vmatprep.subr.mxu0 %v11951_v2  ;;  %3564 = vmatprep.mubr.f32.mxu1 %v12844_v1  ;;  %v4838_v20 = vsub.f32 %v4727_v46, %v12053_v56  ;;  %v5293_v46 = vand.u32 4294901760, %v12104_v32 }
 0x1cf   : > { %3805 = vmatprep.mubr.f32.mxu0 %v12844_v1  ;;  %3568 = vmatmul.mubr.f32.vlgmr.msra.gmra.mxu1 %v3330_v36  ;;  %v12033_v36 = vand.u32 4294901760, %v3856_v38  ;;  %v4716_v17 = vmul.f32 %v4711_v35, %v4706_v25 }
 0x1d0   : > { %3811 = vmatmul.mubr.f32.vlgmr.msra.gmra.mxu0 %v3810_v31  ;;  %3685 = vmatpush1.msra.mxu1 %v11893_v33  ;;  %v4304_v33 = vsub.f32 %v11987_v49, %v4303_v39  ;;  %v4839_v34 = vand.u32 4294901760, %v4838_v20  ;;  %v5294_v58 = vsub.f32 %v12104_v32, %v5293_v46 }
 0x1d1   : > { %3934 = vmatpush1.msra.mxu0 %v11962_v9  ;;  %3852 = vmatprep.subr.mxu1 %v12018_v12  ;;  %12887 = vst [vmem:[#allocation16_spill] sm:$0xff] %v12033_v36  ;;  %v4724_v55 = vsel %vm1792_vm4, %v4716_v17, 0 }
 0x1d2   : > { %4085 = vmatprep.subr.mxu0 %v11972_v23  ;;  %3718 = vmatprep.mubr.f32.mxu1 %v12844_v1  ;;  %v4305_v50 = vand.u32 4294901760, %v4304_v33  ;;  %v12069_v15 = vand.u32 4294901760, %v4724_v55  ;;  %v4840_v25 = vsub.f32 %v4838_v20, %v4839_v34  ;;  %v11234_v33 = vld [vmem:[%s12830_s7 + $0x40] sm:$0xff] }
 0x1d3   : > { %3967 = vmatprep.mubr.f32.mxu0 %v12844_v1  ;;  %3720 = vmatmul.mubr.f32.vlgmr.msra.gmra.mxu1 %v11872_v30  ;;  %v5197_v30 = vpop.permute.xlu1 %5196 }
 0x1d4   : > { %3970 = vmatmul.mubr.f32.vlgmr.msra.gmra.mxu0 %v11931_v54  ;;  %3858 = vmatpush1.msra.mxu1 %v12033_v36  ;;  %v5202_v8 = vsel %vm5200_vm9, %v5199_v61, %v5197_v30  ;;  %v5201_v48 = vsel %vm5200_vm9, %v5197_v30, %v5199_v61  ;;  %v12085_v54 = vsub.f32 %v4724_v55, %v12069_v15  ;;  %v11232_v30 = vld [vmem:[%s12876_s22 + $0x10] ss:$0 sm:$0xff]  ;;  %v5711_v55 = vsel %vm1788_vm1, %v11234_v33, 0 }
 0x1d5   : > { %4089 = vmatpush1.msra.mxu0 %v11984_v45  ;;  %4007 = vmatprep.subr.mxu1 %v11928_v53  ;;  %v5212_v18 = vmul.f32 %v5210_v62, %v5202_v8  ;;  %v5211_v31 = vmul.f32 %v5206_v13, %v5201_v48  ;;  %v12147_v62 = vand.u32 4294901760, %v5711_v55  ;;  %v5295_v8 = vand.u32 4294901760, %v5294_v58 }
 0x1d6   : > { %4265 = vmatprep.subr.mxu0 %v11990_v14  ;;  %3891 = vmatprep.mubr.f32.mxu1 %v12844_v1 }
 0x1d7   : > { %4122 = vmatprep.mubr.f32.mxu0 %v12844_v1  ;;  %3893 = vmatmul.mubr.f32.vlgmr.msra.gmra.mxu1 %v11913_v41  ;;  %v5222_v44 = vsel %vm1792_vm4, %v5212_v18, 0  ;;  %v5692_v21 = vpop.permute.xlu1 %5691  ;;  %v5219_v38 = vsel %vm1792_vm4, %v5211_v31, 0 }
 0x1d8   : > { %4124 = vmatmul.mubr.f32.vlgmr.msra.gmra.mxu0 %v11913_v41  ;;  %4009 = vmatpush1.msra.mxu1 %v11946_v63  ;;  %v12107_v35 = vand.u32 4294901760, %v5222_v44  ;;  %v12122_v17 = vand.u32 4294901760, %v5219_v38 }
 0x1d9   : > { %4267 = vmatpush1.msra.mxu0 %v12007_v11  ;;  %4161 = vmatprep.subr.mxu1 %v11928_v53 }
 0x1da   : > { %4426 = vmatprep.subr.mxu0 %v4343_v16  ;;  %4042 = vmatprep.mubr.f32.mxu1 %v12844_v1  ;;  %v4800_v16 = vand.u32 4294901760, %v4799_v29  ;;  %v5333_v47 = vsub.f32 %v5222_v44, %v12107_v35 }
 0x1db   : > { %4300 = vmatprep.mubr.f32.mxu0 %v12844_v1  ;;  %4046 = vmatmul.mubr.f32.vlgmr.msra.gmra.mxu1 %v3808_v59  ;;  %v4352_v59 = vand.u32 4294901760, %v4351_v5 }
 0x1dc   : > { %4306 = vmatmul.mubr.f32.vlgmr.msra.gmra.mxu0 %v4305_v50  ;;  %4163 = vmatpush1.msra.mxu1 %v11946_v63  ;;  %v5696_v50 = vsel %vm5695_vm10, %v5692_v21, %v5694_v6 }
 0x1dd   : > { %4429 = vmatpush1.msra.mxu0 %v12029_v10  ;;  %4347 = vmatprep.subr.mxu1 %v4346_v57  ;;  %v5697_v10 = vsel %vm5695_vm10, %v5694_v6, %v5692_v21  ;;  %v5706_v61 = vmul.f32 %v11232_v30, %v5696_v50 }
 0x1de   : > { %4580 = vmatprep.subr.mxu0 %v4344_v43  ;;  %4196 = vmatprep.mubr.f32.mxu1 %v12844_v1 }
 0x1df   : > { %4462 = vmatprep.mubr.f32.mxu0 %v12844_v1  ;;  %4198 = vmatmul.mubr.f32.vlgmr.msra.gmra.mxu1 %v11913_v41  ;;  %v4845_v41 = vand.u32 4294901760, %v12085_v54 }
 0x1e0   : > { %4465 = vmatmul.mubr.f32.vlgmr.msra.gmra.mxu0 %v11987_v49  ;;  %4353 = vmatpush1.msra.mxu1 %v4352_v59  ;;  %v5339_v49 = vsub.f32 %v5219_v38, %v12122_v17 }
 0x1e1   : > { %4584 = vmatpush1.msra.mxu0 %v4350_v52  ;;  %4502 = vmatprep.subr.mxu1 %v11990_v14  ;;  %v4846_v43 = vsub.f32 %v12085_v54, %v4845_v41  ;;  %v5707_v52 = vmul.f32 %v11233_v37, %v5697_v10 }
 0x1e2   : > { %4760 = vmatprep.subr.mxu0 %v12053_v56  ;;  %4386 = vmatprep.mubr.f32.mxu1 %v12844_v1  ;;  %v5340_v13 = vand.u32 4294901760, %v5339_v49 }
 0x1e3   : > { %4617 = vmatprep.mubr.f32.mxu0 %v12844_v1  ;;  %4388 = vmatmul.mubr.f32.vlgmr.msra.gmra.mxu1 %v11964_v19  ;;  %v5717_v0 = vsel %vm1792_vm4, %v5707_v52, 0 }
 0x1e4   : > { %4619 = vmatmul.mubr.f32.vlgmr.msra.gmra.mxu0 %v11964_v19  ;;  %4504 = vmatpush1.msra.mxu1 %v12007_v11  ;;  %v12155_v5 = vand.u32 4294901760, %v5717_v0  ;;  %v5341_v48 = vsub.f32 %v5339_v49, %v5340_v13 }
 0x1e5   : > { %4762 = vmatpush1.msra.mxu0 %v12069_v15  ;;  %4656 = vmatprep.subr.mxu1 %v11990_v14  ;;  %v4841_v14 = vand.u32 4294901760, %v4840_v25 }
 0x1e6   : > { %4921 = vmatprep.subr.mxu0 %v4838_v20  ;;  %4537 = vmatprep.mubr.f32.mxu1 %v12844_v1  ;;  %v12160_v20 = vsub.f32 %v5711_v55, %v12147_v62  ;;  %v5342_v31 = vand.u32 4294901760, %v5341_v48 }
 0x1e7   : > { %4795 = vmatprep.mubr.f32.mxu0 %v12844_v1  ;;  %4541 = vmatmul.mubr.f32.vlgmr.msra.gmra.mxu1 %v4303_v39  ;;  %v4847_v39 = vand.u32 4294901760, %v4846_v43 }
 0x1e8   : > { %4801 = vmatmul.mubr.f32.vlgmr.msra.gmra.mxu0 %v4800_v16  ;;  %4658 = vmatpush1.msra.mxu1 %v12007_v11  ;;  %v5334_v11 = vand.u32 4294901760, %v5333_v47  ;;  %v5788_v59 = vand.u32 4294901760, %v12160_v20 }
 0x1e9   : > { %4924 = vmatpush1.msra.mxu0 %v12085_v54  ;;  %4842 = vmatprep.subr.mxu1 %v4841_v14  ;;  %v5828_v54 = vsub.f32 %v5717_v0, %v12155_v5 }
 0x1ea   : > { %5075 = vmatprep.subr.mxu0 %v4839_v34  ;;  %4691 = vmatprep.mubr.f32.mxu1 %v12844_v1  ;;  %v5335_v57 = vsub.f32 %v5333_v47, %v5334_v11 }
 0x1eb   : > { %4957 = vmatprep.mubr.f32.mxu0 %v12844_v1  ;;  %4693 = vmatmul.mubr.f32.vlgmr.msra.gmra.mxu1 %v11964_v19  ;;  %v5714_v19 = vsel %vm1792_vm4, %v5706_v61, 0 }
 0x1ec   : > { %4960 = vmatmul.mubr.f32.vlgmr.msra.gmra.mxu0 %v12058_v60  ;;  %4848 = vmatpush1.msra.mxu1 %v4847_v39  ;;  %v5751_v26 = vand.u32 4294901760, %v5714_v19  ;;  %v5336_v18 = vand.u32 4294901760, %v5335_v57  ;;  %v5789_v60 = vsub.f32 %v12160_v20, %v5788_v59 }
 0x1ed   : > { %5079 = vmatpush1.msra.mxu0 %v4845_v41  ;;  %4997 = vmatprep.subr.mxu1 %v12053_v56 }
 0x1ee   : > { %5255 = vmatprep.subr.mxu0 %v12107_v35  ;;  %4881 = vmatprep.mubr.f32.mxu1 %v12844_v1 }
 0x1ef   : > { %5112 = vmatprep.mubr.f32.mxu0 %v12844_v1  ;;  %4883 = vmatmul.mubr.f32.vlgmr.msra.gmra.mxu1 %v12040_v3 }
 0x1f0   : > { %5114 = vmatmul.mubr.f32.vlgmr.msra.gmra.mxu0 %v12040_v3  ;;  %4999 = vmatpush1.msra.mxu1 %v12069_v15 }
 0x1f1   : > { %5257 = vmatpush1.msra.mxu0 %v12122_v17  ;;  %5151 = vmatprep.subr.mxu1 %v12053_v56  ;;  %v5834_v56 = vsub.f32 %v5714_v19, %v5751_v26 }
 0x1f2   : > { %5416 = vmatprep.subr.mxu0 %v5333_v47  ;;  %5032 = vmatprep.mubr.f32.mxu1 %v12844_v1 }
 0x1f3   : > { %5290 = vmatprep.mubr.f32.mxu0 %v12844_v1  ;;  %5036 = vmatmul.mubr.f32.vlgmr.msra.gmra.mxu1 %v4798_v7  ;;  %v5829_v7 = vand.u32 4294901760, %v5828_v54 }
 0x1f4   : > { %5296 = vmatmul.mubr.f32.vlgmr.msra.gmra.mxu0 %v5295_v8  ;;  %5153 = vmatpush1.msra.mxu1 %v12069_v15  ;;  %v5835_v15 = vand.u32 4294901760, %v5834_v56 }
 0x1f5   : > { %5419 = vmatpush1.msra.mxu0 %v5339_v49  ;;  %5337 = vmatprep.subr.mxu1 %v5336_v18  ;;  %v5830_v29 = vsub.f32 %v5828_v54, %v5829_v7 }
 0x1f6   : > { %5570 = vmatprep.subr.mxu0 %v5334_v11  ;;  %5186 = vmatprep.mubr.f32.mxu1 %v12844_v1  ;;  %v5836_v34 = vsub.f32 %v5834_v56, %v5835_v15 }
 0x1f7   : > { %5452 = vmatprep.mubr.f32.mxu0 %v12844_v1  ;;  %5188 = vmatmul.mubr.f32.vlgmr.msra.gmra.mxu1 %v12040_v3  ;;  %v5790_v3 = vand.u32 4294901760, %v5789_v60  ;;  %v5831_v44 = vand.u32 4294901760, %v5830_v29 }
 0x1f8   : > { %5455 = vmatmul.mubr.f32.vlgmr.msra.gmra.mxu0 %v12104_v32  ;;  %5343 = vmatpush1.msra.mxu1 %v5342_v31  ;;  %v5837_v21 = vand.u32 4294901760, %v5836_v34 }
 0x1f9   : > { %5574 = vmatpush1.msra.mxu0 %v5340_v13  ;;  %5492 = vmatprep.subr.mxu1 %v12107_v35 }
 0x1fa   : > { %5750 = vmatprep.subr.mxu0 %v12155_v5  ;;  %5376 = vmatprep.mubr.f32.mxu1 %v12844_v1 }
 0x1fb   : > { %5607 = vmatprep.mubr.f32.mxu0 %v12844_v1  ;;  %5378 = vmatmul.mubr.f32.vlgmr.msra.gmra.mxu1 %v12089_v28 }
 0x1fc   : > { %5609 = vmatmul.mubr.f32.vlgmr.msra.gmra.mxu0 %v12089_v28  ;;  %5494 = vmatpush1.msra.mxu1 %v12122_v17 }
 0x1fd   : > { %5752 = vmatpush1.msra.mxu0 %v5751_v26  ;;  %5646 = vmatprep.subr.mxu1 %v12107_v35 }
 0x1fe   : > { %5911 = vmatprep.subr.mxu0 %v5828_v54  ;;  %5527 = vmatprep.mubr.f32.mxu1 %v12844_v1 }
 0x1ff   : > { %5785 = vmatprep.mubr.f32.mxu0 %v12844_v1  ;;  %5531 = vmatmul.mubr.f32.vlgmr.msra.gmra.mxu1 %v5293_v46 }
 0x200   : > { %5791 = vmatmul.mubr.f32.vlgmr.msra.gmra.mxu0 %v5790_v3  ;;  %5648 = vmatpush1.msra.mxu1 %v12122_v17 }
 0x201   : > { %5914 = vmatpush1.msra.mxu0 %v5834_v56  ;;  %5832 = vmatprep.subr.mxu1 %v5831_v44 }
 0x202   : > { %6065 = vmatprep.subr.mxu0 %v5829_v7  ;;  %5681 = vmatprep.mubr.f32.mxu1 %v12844_v1 }
 0x203   : > { %5947 = vmatprep.mubr.f32.mxu0 %v12844_v1  ;;  %5683 = vmatmul.mubr.f32.vlgmr.msra.gmra.mxu1 %v12089_v28 }
 0x204   : > { %5950 = vmatmul.mubr.f32.vlgmr.msra.gmra.mxu0 %v12160_v20  ;;  %5838 = vmatpush1.msra.mxu1 %v5837_v21 }
 0x205   : > { %6069 = vmatpush1.msra.mxu0 %v5835_v15  ;;  %5987 = vmatprep.subr.mxu1 %v12155_v5 }
 0x206   : > { %5871 = vmatprep.mubr.f32.mxu1 %v12844_v1  ;;  %6102 = vmatprep.mubr.f32.mxu0 %v12844_v1 }
 0x207   : > { %5873 = vmatmul.mubr.f32.vlgmr.msra.gmra.mxu1 %v12147_v62 }
 0x208   : > { %6104 = vmatmul.mubr.f32.vlgmr.msra.gmra.mxu0 %v12147_v62  ;;  %5989 = vmatpush1.msra.mxu1 %v5751_v26 }
 0x209   : > { %6022 = vmatprep.mubr.f32.mxu1 %v12844_v1  ;;  %6141 = vmatprep.subr.mxu1 %v12155_v5 }
 0x20a   : > { %6274 = vmatprep.mubr.f32.mxu0 %v12844_v1 }
 0x20b   : > { %6026 = vmatmul.mubr.f32.vlgmr.msra.gmra.mxu1 %v5788_v59 }
 0x20c   : > { %6143 = vmatpush1.msra.mxu1 %v5751_v26  ;;  %6176 = vmatprep.mubr.f32.mxu1 %v12844_v1 }
 0x20f   : > { %6178 = vmatmul.mubr.f32.vlgmr.msra.gmra.mxu1 %v12147_v62 }
 0x210   : > { %6360 = vmatprep.mubr.f32.mxu1 %v12844_v1 }
 0x25f   : > { %v1872_v28 = vpop.f32.mrf.mxu0 }
 0x261   : > { %v12205_v41 = vpop.f32.mrf.mxu0 }
 0x263   : > { %v2031_v32 = vpop.f32.mrf.mxu0 }
 0x265   : > { %v12207_v38 = vpop.f32.mrf.mxu0 }
 0x267   : > { %v2185_v35 = vpop.f32.mrf.mxu0  ;;  %v1954_v16 = vpop.f32.mrf.mxu1 }
 0x268   : > { %v1955_v25 = vadd.f32 %v1954_v16, %v1872_v28 }
 0x269   : > { %v12209_v6 = vpop.f32.mrf.mxu0  ;;  %v1956_v37 = vpop.f32.mrf.mxu1 }
 0x26a   : > { %v2032_v10 = vadd.f32 %v2031_v32, %v1955_v25 }
 0x26b   : > { %v2107_v33 = vpop.f32.mrf.mxu1 }
 0x26c   : > { %v2346_v17 = vpop.f32.mrf.mxu0  ;;  %v2108_v43 = vadd.f32 %v2107_v33, %v2032_v10 }
 0x26d   : > { %v12211_v46 = vpop.f32.mrf.mxu1 }
 0x26e   : > { %v12213_v14 = vpop.f32.mrf.mxu0  ;;  %v2186_v47 = vadd.f32 %v2185_v35, %v2108_v43 }
 0x26f   : > { %v2259_v30 = vpop.f32.mrf.mxu1 }
 0x270   : > { %v2505_v50 = vpop.f32.mrf.mxu0  ;;  %v2260_v52 = vadd.f32 %v2259_v30, %v2186_v47 }
 0x271   : > { %v12215_v55 = vpop.f32.mrf.mxu1 }
 0x272   : > { %v12217_v49 = vpop.f32.mrf.mxu0  ;;  %v2347_v39 = vadd.f32 %v2346_v17, %v2260_v52 }
 0x273   : > { %v2428_v58 = vpop.f32.mrf.mxu1 }
 0x274   : > { %v2659_v61 = vpop.f32.mrf.mxu0  ;;  %v2429_v11 = vadd.f32 %v2428_v58, %v2347_v39 }
 0x275   : > { %v12219_v62 = vpop.f32.mrf.mxu1 }
 0x276   : > { %v12221_v0 = vpop.f32.mrf.mxu0  ;;  %v2506_v8 = vadd.f32 %v2505_v50, %v2429_v11 }
 0x277   : > { %v2581_v13 = vpop.f32.mrf.mxu1 }
 0x278   : > { %v12223_v19 = vpop.f32.mrf.mxu0  ;;  %v2582_v5 = vadd.f32 %v2581_v13, %v2506_v8 }
 0x279   : > { %v12225_v57 = vpop.f32.mrf.mxu1 }
 0x27a   : > { %v12227_v20 = vpop.f32.mrf.mxu0  ;;  %v2660_v26 = vadd.f32 %v2659_v61, %v2582_v5 }
 0x27b   : > { %v2733_v48 = vpop.f32.mrf.mxu1 }
 0x27c   : > { %v12229_v18 = vpop.f32.mrf.mxu0  ;;  %v12231_v54 = vadd.f32 %v2733_v48, %v2660_v26  ;;  %v1957_v48 = vadd.f32 %v1956_v37, %v12205_v41 }
 0x27d   : > { %v12233_v59 = vpop.f32.mrf.mxu1 }
 0x27e   : > { %12888 = vst [vmem:[#allocation17_spill] sm:$0xff] %v12231_v54  ;;  %12889 = vst [vmem:[#allocation18_spill] sm:$0xff] %v12233_v59  ;;  %v12235_v56 = vpop.f32.mrf.mxu0  ;;  %v2034_v27 = vadd.f32 %v12207_v38, %v1957_v48 }
 0x27f   : > { %v2921_v31 = vpop.f32.mrf.mxu1 }
 0x280   : > { %v12237_v60 = vpop.f32.mrf.mxu0  ;;  %v2110_v63 = vadd.f32 %v12211_v46, %v2034_v27 }
 0x281   : > { %v2923_v7 = vpop.f32.mrf.mxu1 }
 0x282   : > { %v12239_v15 = vpop.f32.mrf.mxu0  ;;  %v2188_v22 = vadd.f32 %v12209_v6, %v2110_v63  ;;  %v2924_v6 = vadd.f32 %v2923_v7, %v12227_v20 }
 0x283   : > { %v12241_v3 = vpop.f32.mrf.mxu1 }
 0x284   : > { %v3334_v29 = vpop.f32.mrf.mxu0  ;;  %v2262_v48 = vadd.f32 %v12215_v55, %v2188_v22 }
 0x285   : > { %v12243_v34 = vpop.f32.mrf.mxu1 }
 0x286   : > { %v3336_v44 = vpop.f32.mrf.mxu0  ;;  %v2349_v46 = vadd.f32 %v12213_v14, %v2262_v48  ;;  %v3001_v14 = vadd.f32 %v12235_v56, %v2924_v6 }
 0x287   : > { %v12245_v21 = vpop.f32.mrf.mxu1 }
 0x288   : > { %v3493_v28 = vpop.f32.mrf.mxu0  ;;  %v2431_v22 = vadd.f32 %v12219_v62, %v2349_v46  ;;  %v3077_v56 = vadd.f32 %v12243_v34, %v3001_v14  ;;  %v12907_v14 = vld [vmem:[#allocation17_spill] sm:$0xff] }
 0x289   : > { %v12247_v32 = vpop.f32.mrf.mxu1 }
 0x28a   : > { %12890 = vst [vmem:[#allocation19_spill] sm:$0xff] %v12247_v32  ;;  %v12249_v35 = vpop.f32.mrf.mxu0  ;;  %v2508_v20 = vadd.f32 %v12217_v49, %v2431_v22  ;;  %v12906_v22 = vld [vmem:[#allocation18_spill] sm:$0xff] }
 0x28b   : > { %v3416_v16 = vpop.f32.mrf.mxu1 }
 0x28c   : > { %v12251_v25 = vpop.f32.mrf.mxu0  ;;  %v3417_v59 = vadd.f32 %v3416_v16, %v3334_v29  ;;  %v2584_v49 = vadd.f32 %v12225_v57, %v2508_v20 }
 0x28d   : > { %v3418_v10 = vpop.f32.mrf.mxu1 }
 0x28e   : > { %v12253_v33 = vpop.f32.mrf.mxu0  ;;  %v3494_v48 = vadd.f32 %v3493_v28, %v3417_v59 }
 0x28f   : > { %v12255_v17 = vpop.f32.mrf.mxu1 }
 0x290   : > { %v3812_v43 = vpop.f32.mrf.mxu0  ;;  %v3570_v59 = vadd.f32 %v12255_v17, %v3494_v48  ;;  %v3155_v17 = vadd.f32 %v12239_v15, %v3077_v56 }
 0x291   : > { %v12257_v47 = vpop.f32.mrf.mxu1 }
 0x292   : > { %v3814_v30 = vpop.f32.mrf.mxu0 }
 0x293   : > { %v12259_v50 = vpop.f32.mrf.mxu1 }
 0x294   : > { %12891 = vst [vmem:[#allocation20_spill] sm:$0xff] %v12259_v50  ;;  %v3971_v52 = vpop.f32.mrf.mxu0 }
 0x295   : > { %v12261_v39 = vpop.f32.mrf.mxu1 }
 0x296   : > { %12892 = vst [vmem:[#allocation21_spill] sm:$0xff] %v12261_v39  ;;  %v3973_v58 = vpop.f32.mrf.mxu0 }
 0x297   : > { %v3894_v61 = vpop.f32.mrf.mxu1 }
 0x298   : > { %v12263_v11 = vpop.f32.mrf.mxu0 }
 0x299   : > { %v3896_v8 = vpop.f32.mrf.mxu1 }
 0x29a   : > { %v12265_v13 = vpop.f32.mrf.mxu0 }
 0x29b   : > { %12893 = vst [vmem:[#allocation22_spill] sm:$0xff] %v12265_v13  ;;  %v12267_v5 = vpop.f32.mrf.mxu1  ;;  %v3895_v13 = vadd.f32 %v3894_v61, %v3812_v43 }
 0x29c   : > { %v4307_v26 = vpop.f32.mrf.mxu0 }
 0x29d   : > { %v12270_v1 = vpop.f32.mrf.mxu1  ;;  %v3972_v29 = vadd.f32 %v3971_v52, %v3895_v13  ;;  %v12908_v48 = vld [vmem:[#allocation21_spill] sm:$0xff] }
 0x29e   : > { %v4309_v4 = vpop.f32.mrf.mxu0 }
 0x29f   : > { %v12272_v45 = vpop.f32.mrf.mxu1 }
 0x2a0   : > { %12894 = vst [vmem:[#allocation23_spill] sm:$0xff] %v12272_v45  ;;  %v4466_v36 = vpop.f32.mrf.mxu0 }
 0x2a1   : > { %v12275_v23 = vpop.f32.mrf.mxu1 }
 0x2a2   : > { %12895 = vst [vmem:[#allocation24_spill] sm:$0xff] %v12275_v23  ;;  %v4468_v12 = vpop.f32.mrf.mxu0  ;;  %v12904_v46 = vld [vmem:[#allocation22_spill] sm:$0xff] }
 0x2a3   : > { %v4389_v9 = vpop.f32.mrf.mxu1 }
 0x2a4   : > { %v12277_v2 = vpop.f32.mrf.mxu0 }
 0x2a5   : > { %12896 = vst [vmem:[#allocation25_spill] sm:$0xff] %v12277_v2  ;;  %v4391_v53 = vpop.f32.mrf.mxu1 }
 0x2a6   : > { %v12280_v51 = vpop.f32.mrf.mxu0 }
 0x2a7   : > { %12897 = vst [vmem:[#allocation26_spill] sm:$0xff] %v12280_v51  ;;  %v4542_v41 = vpop.f32.mrf.mxu1  ;;  %v2922_v51 = vadd.f32 %v2921_v31, %v12223_v19  ;;  %v3897_v19 = vadd.f32 %v3896_v8, %v3814_v30  ;;  %v4390_v31 = vadd.f32 %v4389_v9, %v4307_v26 }
 0x2a8   : > { %v4802_v37 = vpop.f32.mrf.mxu0 }
 0x2a9   : > { %v12283_v24 = vpop.f32.mrf.mxu1  ;;  %v2999_v55 = vadd.f32 %v12229_v18, %v2922_v51  ;;  %v4392_v51 = vadd.f32 %v4391_v53, %v4309_v4  ;;  %v3974_v9 = vadd.f32 %v3973_v58, %v3897_v19  ;;  %v4467_v28 = vadd.f32 %v4466_v36, %v4390_v31 }
 0x2aa   : > { %v4804_v42 = vpop.f32.mrf.mxu0  ;;  %v4048_v53 = vadd.f32 %v12267_v5, %v3972_v29  ;;  %v3648_v36 = vadd.f32 %v12251_v25, %v3570_v59  ;;  %v12912_v59 = vld [vmem:[#allocation24_spill] sm:$0xff] }
 0x2ab   : > { %v12285_v40 = vpop.f32.mrf.mxu1  ;;  %v3075_v7 = vadd.f32 %v12241_v3, %v2999_v55  ;;  %v4050_v58 = vadd.f32 %v12270_v1, %v3974_v9  ;;  %v4543_v57 = vadd.f32 %v4542_v41, %v4467_v28  ;;  %v12902_v1 = vld [vmem:[#allocation19_spill] sm:$0xff] }
 0x2ac   : > { %12898 = vst [vmem:[#allocation27_spill] sm:$0xff] %v12285_v40  ;;  %v4961_v38 = vpop.f32.mrf.mxu0  ;;  %v4126_v13 = vadd.f32 %v12263_v11, %v4048_v53  ;;  %v3229_v41 = vadd.f32 %v12902_v1, %v3155_v17 }
 0x2ad   : > { %v12288_v23 = vpop.f32.mrf.mxu1 }
 0x2ae   : > { %12899 = vst [vmem:[#allocation28_spill] sm:$0xff] %v12288_v23  ;;  %v4963_v45 = vpop.f32.mrf.mxu0  ;;  %v3419_v23 = vadd.f32 %v3418_v10, %v3336_v44  ;;  %v12910_v20 = vld [vmem:[#allocation26_spill] sm:$0xff] }
 0x2af   : > { %v4884_v39 = vpop.f32.mrf.mxu1 }
 0x2b0   : > { %v12290_v27 = vpop.f32.mrf.mxu0  ;;  %v3496_v62 = vadd.f32 %v12249_v35, %v3419_v23  ;;  %v4885_v16 = vadd.f32 %v4884_v39, %v4802_v37  ;;  %v3153_v23 = vadd.f32 %v12237_v60, %v3075_v7  ;;  %v4469_v35 = vadd.f32 %v4468_v12, %v4392_v51 }
 0x2b1   : > { %12900 = vst [vmem:[#allocation29_spill] sm:$0xff] %v12290_v27  ;;  %v4886_v54 = vpop.f32.mrf.mxu1 }
 0x2b2   : > { %v12294_v63 = vpop.f32.mrf.mxu0  ;;  %v4887_v30 = vadd.f32 %v4886_v54, %v4804_v42  ;;  %v3572_v4 = vadd.f32 %v12257_v47, %v3496_v62  ;;  %v4962_v34 = vadd.f32 %v4961_v38, %v4885_v16  ;;  %v2662_v54 = vadd.f32 %v12221_v0, %v2584_v49  ;;  %v12903_v38 = vld [vmem:[#allocation20_spill] sm:$0xff] }
 0x2b3   : > { %12901 = vst [vmem:[#allocation30_spill] sm:$0xff] %v12294_v63  ;;  %v5037_v40 = vpop.f32.mrf.mxu1  ;;  %v3227_v8 = vadd.f32 %v12245_v21, %v3153_v23  ;;  %v4545_v5 = vadd.f32 %v12283_v24, %v4469_v35  ;;  %v4128_v0 = vadd.f32 %v12904_v46, %v4050_v58  ;;  %v12913_v28 = vld [vmem:[#allocation27_spill] sm:$0xff] }
 0x2b4   : > { %v5297_v2 = vpop.f32.mrf.mxu0  ;;  %v4964_v60 = vadd.f32 %v4963_v45, %v4887_v30  ;;  %v3650_v12 = vadd.f32 %v12253_v33, %v3572_v4  ;;  %v5038_v25 = vadd.f32 %v5037_v40, %v4962_v34  ;;  %v12905_v45 = vld [vmem:[#allocation25_spill] sm:$0xff]  ;;  %v2736_v33 = vadd.f32 %v12906_v22, %v2662_v54  ;;  %v12909_v40 = vld [vmem:[#allocation23_spill] sm:$0xff] }
 0x2b5   : > { %v5039_v50 = vpop.f32.mrf.mxu1  ;;  %v3231_v24 = vadd.f32 %v3227_v8, %v12907_v14  ;;  %v4200_v31 = vadd.f32 %v12909_v40, %v4126_v13  ;;  %v4623_v7 = vadd.f32 %v12910_v20, %v4545_v5  ;;  %v4202_v9 = vadd.f32 %v12912_v59, %v4128_v0  ;;  %v6190_v0 = vpop.permute.xlu1 %6189  ;;  %v9103_v14 = vld [vmem:[%s12835_s12] sm:$0xf] }
 0x2b6   : > { %v5299_v27 = vpop.f32.mrf.mxu0  ;;  %v5040_v55 = vadd.f32 %v5039_v50, %v4964_v60  ;;  %v3724_v19 = vadd.f32 %v12908_v48, %v3650_v12  ;;  %v3232_v16 = vadd.f32 %v3229_v41, %v2736_v33  ;;  %v10057_v48 = vld [vmem:[%s12838_s15] sm:$0xf] }
 0x2b7   : > { %v12300_v32 = vpop.f32.mrf.mxu1  ;;  %v11123_v40 = vld [vmem:[%s12841_s18] sm:$0xff] }
 0x2b8   : > { %v5456_v63 = vpop.f32.mrf.mxu0  ;;  %v12911_v29 = vld [vmem:[#allocation29_spill] sm:$0xff]  ;;  %v3727_v53 = vadd.f32 %v3724_v19, %v3232_v16  ;;  %v9093_v19 = vld [vmem:[%s12833_s10] sm:$0xf] }
 0x2b9   : > { %v12305_v18 = vpop.f32.mrf.mxu1  ;;  %v5116_v51 = vadd.f32 %v12911_v29, %v5038_v25  ;;  %v6196_v20 = vld [vmem:[%s12832_s9] sm:$0xf] }
 0x2ba   : > { %v5458_v44 = vpop.f32.mrf.mxu0  ;;  %v12914_v30 = vld [vmem:[#allocation30_spill] sm:$0xff] }
 0x2bb   : > { %v5379_v10 = vpop.f32.mrf.mxu1  ;;  %v5190_v17 = vadd.f32 %v12300_v32, %v5116_v51  ;;  %v11235_v51 = vld [vmem:[%s12832_s9 + $0x4] sm:$0xf] }
 0x2bc   : > { %v5610_v43 = vpop.f32.mrf.mxu0  ;;  %v5380_v3 = vadd.f32 %v5379_v10, %v5297_v2  ;;  %v6708_v16 = vsel %vm6204_vm11, %v11235_v51, 0 }
 0x2bd   : > { %v5381_v52 = vpop.f32.mrf.mxu1 }
 0x2be   : > { %v5612_v39 = vpop.f32.mrf.mxu0  ;;  %v5382_v61 = vadd.f32 %v5381_v52, %v5299_v27  ;;  %v5457_v47 = vadd.f32 %v5456_v63, %v5380_v3  ;;  %v3722_v27 = vadd.f32 %v12903_v38, %v3648_v36  ;;  %v4621_v63 = vadd.f32 %v12905_v45, %v4543_v57  ;;  %v12915_v52 = vld [vmem:[#allocation28_spill] sm:$0xff] }
 0x2bf   : > { %v5532_v42 = vpop.f32.mrf.mxu1  ;;  %v5118_v3 = vadd.f32 %v12914_v30, %v5040_v55  ;;  %v4697_v34 = vadd.f32 %v12915_v52, %v4623_v7  ;;  %v6206_v7 = vsel %vm6204_vm11, %v6196_v20, 0  ;;  %v12923_v20 = vld [vmem:[#allocation8_spill] sm:$0xff] }
 0x2c0   : > { %v5792_v2 = vpop.f32.mrf.mxu0  ;;  %v5459_v37 = vadd.f32 %v5458_v44, %v5382_v61  ;;  %v5533_v11 = vadd.f32 %v5532_v42, %v5457_v47  ;;  %v3726_v56 = vadd.f32 %v3722_v27, %v3231_v24  ;;  %v4695_v10 = vadd.f32 %v12913_v28, %v4621_v63  ;;  %v12917_v24 = vld [vmem:[#allocation3_spill] sm:$0xff] }
 0x2c1   : > { %v5534_v15 = vpop.f32.mrf.mxu1  ;;  %v4205_v42 = vadd.f32 %v4202_v9, %v3727_v53  ;;  %v5192_v8 = vadd.f32 %v12305_v18, %v5118_v3  ;;  %v12372_v9 = vand.u32 4294901760, %v6708_v16 }
 0x2c2   : > { %v5794_v26 = vpop.f32.mrf.mxu0  ;;  %v5535_v44 = vadd.f32 %v5534_v15, %v5459_v37  ;;  %v5611_v23 = vadd.f32 %v5610_v43, %v5533_v11  ;;  %v4204_v35 = vadd.f32 %v4200_v31, %v3726_v56  ;;  %v12916_v11 = vld [vmem:[#allocation2_spill] sm:$0xff]  ;;  %v11124_v31 = vld [vmem:[%s12841_s18 + $0x8] sm:$0xff]  ;;  %v12918_v56 = vld [vmem:[#allocation5_spill] sm:$0xff] }
 0x2c3   : > { %v5684_v6 = vpop.f32.mrf.mxu1  ;;  %vm6201_vm12 = vcmp.lt.s32.totalorder %v12918_v56, 64  ;;  %v11237_v56 = vld [vmem:[%s12832_s9 + $0x8] sm:$0xf] }
 0x2c4   : > { %v5951_v21 = vpop.f32.mrf.mxu0  ;;  %v5613_v36 = vadd.f32 %v5612_v39, %v5535_v44  ;;  %v4699_v54 = vadd.f32 %v4695_v10, %v4204_v35  ;;  %v5685_v12 = vadd.f32 %v5684_v6, %v5611_v23 }
 0x2c5   : > { %v5686_v62 = vpop.f32.mrf.mxu1 }
 0x2c6   : > { %v5953_v49 = vpop.f32.mrf.mxu0  ;;  %v5194_v15 = vadd.f32 %v5190_v17, %v4699_v54  ;;  %v5687_v25 = vadd.f32 %v5686_v62, %v5613_v36  ;;  %v12358_v62 = vand.u32 4294901760, %v6206_v7  ;;  %v12919_v36 = vmov 0.0   ;;  %v12920_v54 = vld [vmem:[#allocation4_spill] sm:$0xff] }
 0x2c7   : > { %v5874_v50 = vpop.f32.mrf.mxu1 }
 0x2c8   : > { %v5875_v4 = vadd.f32 %v5874_v50, %v5792_v2  ;;  %v6105_v47 = vpop.f32.mrf.mxu0  ;;  %v4700_v2 = vadd.f32 %v4697_v34, %v4205_v42  ;;  %v5689_v38 = vadd.f32 %v5685_v12, %v5194_v15  ;;  %v12361_v29 = vsub.f32 %v6206_v7, %v12358_v62  ;;  %v11236_v34 = vld [vmem:[%s12834_s11 + $0x4] sm:$0xf] }
 0x2c9   : > { %v5876_v61 = vpop.f32.mrf.mxu1 }
 0x2ca   : > { %v5952_v58 = vadd.f32 %v5951_v21, %v5875_v4  ;;  %v5877_v57 = vadd.f32 %v5876_v61, %v5794_v26  ;;  %v6107_v41 = vpop.f32.mrf.mxu0  ;;  %v5195_v39 = vadd.f32 %v5192_v8, %v4700_v2  ;;  %v6277_v44 = vand.u32 4294901760, %v12361_v29  ;;  %v12419_v8 = vld [vmem:[%s12921_s26] sm:$0x77] }
 0x2cb   : > { %v6027_v60 = vpop.f32.mrf.mxu1  ;;  %v12383_v4 = vsub.f32 %v6708_v16, %v12372_v9  ;;  %v12925_v16 = vld [vmem:[#allocation10_spill] sm:$0xff] }
 0x2cc   : > { %v5954_v13 = vadd.f32 %v5953_v49, %v5877_v57  ;;  %v6028_v43 = vadd.f32 %v6027_v60, %v5952_v58  ;;  %v5690_v45 = vadd.f32 %v5687_v25, %v5195_v39  ;;  %v6278_v59 = vsub.f32 %v12361_v29, %v6277_v44  ;;  %v12922_v39 = vld [vmem:[#allocation6_spill] sm:$0xff] }
 0x2cd   : > { %v6029_v5 = vpop.f32.mrf.mxu1  ;;  %v6779_v57 = vand.u32 4294901760, %v12383_v4  ;;  %v6686_v60 = vsub.s32 4, %v12920_v54 }
 0x2ce   : > { %v6106_v37 = vadd.f32 %v6105_v47, %v6028_v43  ;;  %v6030_v1 = vadd.f32 %v6029_v5, %v5954_v13  ;;  %v6279_v23 = vand.u32 4294901760, %v6278_v59  ;;  %v7180_v47 = vsel %vm1788_vm1, %v11236_v34, 0  ;;  %v12928_v34 = vld [vmem:[#allocation12_spill] sm:$0xff] }
 0x2cf   : > { %v6179_v32 = vpop.f32.mrf.mxu1  ;;  %v6780_v2 = vsub.f32 %v12383_v4, %v6779_v57 }
 0x2d0   : > { %v6108_v26 = vadd.f32 %v6107_v41, %v6030_v1  ;;  %v6180_v27 = vadd.f32 %v6179_v32, %v6106_v37  ;;  %v12442_v37 = vand.u32 4294901760, %v7180_v47  ;;  %v6687_v1 = vrot.slane %v12419_v8, %v6686_v60 }
 0x2d1   : > { %v6181_v46 = vpop.f32.mrf.mxu1 }
 0x2d2   : > { %v6184_v63 = vadd.f32 %v6180_v27, %v5689_v38  ;;  %v6182_v18 = vadd.f32 %v6181_v46, %v6108_v26  ;;  %v6683_v38 = vrot.slane %v12419_v8, %v12922_v39  ;;  %v6781_v26 = vand.u32 4294901760, %v6780_v2  ;;  %v12931_v2 = vld [vmem:[#allocation14_spill] sm:$0xff] }
 0x2d3   : > { %v12459_v46 = vsub.f32 %v7180_v47, %v12442_v37  ;;  %v12929_v47 = vld [vmem:[#allocation13_spill] sm:$0xff] }
 0x2d4   : > { %v6185_v6 = vadd.f32 %v6182_v18, %v5690_v45  ;;  %v6192_v21 = vadd.f32 %v6190_v0, %v6184_v63  ;;  %v12462_v45 = vrot.slane %v6687_v1, %v12922_v39  ;;  %v6704_v18 = vld [vmem:[%s12834_s11] sm:$0xf]  ;;  %v12932_v1 = vld [vmem:[#allocation7_spill] sm:$0xff] }
 0x2d6   : > { %v6193_v22 = vadd.f32 %v6190_v0, %v6185_v6  ;;  %v6194_v33 = vmax.f32 %v6192_v21, 0.0  ;;  %v12479_v21 = vrot.slane %v6683_v38, %v12922_v39 }
 0x2d8   : > { %v6195_v55 = vmax.f32 %v6193_v22, 0.0  ;;  %6197 = vrot.lane.b32.xlu0 %v6194_v33, %s11283_s21  ;;  %v12398_v61 = vand.u32 4294901760, %v6194_v33 }
 0x2da   : > { %6199 = vrot.lane.b32.xlu1 %v6195_v55, %s11283_s21  ;;  %v12385_v53 = vand.u32 4294901760, %v6195_v55  ;;  %v12427_v43 = vsub.f32 %v6194_v33, %v12398_v61  ;;  %v7251_v33 = vand.u32 4294901760, %v12459_v46 }
 0x2dc   : > { %6673 = vrot.lane.b32.xlu0 %v12916_v11, %s11283_s21  ;;  %v12410_v42 = vsub.f32 %v6195_v55, %v12385_v53  ;;  %v12450_v32 = vand.u32 4294901760, %v12427_v43 }
 0x2de   : > { %6675 = vrot.lane.b32.xlu1 %v12917_v24, %s11283_s21  ;;  %v12440_v25 = vand.u32 4294901760, %v12410_v42  ;;  %v6827_v6 = vsub.f32 %v12427_v43, %v12450_v32 }
 0x2e0   : > { %9106 = vperm.xlu0 %11263, %v9103_v14   ;;  %v6821_v27 = vsub.f32 %v12410_v42, %v12440_v25  ;;  %v7648_v14 = vsel %vm1788_vm1, %v6704_v18, 0  ;;  %v12499_v24 = vand.u32 4294901760, %v6827_v6 }
 0x2e2   : > { %10060 = vperm.xlu1 %11264, %v10057_v48   ;;  %v12483_v22 = vand.u32 4294901760, %v6821_v27 }
 0x2e4   : > { %9096 = vperm.xlu0 %11263, %v9093_v19   ;;  %v7252_v19 = vsub.f32 %v12459_v46, %v7251_v33 }
 0x2e6   : > { %11127 = vperm.xlu1 %11264, %v11123_v40   ;;  %v12508_v40 = vand.u32 4294901760, %v7648_v14 }
 0x2e8   : > { %11132 = vperm.xlu0 %11263, %v11124_v31   ;;  %v12523_v51 = vsub.f32 %v7648_v14, %v12508_v40 }
 0x34a   : > { %v6198_v28 = vpop.permute.xlu0 %6197 }
 0x34c   : > { %v6200_v10 = vpop.permute.xlu1 %6199 }
 0x34d   : > { %v6202_v50 = vsel %vm6201_vm12, %v6198_v28, %v6200_v10  ;;  %v6203_v49 = vsel %vm6201_vm12, %v6200_v10, %v6198_v28  ;;  %v7725_v10 = vand.u32 4294901760, %v12523_v51 }
 0x34e   : > { %v12378_v30 = vand.u32 4294901760, %v6202_v50  ;;  %v12380_v3 = vand.u32 4294901760, %v6203_v49  ;;  %v6674_v0 = vpop.permute.xlu0 %6673 }
 0x350   : > { %v12388_v35 = vsub.f32 %v6202_v50, %v12378_v30  ;;  %v12391_v52 = vsub.f32 %v6203_v49, %v12380_v3  ;;  %6239 = vmatprep.subr.mxu0 %v12378_v30  ;;  %v6676_v41 = vpop.permute.xlu1 %6675  ;;  %v12926_v50 = vld [vmem:[#allocation11_spill] sm:$0xff]  ;;  %v8124_v49 = vsel %vm6204_vm11, %v11237_v56, 0 }
 0x351   : > { %6241 = vmatpush1.msra.mxu0 %v12380_v3  ;;  %v12468_v63 = vsel %vm6201_vm12, %v6674_v0, %v6676_v41  ;;  %v12488_v55 = vsel %vm6201_vm12, %v6676_v41, %v6674_v0  ;;  %v12553_v60 = vand.u32 4294901760, %v8124_v49  ;;  %v8594_v41 = vrot.slane %v12419_v8, %v12932_v1 }
 0x352   : > { %6280 = vmatmul.mubr.f32.vlgmr.msra.gmra.mxu0 %v6279_v23  ;;  %6400 = vmatprep.subr.mxu0 %v12388_v35  ;;  %v12402_v17 = vand.u32 4294901760, %v12388_v35  ;;  %v12406_v58 = vand.u32 4294901760, %v12391_v52  ;;  %v6701_v11 = vmul.f32 %v12462_v45, %v12468_v63  ;;  %v6700_v48 = vmul.f32 %v12479_v21, %v12488_v55  ;;  %v12927_v23 = vld [vmem:[#allocation15_spill] sm:$0xff] }
 0x353   : > { %6436 = vmatprep.mubr.f32.mxu0 %v12919_v36  ;;  %6403 = vmatpush1.msra.mxu0 %v12391_v52  ;;  %v12582_v18 = vrot.slane %v8594_v41, %v12932_v1 }
 0x354   : > { %6554 = vmatprep.subr.mxu0 %v12402_v17  ;;  %v6319_v12 = vsub.f32 %v12388_v35, %v12402_v17  ;;  %v6325_v13 = vsub.f32 %v12391_v52, %v12406_v58  ;;  %v7654_v31 = vsel %vm1792_vm4, %v6701_v11, 0  ;;  %v7651_v7 = vsel %vm1792_vm4, %v6700_v48, 0 }
 0x355   : > { %v12532_v59 = vand.u32 4294901760, %v7651_v7 }
 0x356   : > { %6439 = vmatmul.mubr.f32.vlgmr.msra.gmra.mxu0 %v12361_v29  ;;  %v12435_v5 = vand.u32 4294901760, %v6319_v12  ;;  %v12437_v15 = vand.u32 4294901760, %v6325_v13  ;;  %v7253_v29 = vand.u32 4294901760, %v7252_v19  ;;  %v8598_v12 = vrot.slane %v12419_v8, %v12929_v47  ;;  %v12930_v13 = vld [vmem:[#allocation16_spill] sm:$0xff]  ;;  %v11238_v8 = vld [vmem:[%s12834_s11 + $0x8] sm:$0xf] }
 0x357   : > { %6558 = vmatpush1.msra.mxu0 %v12406_v58  ;;  %6591 = vmatprep.mubr.f32.mxu0 %v12919_v36  ;;  %v7771_v54 = vsub.f32 %v7651_v7, %v12532_v59  ;;  %v8618_v48 = vsel %vm1788_vm1, %v11238_v8, 0 }
 0x358   : > { %6741 = vmatprep.subr.mxu0 %v12385_v53  ;;  %6321 = vmatprep.subr.mxu1 %v12435_v5  ;;  %v12571_v27 = vrot.slane %v8598_v12, %v12932_v1  ;;  %v12600_v19 = vand.u32 4294901760, %v8618_v48 }
 0x359   : > { %6327 = vmatpush1.msra.mxu1 %v12437_v15 }
 0x35a   : > { %6593 = vmatmul.mubr.f32.vlgmr.msra.gmra.mxu0 %v12358_v62  ;;  %6362 = vmatmul.mubr.f32.vlgmr.msra.gmra.mxu1 %v12358_v62  ;;  %v8612_v14 = vmul.f32 %v12571_v27, %v12488_v55  ;;  %v12613_v7 = vsub.f32 %v8618_v48, %v12600_v19 }
 0x35b   : > { %6743 = vmatpush1.msra.mxu0 %v12398_v61  ;;  %6476 = vmatprep.subr.mxu1 %v12378_v30 }
 0x35c   : > { %6478 = vmatpush1.msra.mxu1 %v12380_v3  ;;  %6902 = vmatprep.subr.mxu0 %v12410_v42 }
 0x35d   : > { %6630 = vmatprep.subr.mxu1 %v12378_v30  ;;  %6511 = vmatprep.mubr.f32.mxu1 %v12919_v36 }
 0x35e   : > { %6776 = vmatprep.mubr.f32.mxu0 %v12919_v36  ;;  %6515 = vmatmul.mubr.f32.vlgmr.msra.gmra.mxu1 %v6277_v44  ;;  %v12924_v44 = vld [vmem:[#allocation9_spill] sm:$0xff] }
 0x35f   : > { %6782 = vmatmul.mubr.f32.vlgmr.msra.gmra.mxu0 %v6781_v26  ;;  %6632 = vmatpush1.msra.mxu1 %v12380_v3  ;;  %v12568_v26 = vsub.f32 %v8124_v49, %v12553_v60 }
 0x360   : > { %6905 = vmatpush1.msra.mxu0 %v12427_v43  ;;  %6823 = vmatprep.subr.mxu1 %v12483_v22 }
 0x361   : > { %7056 = vmatprep.subr.mxu0 %v12440_v25  ;;  %6665 = vmatprep.mubr.f32.mxu1 %v12919_v36  ;;  %v8195_v11 = vand.u32 4294901760, %v12568_v26 }
 0x362   : > { %6938 = vmatprep.mubr.f32.mxu0 %v12919_v36  ;;  %6667 = vmatmul.mubr.f32.vlgmr.msra.gmra.mxu1 %v12358_v62  ;;  %v12518_v62 = vand.u32 4294901760, %v7654_v31 }
 0x363   : > { %6941 = vmatmul.mubr.f32.vlgmr.msra.gmra.mxu0 %v12383_v4  ;;  %6829 = vmatpush1.msra.mxu1 %v12499_v24  ;;  %v7726_v4 = vsub.f32 %v12523_v51, %v7725_v10  ;;  %v8196_v55 = vsub.f32 %v12568_v26, %v8195_v11 }
 0x364   : > { %7060 = vmatpush1.msra.mxu0 %v12450_v32  ;;  %6978 = vmatprep.subr.mxu1 %v12385_v53  ;;  %v7765_v28 = vsub.f32 %v7654_v31, %v12518_v62  ;;  %v8624_v31 = vsel %vm1792_vm4, %v8612_v14, 0 }
 0x365   : > { %7213 = vmatprep.subr.mxu0 %v12923_v20  ;;  %6862 = vmatprep.mubr.f32.mxu1 %v12919_v36  ;;  %v7727_v39 = vand.u32 4294901760, %v7726_v4 }
 0x366   : > { %7093 = vmatprep.mubr.f32.mxu0 %v12919_v36  ;;  %6864 = vmatmul.mubr.f32.vlgmr.msra.gmra.mxu1 %v12372_v9 }
 0x367   : > { %7095 = vmatmul.mubr.f32.vlgmr.msra.gmra.mxu0 %v12372_v9  ;;  %6980 = vmatpush1.msra.mxu1 %v12398_v61 }
 0x368   : > { %7215 = vmatpush1.msra.mxu0 %v12924_v44  ;;  %7132 = vmatprep.subr.mxu1 %v12385_v53 }
 0x369   : > { %7374 = vmatprep.subr.mxu0 %v12925_v16  ;;  %7013 = vmatprep.mubr.f32.mxu1 %v12919_v36  ;;  %v8695_v16 = vand.u32 4294901760, %v12613_v7 }
 0x36a   : > { %7248 = vmatprep.mubr.f32.mxu0 %v12919_v36  ;;  %7017 = vmatmul.mubr.f32.vlgmr.msra.gmra.mxu1 %v6779_v57  ;;  %v7766_v57 = vand.u32 4294901760, %v7765_v28 }
 0x36b   : > { %7254 = vmatmul.mubr.f32.vlgmr.msra.gmra.mxu0 %v7253_v29  ;;  %7134 = vmatpush1.msra.mxu1 %v12398_v61 }
 0x36c   : > { %7377 = vmatpush1.msra.mxu0 %v12926_v50  ;;  %7295 = vmatprep.subr.mxu1 %v12927_v23  ;;  %v7767_v38 = vsub.f32 %v7765_v28, %v7766_v57 }
 0x36d   : > { %7528 = vmatprep.subr.mxu0 %v12928_v34  ;;  %7167 = vmatprep.mubr.f32.mxu1 %v12919_v36 }
 0x36e   : > { %7410 = vmatprep.mubr.f32.mxu0 %v12919_v36  ;;  %7169 = vmatmul.mubr.f32.vlgmr.msra.gmra.mxu1 %v12372_v9  ;;  %v7772_v9 = vand.u32 4294901760, %v7771_v54  ;;  %v7768_v6 = vand.u32 4294901760, %v7767_v38 }
 0x36f   : > { %7413 = vmatmul.mubr.f32.vlgmr.msra.gmra.mxu0 %v12459_v46  ;;  %7301 = vmatpush1.msra.mxu1 %v12930_v13 }
 0x370   : > { %7532 = vmatpush1.msra.mxu0 %v12931_v2  ;;  %7450 = vmatprep.subr.mxu1 %v12923_v20  ;;  %v7773_v0 = vsub.f32 %v7771_v54, %v7772_v9 }
 0x371   : > { %7687 = vmatprep.subr.mxu0 %v12518_v62  ;;  %7334 = vmatprep.mubr.f32.mxu1 %v12919_v36 }
 0x372   : > { %7565 = vmatprep.mubr.f32.mxu0 %v12919_v36  ;;  %7336 = vmatmul.mubr.f32.vlgmr.msra.gmra.mxu1 %v12442_v37  ;;  %v7774_v46 = vand.u32 4294901760, %v7773_v0 }
 0x373   : > { %7567 = vmatmul.mubr.f32.vlgmr.msra.gmra.mxu0 %v12442_v37  ;;  %7452 = vmatpush1.msra.mxu1 %v12924_v44 }
 0x374   : > { %7689 = vmatpush1.msra.mxu0 %v12532_v59  ;;  %7604 = vmatprep.subr.mxu1 %v12923_v20  ;;  %v8197_v20 = vand.u32 4294901760, %v8196_v55 }
 0x375   : > { %7848 = vmatprep.subr.mxu0 %v7765_v28  ;;  %7485 = vmatprep.mubr.f32.mxu1 %v12919_v36 }
 0x376   : > { %7722 = vmatprep.mubr.f32.mxu0 %v12919_v36  ;;  %7489 = vmatmul.mubr.f32.vlgmr.msra.gmra.mxu1 %v7251_v33  ;;  %v8611_v33 = vmul.f32 %v12582_v18, %v12468_v63  ;;  %v12608_v63 = vand.u32 4294901760, %v8624_v31 }
 0x377   : > { %7728 = vmatmul.mubr.f32.vlgmr.msra.gmra.mxu0 %v7727_v39  ;;  %7606 = vmatpush1.msra.mxu1 %v12924_v44 }
 0x378   : > { %7851 = vmatpush1.msra.mxu0 %v7771_v54  ;;  %7769 = vmatprep.subr.mxu1 %v7768_v6  ;;  %v8735_v44 = vsub.f32 %v8624_v31, %v12608_v63 }
 0x379   : > { %8002 = vmatprep.subr.mxu0 %v7766_v57  ;;  %7639 = vmatprep.mubr.f32.mxu1 %v12919_v36 }
 0x37a   : > { %7884 = vmatprep.mubr.f32.mxu0 %v12919_v36  ;;  %7641 = vmatmul.mubr.f32.vlgmr.msra.gmra.mxu1 %v12442_v37  ;;  %v8621_v37 = vsel %vm1792_vm4, %v8611_v33, 0 }
 0x37b   : > { %7887 = vmatmul.mubr.f32.vlgmr.msra.gmra.mxu0 %v12523_v51  ;;  %7775 = vmatpush1.msra.mxu1 %v7774_v46  ;;  %v8658_v29 = vand.u32 4294901760, %v8621_v37  ;;  %v8736_v51 = vand.u32 4294901760, %v8735_v44 }
 0x37c   : > { %8006 = vmatpush1.msra.mxu0 %v7772_v9  ;;  %7924 = vmatprep.subr.mxu1 %v12518_v62 }
 0x37d   : > { %8157 = vmatprep.subr.mxu0 %v12380_v3  ;;  %7808 = vmatprep.mubr.f32.mxu1 %v12919_v36 }
 0x37e   : > { %8039 = vmatprep.mubr.f32.mxu0 %v12919_v36  ;;  %7810 = vmatmul.mubr.f32.vlgmr.msra.gmra.mxu1 %v12508_v40 }
 0x37f   : > { %8041 = vmatmul.mubr.f32.vlgmr.msra.gmra.mxu0 %v12508_v40  ;;  %7926 = vmatpush1.msra.mxu1 %v12532_v59 }
 0x380   : > { %8159 = vmatpush1.msra.mxu0 %v12378_v30  ;;  %8078 = vmatprep.subr.mxu1 %v12518_v62  ;;  %v8696_v62 = vsub.f32 %v12613_v7, %v8695_v16 }
 0x381   : > { %8318 = vmatprep.subr.mxu0 %v12391_v52  ;;  %7959 = vmatprep.mubr.f32.mxu1 %v12919_v36  ;;  %v8741_v52 = vsub.f32 %v8621_v37, %v8658_v29 }
 0x382   : > { %8192 = vmatprep.mubr.f32.mxu0 %v12919_v36  ;;  %7963 = vmatmul.mubr.f32.vlgmr.msra.gmra.mxu1 %v7725_v10 }
 0x383   : > { %8198 = vmatmul.mubr.f32.vlgmr.msra.gmra.mxu0 %v8197_v20  ;;  %8080 = vmatpush1.msra.mxu1 %v12532_v59 }
 0x384   : > { %8321 = vmatpush1.msra.mxu0 %v12388_v35  ;;  %8239 = vmatprep.subr.mxu1 %v12437_v15  ;;  %v8742_v35 = vand.u32 4294901760, %v8741_v52  ;;  %v8737_v15 = vsub.f32 %v8735_v44, %v8736_v51 }
 0x385   : > { %8472 = vmatprep.subr.mxu0 %v12406_v58  ;;  %8113 = vmatprep.mubr.f32.mxu1 %v12919_v36  ;;  %v8697_v58 = vand.u32 4294901760, %v8696_v62 }
 0x386   : > { %8354 = vmatprep.mubr.f32.mxu0 %v12919_v36  ;;  %8115 = vmatmul.mubr.f32.vlgmr.msra.gmra.mxu1 %v12508_v40 }
 0x387   : > { %8357 = vmatmul.mubr.f32.vlgmr.msra.gmra.mxu0 %v12568_v26  ;;  %8245 = vmatpush1.msra.mxu1 %v12435_v5  ;;  %v8738_v5 = vand.u32 4294901760, %v8737_v15 }
 0x388   : > { %8476 = vmatpush1.msra.mxu0 %v12402_v17  ;;  %8394 = vmatprep.subr.mxu1 %v12380_v3  ;;  %v8743_v17 = vsub.f32 %v8741_v52, %v8742_v35 }
 0x389   : > { %8657 = vmatprep.subr.mxu0 %v12608_v63  ;;  %8278 = vmatprep.mubr.f32.mxu1 %v12919_v36 }
 0x38a   : > { %8509 = vmatprep.mubr.f32.mxu0 %v12919_v36  ;;  %8280 = vmatmul.mubr.f32.vlgmr.msra.gmra.mxu1 %v12553_v60 }
 0x38b   : > { %8511 = vmatmul.mubr.f32.vlgmr.msra.gmra.mxu0 %v12553_v60  ;;  %8396 = vmatpush1.msra.mxu1 %v12378_v30 }
 0x38c   : > { %8659 = vmatpush1.msra.mxu0 %v8658_v29  ;;  %8548 = vmatprep.subr.mxu1 %v12380_v3  ;;  %v8744_v3 = vand.u32 4294901760, %v8743_v17 }
 0x38d   : > { %8818 = vmatprep.subr.mxu0 %v8735_v44  ;;  %8429 = vmatprep.mubr.f32.mxu1 %v12919_v36 }
 0x38e   : > { %8692 = vmatprep.mubr.f32.mxu0 %v12919_v36  ;;  %8433 = vmatmul.mubr.f32.vlgmr.msra.gmra.mxu1 %v8195_v11 }
 0x38f   : > { %8698 = vmatmul.mubr.f32.vlgmr.msra.gmra.mxu0 %v8697_v58  ;;  %8550 = vmatpush1.msra.mxu1 %v12378_v30 }
 0x390   : > { %8821 = vmatpush1.msra.mxu0 %v8741_v52  ;;  %8739 = vmatprep.subr.mxu1 %v8738_v5 }
 0x391   : > { %8972 = vmatprep.subr.mxu0 %v8736_v51  ;;  %8583 = vmatprep.mubr.f32.mxu1 %v12919_v36 }
 0x392   : > { %8854 = vmatprep.mubr.f32.mxu0 %v12919_v36  ;;  %8585 = vmatmul.mubr.f32.vlgmr.msra.gmra.mxu1 %v12553_v60 }
 0x393   : > { %8857 = vmatmul.mubr.f32.vlgmr.msra.gmra.mxu0 %v12613_v7  ;;  %8745 = vmatpush1.msra.mxu1 %v8744_v3 }
 0x394   : > { %8976 = vmatpush1.msra.mxu0 %v8742_v35  ;;  %8894 = vmatprep.subr.mxu1 %v12608_v63 }
 0x395   : > { %8778 = vmatprep.mubr.f32.mxu1 %v12919_v36  ;;  %9009 = vmatprep.mubr.f32.mxu0 %v12919_v36 }
 0x396   : > { %8780 = vmatmul.mubr.f32.vlgmr.msra.gmra.mxu1 %v12600_v19 }
 0x397   : > { %9011 = vmatmul.mubr.f32.vlgmr.msra.gmra.mxu0 %v12600_v19  ;;  %8896 = vmatpush1.msra.mxu1 %v8658_v29 }
 0x398   : > { %8929 = vmatprep.mubr.f32.mxu1 %v12919_v36  ;;  %9048 = vmatprep.subr.mxu1 %v12608_v63 }
 0x399   : > { %9190 = vmatprep.mubr.f32.mxu0 %v12919_v36 }
 0x39a   : > { %8933 = vmatmul.mubr.f32.vlgmr.msra.gmra.mxu1 %v8695_v16 }
 0x39b   : > { %9050 = vmatpush1.msra.mxu1 %v8658_v29  ;;  %9083 = vmatprep.mubr.f32.mxu1 %v12919_v36 }
 0x39e   : > { %9085 = vmatmul.mubr.f32.vlgmr.msra.gmra.mxu1 %v12600_v19 }
 0x39f   : > { %9276 = vmatprep.mubr.f32.mxu1 %v12919_v36 }
 0x412   : > { %v6281_v30 = vpop.f32.mrf.mxu0 }
 0x414   : > { %v6283_v40 = vpop.f32.mrf.mxu0 }
 0x416   : > { %v6440_v56 = vpop.f32.mrf.mxu0 }
 0x418   : > { %v6442_v59 = vpop.f32.mrf.mxu0 }
 0x41a   : > { %v6594_v28 = vpop.f32.mrf.mxu0  ;;  %v6363_v10 = vpop.f32.mrf.mxu1 }
 0x41b   : > { %v6364_v49 = vadd.f32 %v6363_v10, %v6281_v30 }
 0x41c   : > { %v6596_v50 = vpop.f32.mrf.mxu0  ;;  %v6365_v23 = vpop.f32.mrf.mxu1 }
 0x41d   : > { %v6441_v34 = vadd.f32 %v6440_v56, %v6364_v49  ;;  %v6366_v54 = vadd.f32 %v6365_v23, %v6283_v40 }
 0x41e   : > { %v6516_v4 = vpop.f32.mrf.mxu1 }
 0x41f   : > { %v6783_v57 = vpop.f32.mrf.mxu0  ;;  %v6443_v60 = vadd.f32 %v6442_v59, %v6366_v54  ;;  %v6517_v47 = vadd.f32 %v6516_v4, %v6441_v34 }
 0x420   : > { %v6518_v12 = vpop.f32.mrf.mxu1 }
 0x421   : > { %v6785_v13 = vpop.f32.mrf.mxu0  ;;  %v6595_v2 = vadd.f32 %v6594_v28, %v6517_v47  ;;  %v6519_v9 = vadd.f32 %v6518_v12, %v6443_v60 }
 0x422   : > { %v6668_v1 = vpop.f32.mrf.mxu1 }
 0x423   : > { %v6942_v41 = vpop.f32.mrf.mxu0  ;;  %v6597_v39 = vadd.f32 %v6596_v50, %v6519_v9  ;;  %v6669_v38 = vadd.f32 %v6668_v1, %v6595_v2 }
 0x424   : > { %v6670_v26 = vpop.f32.mrf.mxu1 }
 0x425   : > { %v6944_v8 = vpop.f32.mrf.mxu0  ;;  %v6671_v0 = vadd.f32 %v6670_v26, %v6597_v39  ;;  %v6698_v62 = vmul.f32 %v12479_v21, %v6669_v38 }
 0x426   : > { %v6865_v6 = vpop.f32.mrf.mxu1 }
 0x427   : > { %v7096_v11 = vpop.f32.mrf.mxu0  ;;  %v6866_v14 = vadd.f32 %v6865_v6, %v6783_v57  ;;  %v6699_v17 = vmul.f32 %v12462_v45, %v6671_v0 }
 0x428   : > { %v6867_v48 = vpop.f32.mrf.mxu1 }
 0x429   : > { %v7098_v46 = vpop.f32.mrf.mxu0  ;;  %v6943_v33 = vadd.f32 %v6942_v41, %v6866_v14  ;;  %v6868_v55 = vadd.f32 %v6867_v48, %v6785_v13 }
 0x42a   : > { %v7018_v19 = vpop.f32.mrf.mxu1 }
 0x42b   : > { %v7255_v31 = vpop.f32.mrf.mxu0  ;;  %v6945_v37 = vadd.f32 %v6944_v8, %v6868_v55  ;;  %v7019_v63 = vadd.f32 %v7018_v19, %v6943_v33 }
 0x42c   : > { %v7020_v20 = vpop.f32.mrf.mxu1 }
 0x42d   : > { %v7257_v7 = vpop.f32.mrf.mxu0  ;;  %v7097_v29 = vadd.f32 %v7096_v11, %v7019_v63  ;;  %v7021_v44 = vadd.f32 %v7020_v20, %v6945_v37 }
 0x42e   : > { %v7170_v16 = vpop.f32.mrf.mxu1 }
 0x42f   : > { %v7414_v52 = vpop.f32.mrf.mxu0  ;;  %v7099_v51 = vadd.f32 %v7098_v46, %v7021_v44  ;;  %v7171_v35 = vadd.f32 %v7170_v16, %v7097_v29 }
 0x430   : > { %v7172_v58 = vpop.f32.mrf.mxu1 }
 0x431   : > { %v7416_v15 = vpop.f32.mrf.mxu0  ;;  %v12666_v5 = vadd.f32 %v7171_v35, %v6698_v62  ;;  %v7173_v3 = vadd.f32 %v7172_v58, %v7099_v51 }
 0x432   : > { %v7337_v30 = vpop.f32.mrf.mxu1 }
 0x433   : > { %v7568_v40 = vpop.f32.mrf.mxu0  ;;  %v12668_v56 = vadd.f32 %v7173_v3, %v6699_v17  ;;  %v7338_v49 = vadd.f32 %v7337_v30, %v7255_v31 }
 0x434   : > { %v7339_v59 = vpop.f32.mrf.mxu1 }
 0x435   : > { %v7570_v28 = vpop.f32.mrf.mxu0  ;;  %v7340_v34 = vadd.f32 %v7339_v59, %v7257_v7  ;;  %v7415_v57 = vadd.f32 %v7414_v52, %v7338_v49 }
 0x436   : > { %v7490_v10 = vpop.f32.mrf.mxu1 }
 0x437   : > { %v7729_v50 = vpop.f32.mrf.mxu0  ;;  %v7417_v47 = vadd.f32 %v7416_v15, %v7340_v34  ;;  %v7491_v2 = vadd.f32 %v7490_v10, %v7415_v57 }
 0x438   : > { %v7492_v23 = vpop.f32.mrf.mxu1 }
 0x439   : > { %v7731_v21 = vpop.f32.mrf.mxu0  ;;  %v7493_v41 = vadd.f32 %v7492_v23, %v7417_v47  ;;  %v7569_v26 = vadd.f32 %v7568_v40, %v7491_v2  ;;  %v9114_v23 = vld [vmem:[%s12837_s14] sm:$0xf] }
 0x43a   : > { %v7642_v54 = vpop.f32.mrf.mxu1 }
 0x43b   : > { %v7888_v4 = vpop.f32.mrf.mxu0  ;;  %v7571_v6 = vadd.f32 %v7570_v28, %v7493_v41  ;;  %v7643_v48 = vadd.f32 %v7642_v54, %v7569_v26 }
 0x43c   : > { %v7644_v60 = vpop.f32.mrf.mxu1 }
 0x43d   : > { %v7890_v45 = vpop.f32.mrf.mxu0  ;;  %v7645_v55 = vadd.f32 %v7644_v60, %v7571_v6  ;;  %v7730_v37 = vadd.f32 %v7729_v50, %v7643_v48 }
 0x43e   : > { %v7811_v12 = vpop.f32.mrf.mxu1 }
 0x43f   : > { %v8042_v13 = vpop.f32.mrf.mxu0  ;;  %v7732_v29 = vadd.f32 %v7731_v21, %v7645_v55  ;;  %v7812_v51 = vadd.f32 %v7811_v12, %v7730_v37  ;;  %v9116_v12 = vsel %vm1788_vm1, %v9114_v23, 0 }
 0x440   : > { %v7813_v9 = vpop.f32.mrf.mxu1  ;;  %v12682_v48 = vand.u32 4294901760, %v9116_v12 }
 0x441   : > { %v8044_v1 = vpop.f32.mrf.mxu0  ;;  %v7814_v3 = vadd.f32 %v7813_v9, %v7732_v29  ;;  %v7889_v10 = vadd.f32 %v7888_v4, %v7812_v51 }
 0x442   : > { %v7964_v39 = vpop.f32.mrf.mxu1 }
 0x443   : > { %v8199_v38 = vpop.f32.mrf.mxu0  ;;  %v7891_v34 = vadd.f32 %v7890_v45, %v7814_v3  ;;  %v7965_v2 = vadd.f32 %v7964_v39, %v7889_v10 }
 0x444   : > { %v7966_v8 = vpop.f32.mrf.mxu1 }
 0x445   : > { %v8201_v0 = vpop.f32.mrf.mxu0  ;;  %v7967_v26 = vadd.f32 %v7966_v8, %v7891_v34  ;;  %v9192_v8 = vsub.f32 %v9116_v12, %v12682_v48 }
 0x446   : > { %v8116_v11 = vpop.f32.mrf.mxu1 }
 0x447   : > { %v8358_v14 = vpop.f32.mrf.mxu0  ;;  %v9193_v51 = vand.u32 4294901760, %v9192_v8 }
 0x448   : > { %v8118_v46 = vpop.f32.mrf.mxu1 }
 0x449   : > { %v8360_v33 = vpop.f32.mrf.mxu0  ;;  %v9194_v3 = vsub.f32 %v9192_v8, %v9193_v51 }
 0x44a   : > { %v8281_v19 = vpop.f32.mrf.mxu1 }
 0x44b   : > { %v8512_v31 = vpop.f32.mrf.mxu0  ;;  %v8282_v63 = vadd.f32 %v8281_v19, %v8199_v38  ;;  %v9195_v10 = vand.u32 4294901760, %v9194_v3 }
 0x44c   : > { %v8283_v20 = vpop.f32.mrf.mxu1 }
 0x44d   : > { %v8514_v7 = vpop.f32.mrf.mxu0  ;;  %v8359_v44 = vadd.f32 %v8358_v14, %v8282_v63  ;;  %v8284_v16 = vadd.f32 %v8283_v20, %v8201_v0 }
 0x44e   : > { %v8434_v52 = vpop.f32.mrf.mxu1 }
 0x44f   : > { %v8699_v62 = vpop.f32.mrf.mxu0  ;;  %v8361_v35 = vadd.f32 %v8360_v33, %v8284_v16  ;;  %v8435_v58 = vadd.f32 %v8434_v52, %v8359_v44  ;;  %v8043_v33 = vadd.f32 %v8042_v13, %v7965_v2  ;;  %v9113_v13 = vld [vmem:[%s12836_s13] sm:$0xf] }
 0x450   : > { %v8436_v15 = vpop.f32.mrf.mxu1 }
 0x451   : > { %v8701_v17 = vpop.f32.mrf.mxu0  ;;  %v8513_v30 = vadd.f32 %v8512_v31, %v8435_v58  ;;  %v8437_v40 = vadd.f32 %v8436_v15, %v8361_v35  ;;  %v8117_v20 = vadd.f32 %v8116_v11, %v8043_v33  ;;  %v9590_v58 = vsel %vm6204_vm11, %v9113_v13, 0 }
 0x452   : > { %v8586_v59 = vpop.f32.mrf.mxu1 }
 0x453   : > { %v8858_v28 = vpop.f32.mrf.mxu0  ;;  %v8515_v50 = vadd.f32 %v8514_v7, %v8437_v40  ;;  %v8587_v49 = vadd.f32 %v8586_v59, %v8513_v30  ;;  %v9659_v40 = vand.u32 4294901760, %v9590_v58 }
 0x454   : > { %v8588_v21 = vpop.f32.mrf.mxu1 }
 0x455   : > { %v8609_v54 = vmul.f32 %v12582_v18, %v8587_v49  ;;  %v8589_v57 = vadd.f32 %v8588_v21, %v8515_v50  ;;  %v8860_v47 = vpop.f32.mrf.mxu0  ;;  %v9660_v49 = vsub.f32 %v9590_v58, %v9659_v40 }
 0x456   : > { %v8781_v60 = vpop.f32.mrf.mxu1 }
 0x457   : > { %v12676_v9 = vadd.f32 %v8609_v54, %v12666_v5  ;;  %v8610_v4 = vmul.f32 %v12571_v27, %v8589_v57  ;;  %v8782_v41 = vadd.f32 %v8781_v60, %v8699_v62  ;;  %v9012_v14 = vpop.f32.mrf.mxu0  ;;  %v8045_v5 = vadd.f32 %v8044_v1, %v7967_v26  ;;  %v9107_v62 = vpop.permute.xlu0 %9106 }
 0x458   : > { %v8783_v38 = vpop.f32.mrf.mxu1  ;;  %v9661_v57 = vand.u32 4294901760, %v9660_v49 }
 0x459   : > { %v12680_v0 = vadd.f32 %v8610_v4, %v12668_v56  ;;  %v8859_v45 = vadd.f32 %v8858_v28, %v8782_v41  ;;  %v8784_v6 = vadd.f32 %v8783_v38, %v8701_v17  ;;  %v9014_v27 = vpop.f32.mrf.mxu0  ;;  %v8119_v44 = vadd.f32 %v8118_v46, %v8045_v5  ;;  %v10069_v5 = vld [vmem:[%s12840_s17] sm:$0xff] }
 0x45a   : > { %v8934_v18 = vpop.f32.mrf.mxu1  ;;  %v9662_v2 = vsub.f32 %v9660_v49, %v9661_v57 }
 0x45b   : > { %v8861_v55 = vadd.f32 %v8860_v47, %v8784_v6  ;;  %v8935_v39 = vadd.f32 %v8934_v18, %v8859_v45 }
 0x45c   : > { %v8936_v19 = vpop.f32.mrf.mxu1  ;;  %v9663_v4 = vand.u32 4294901760, %v9662_v2 }
 0x45d   : > { %v9013_v31 = vadd.f32 %v9012_v14, %v8935_v39  ;;  %v8937_v37 = vadd.f32 %v8936_v19, %v8861_v55 }
 0x45e   : > { %v9086_v63 = vpop.f32.mrf.mxu1 }
 0x45f   : > { %v9015_v56 = vadd.f32 %v9014_v27, %v8937_v37  ;;  %v9087_v7 = vadd.f32 %v9086_v63, %v9013_v31 }
 0x460   : > { %v9088_v29 = vpop.f32.mrf.mxu1 }
 0x461   : > { %v9091_v16 = vadd.f32 %v9087_v7, %v8117_v20  ;;  %v9089_v52 = vadd.f32 %v9088_v29, %v9015_v56  ;;  %v10072_v56 = vsel %vm1788_vm1, %v10069_v5, 0 }
 0x463   : > { %v9109_v1 = vadd.f32 %v9107_v62, %v9091_v16  ;;  %v9092_v35 = vadd.f32 %v9089_v52, %v8119_v44  ;;  %v10070_v44 = vld [vmem:[%s12840_s17 + $0x8] sm:$0xff] }
 0x465   : > { %v9111_v15 = vmax.f32 %v9109_v1, 0.0  ;;  %v9110_v17 = vadd.f32 %v9107_v62, %v9092_v35  ;;  %v12725_v62 = vand.u32 4294901760, %v10072_v56  ;;  %v10075_v35 = vsel %vm1788_vm1, %v10070_v44, 0 }
 0x467   : > { %v9119_v11 = vsel %vm1792_vm4, %v9111_v15, 0  ;;  %v9112_v30 = vmax.f32 %v9110_v17, 0.0 }
 0x468   : > { %v9156_v46 = vand.u32 4294901760, %v9119_v11 }
 0x469   : > { %v9122_v59 = vsel %vm1792_vm4, %v9112_v30, 0  ;;  %v12729_v30 = vsub.f32 %v10072_v56, %v12725_v62 }
 0x46a   : > { %v9154_v28 = vand.u32 4294901760, %v9122_v59  ;;  %v9239_v50 = vsub.f32 %v9119_v11, %v9156_v46 }
 0x46c   : > { %9155 = vmatprep.subr.mxu0 %v9154_v28  ;;  %v9233_v23 = vsub.f32 %v9122_v59, %v9154_v28  ;;  %v9240_v21 = vand.u32 4294901760, %v9239_v50 }
 0x46d   : > { %9157 = vmatpush1.msra.mxu0 %v9156_v46 }
 0x46e   : > { %9196 = vmatmul.mubr.f32.vlgmr.msra.gmra.mxu0 %v9195_v10  ;;  %9316 = vmatprep.subr.mxu0 %v9233_v23  ;;  %v9234_v34 = vand.u32 4294901760, %v9233_v23  ;;  %v9241_v54 = vsub.f32 %v9239_v50, %v9240_v21 }
 0x46f   : > { %9319 = vmatpush1.msra.mxu0 %v9239_v50  ;;  %9352 = vmatprep.mubr.f32.mxu0 %v12919_v36  ;;  %v10061_v50 = vpop.permute.xlu1 %10060 }
 0x470   : > { %9470 = vmatprep.subr.mxu0 %v9234_v34  ;;  %v9235_v60 = vsub.f32 %v9233_v23, %v9234_v34  ;;  %v9242_v12 = vand.u32 4294901760, %v9241_v54  ;;  %v10152_v54 = vand.u32 4294901760, %v12729_v30 }
 0x472   : > { %9355 = vmatmul.mubr.f32.vlgmr.msra.gmra.mxu0 %v9192_v8  ;;  %v9236_v47 = vand.u32 4294901760, %v9235_v60 }
 0x473   : > { %9474 = vmatpush1.msra.mxu0 %v9240_v21  ;;  %9507 = vmatprep.mubr.f32.mxu0 %v12919_v36  ;;  %v9097_v21 = vpop.permute.xlu0 %9096 }
 0x474   : > { %9623 = vmatprep.subr.mxu0 %v12385_v53  ;;  %9237 = vmatprep.subr.mxu1 %v9236_v47  ;;  %v9100_v60 = vadd.f32 %v9097_v21, %v12680_v0 }
 0x475   : > { %9243 = vmatpush1.msra.mxu1 %v9242_v12 }
 0x476   : > { %9278 = vmatmul.mubr.f32.vlgmr.msra.gmra.mxu1 %v12682_v48  ;;  %9392 = vmatprep.subr.mxu1 %v9154_v28 }
 0x477   : > { %9509 = vmatmul.mubr.f32.vlgmr.msra.gmra.mxu0 %v12682_v48  ;;  %9394 = vmatpush1.msra.mxu1 %v9156_v46 }
 0x478   : > { %9625 = vmatpush1.msra.mxu0 %v12398_v61  ;;  %9546 = vmatprep.subr.mxu1 %v9154_v28 }
 0x479   : > { %9784 = vmatprep.subr.mxu0 %v12410_v42  ;;  %9427 = vmatprep.mubr.f32.mxu1 %v12919_v36 }
 0x47a   : > { %9658 = vmatprep.mubr.f32.mxu0 %v12919_v36  ;;  %9431 = vmatmul.mubr.f32.vlgmr.msra.gmra.mxu1 %v9193_v51 }
 0x47b   : > { %9548 = vmatpush1.msra.mxu1 %v9156_v46  ;;  %9664 = vmatmul.mubr.f32.vlgmr.msra.gmra.mxu0 %v9663_v4 }
 0x47c   : > { %9787 = vmatpush1.msra.mxu0 %v12427_v43  ;;  %9705 = vmatprep.subr.mxu1 %v12483_v22 }
 0x47d   : > { %9938 = vmatprep.subr.mxu0 %v12440_v25  ;;  %9581 = vmatprep.mubr.f32.mxu1 %v12919_v36 }
 0x47e   : > { %9820 = vmatprep.mubr.f32.mxu0 %v12919_v36  ;;  %9583 = vmatmul.mubr.f32.vlgmr.msra.gmra.mxu1 %v12682_v48 }
 0x47f   : > { %9711 = vmatpush1.msra.mxu1 %v12499_v24  ;;  %9823 = vmatmul.mubr.f32.vlgmr.msra.gmra.mxu0 %v9660_v49 }
 0x480   : > { %9942 = vmatpush1.msra.mxu0 %v12450_v32  ;;  %9860 = vmatprep.subr.mxu1 %v12385_v53 }
 0x481   : > { %9744 = vmatprep.mubr.f32.mxu1 %v12919_v36  ;;  %9975 = vmatprep.mubr.f32.mxu0 %v12919_v36 }
 0x482   : > { %9746 = vmatmul.mubr.f32.vlgmr.msra.gmra.mxu1 %v9659_v40 }
 0x483   : > { %9862 = vmatpush1.msra.mxu1 %v12398_v61  ;;  %9895 = vmatprep.mubr.f32.mxu1 %v12919_v36 }
 0x484   : > { %10014 = vmatprep.subr.mxu1 %v12385_v53  ;;  %9977 = vmatmul.mubr.f32.vlgmr.msra.gmra.mxu0 %v9659_v40 }
 0x485   : > { %10149 = vmatprep.mubr.f32.mxu0 %v12919_v36 }
 0x486   : > { %9899 = vmatmul.mubr.f32.vlgmr.msra.gmra.mxu1 %v9661_v57 }
 0x487   : > { %10016 = vmatpush1.msra.mxu1 %v12398_v61  ;;  %10049 = vmatprep.mubr.f32.mxu1 %v12919_v36 }
 0x48a   : > { %10051 = vmatmul.mubr.f32.vlgmr.msra.gmra.mxu1 %v9659_v40  ;;  %v12731_v40 = vand.u32 4294901760, %v10075_v35 }
 0x48b   : > { %10246 = vmatprep.mubr.f32.mxu1 %v12919_v36 }
 0x48c   : > { %v12735_v57 = vsub.f32 %v10075_v35, %v12731_v40 }
 0x52e   : > { %v9197_v42 = vpop.f32.mrf.mxu0 }
 0x530   : > { %v9199_v43 = vpop.f32.mrf.mxu0 }
 0x532   : > { %v9356_v25 = vpop.f32.mrf.mxu0 }
 0x534   : > { %v9358_v32 = vpop.f32.mrf.mxu0 }
 0x536   : > { %v9279_v22 = vpop.f32.mrf.mxu1 }
 0x537   : > { %v9280_v24 = vadd.f32 %v9279_v22, %v9197_v42  ;;  %v9510_v41 = vpop.f32.mrf.mxu0  ;;  %v10153_v42 = vsub.f32 %v12729_v30, %v10152_v54 }
 0x538   : > { %v9281_v38 = vpop.f32.mrf.mxu1 }
 0x539   : > { %v9357_v53 = vadd.f32 %v9356_v25, %v9280_v24  ;;  %v9282_v26 = vadd.f32 %v9281_v38, %v9199_v43  ;;  %v9512_v45 = vpop.f32.mrf.mxu0  ;;  %v10163_v43 = vand.u32 4294901760, %v12735_v57  ;;  %v9102_v25 = vmax.f32 %v9100_v60, 0.0 }
 0x53a   : > { %v9432_v6 = vpop.f32.mrf.mxu1 }
 0x53b   : > { %v9359_v18 = vadd.f32 %v9358_v32, %v9282_v26  ;;  %v9433_v14 = vadd.f32 %v9432_v6, %v9357_v53  ;;  %v9665_v61 = vpop.f32.mrf.mxu0  ;;  %v10154_v26 = vand.u32 4294901760, %v10153_v42  ;;  %v10607_v6 = vsel %vm1792_vm4, %v9102_v25, 0 }
 0x53c   : > { %v9434_v48 = vpop.f32.mrf.mxu1 }
 0x53d   : > { %v9511_v33 = vadd.f32 %v9510_v41, %v9433_v14  ;;  %v9435_v55 = vadd.f32 %v9434_v48, %v9359_v18  ;;  %v9667_v39 = vpop.f32.mrf.mxu0  ;;  %v9099_v41 = vadd.f32 %v9097_v21, %v12676_v9 }
 0x53e   : > { %v9584_v19 = vpop.f32.mrf.mxu1 }
 0x53f   : > { %v9513_v31 = vadd.f32 %v9512_v45, %v9435_v55  ;;  %v9585_v37 = vadd.f32 %v9584_v19, %v9511_v33  ;;  %v9824_v27 = vpop.f32.mrf.mxu0  ;;  %v10164_v45 = vsub.f32 %v12735_v57, %v10163_v43  ;;  %v9101_v9 = vmax.f32 %v9099_v41, 0.0 }
 0x540   : > { %v9586_v63 = vpop.f32.mrf.mxu1  ;;  %v12752_v55 = vand.u32 4294901760, %v10607_v6 }
 0x541   : > { %v9666_v8 = vadd.f32 %v9665_v61, %v9585_v37  ;;  %v9587_v20 = vadd.f32 %v9586_v63, %v9513_v31  ;;  %v9826_v29 = vpop.f32.mrf.mxu0  ;;  %v10067_v61 = vld [vmem:[%s12839_s16] sm:$0xff]  ;;  %v10165_v33 = vand.u32 4294901760, %v10164_v45  ;;  %v10068_v31 = vld [vmem:[%s12839_s16 + $0x8] sm:$0xff] }
 0x542   : > { %v9747_v7 = vpop.f32.mrf.mxu1  ;;  %v10598_v5 = vsel %vm1788_vm1, %v10067_v61, 0  ;;  %v10729_v63 = vsub.f32 %v10607_v6, %v12752_v55  ;;  %v10601_v56 = vsel %vm1788_vm1, %v10068_v31, 0 }
 0x543   : > { %v9668_v16 = vadd.f32 %v9667_v39, %v9587_v20  ;;  %v9748_v52 = vadd.f32 %v9747_v7, %v9666_v8  ;;  %v12762_v20 = vand.u32 4294901760, %v10598_v5 }
 0x544   : > { %v9749_v13 = vpop.f32.mrf.mxu1  ;;  %v9978_v15 = vpop.f32.mrf.mxu0 }
 0x545   : > { %v9825_v51 = vadd.f32 %v9824_v27, %v9748_v52  ;;  %v9750_v1 = vadd.f32 %v9749_v13, %v9668_v16  ;;  %v10604_v27 = vsel %vm1792_vm4, %v9101_v9, 0  ;;  %v10677_v44 = vsub.f32 %v10598_v5, %v12762_v20 }
 0x546   : > { %v9900_v58 = vpop.f32.mrf.mxu1  ;;  %v9980_v28 = vpop.f32.mrf.mxu0  ;;  %v12765_v7 = vand.u32 4294901760, %v10604_v27  ;;  %v12770_v16 = vand.u32 4294901760, %v10601_v56 }
 0x547   : > { %v9827_v17 = vadd.f32 %v9826_v29, %v9750_v1  ;;  %v9901_v3 = vadd.f32 %v9900_v58, %v9825_v51  ;;  %v10730_v29 = vand.u32 4294901760, %v10729_v63  ;;  %v10678_v51 = vand.u32 4294901760, %v10677_v44 }
 0x548   : > { %v9902_v11 = vpop.f32.mrf.mxu1  ;;  %v10735_v52 = vsub.f32 %v10604_v27, %v12765_v7  ;;  %v10688_v1 = vsub.f32 %v10601_v56, %v12770_v16 }
 0x549   : > { %v9979_v46 = vadd.f32 %v9978_v15, %v9901_v3  ;;  %v9903_v59 = vadd.f32 %v9902_v11, %v9827_v17  ;;  %v10731_v13 = vsub.f32 %v10729_v63, %v10730_v29  ;;  %v10679_v15 = vsub.f32 %v10677_v44, %v10678_v51 }
 0x54a   : > { %v10052_v10 = vpop.f32.mrf.mxu1  ;;  %v10736_v35 = vand.u32 4294901760, %v10735_v52  ;;  %v10689_v17 = vand.u32 4294901760, %v10688_v1 }
 0x54b   : > { %v9981_v49 = vadd.f32 %v9980_v28, %v9903_v59  ;;  %v10053_v23 = vadd.f32 %v10052_v10, %v9979_v46  ;;  %v10732_v58 = vand.u32 4294901760, %v10731_v13  ;;  %v10680_v11 = vand.u32 4294901760, %v10679_v15 }
 0x54c   : > { %v10054_v34 = vpop.f32.mrf.mxu1  ;;  %v10737_v3 = vsub.f32 %v10735_v52, %v10736_v35 }
 0x54d   : > { %v10063_v47 = vadd.f32 %v10061_v50, %v10053_v23  ;;  %v10055_v12 = vadd.f32 %v10054_v34, %v9981_v49 }
 0x54e   : > { %v10738_v46 = vand.u32 4294901760, %v10737_v3 }
 0x54f   : > { %v10065_v2 = vmax.f32 %v10063_v47, 0.0  ;;  %v10064_v4 = vadd.f32 %v10061_v50, %v10055_v12 }
 0x551   : > { %v10078_v32 = vsel %vm1792_vm4, %v10065_v2, 0  ;;  %v10066_v22 = vmax.f32 %v10064_v4, 0.0 }
 0x552   : > { %v10115_v24 = vand.u32 4294901760, %v10078_v32 }
 0x553   : > { %v10081_v38 = vsel %vm1792_vm4, %v10066_v22, 0 }
 0x554   : > { %v10209_v0 = vsub.f32 %v10078_v32, %v10115_v24  ;;  %v10113_v53 = vand.u32 4294901760, %v10081_v38 }
 0x556   : > { %10114 = vmatprep.subr.mxu0 %v10113_v53  ;;  %v10203_v18 = vsub.f32 %v10081_v38, %v10113_v53  ;;  %v10210_v14 = vand.u32 4294901760, %v10209_v0 }
 0x557   : > { %10116 = vmatpush1.msra.mxu0 %v10115_v24 }
 0x558   : > { %10155 = vmatmul.mubr.f32.vlgmr.msra.gmra.mxu0 %v10154_v26  ;;  %10293 = vmatprep.subr.mxu0 %v10203_v18  ;;  %v10204_v48 = vand.u32 4294901760, %v10203_v18  ;;  %v10211_v39 = vsub.f32 %v10209_v0, %v10210_v14 }
 0x559   : > { %10296 = vmatpush1.msra.mxu0 %v10209_v0  ;;  %10160 = vmatprep.mubr.f32.mxu0 %v12919_v36 }
 0x55a   : > { %10464 = vmatprep.subr.mxu0 %v10204_v48  ;;  %v10205_v19 = vsub.f32 %v10203_v18, %v10204_v48  ;;  %v10212_v8 = vand.u32 4294901760, %v10211_v39 }
 0x55c   : > { %10166 = vmatmul.mubr.f32.gmra.mxu0 %v10165_v33  ;;  %v10206_v37 = vand.u32 4294901760, %v10205_v19 }
 0x55d   : > { %10329 = vmatprep.mubr.f32.mxu0 %v12919_v36 }
 0x55e   : > { %10207 = vmatprep.subr.mxu1 %v10206_v37 }
 0x55f   : > { %10213 = vmatpush1.msra.mxu1 %v10212_v8 }
 0x560   : > { %10248 = vmatmul.mubr.f32.vlgmr.msra.gmra.mxu1 %v12725_v62  ;;  %10332 = vmatmul.mubr.f32.vlgmr.msra.gmra.mxu0 %v12729_v30  ;;  %v10690_v30 = vsub.f32 %v10688_v1, %v10689_v17 }
 0x561   : > { %10377 = vmatprep.subr.mxu1 %v10113_v53  ;;  %10468 = vmatpush1.msra.mxu0 %v10210_v14 }
 0x562   : > { %10379 = vmatpush1.msra.mxu1 %v10115_v24  ;;  %10640 = vmatprep.subr.mxu0 %v12752_v55  ;;  %v10691_v59 = vand.u32 4294901760, %v10690_v30 }
 0x563   : > { %10547 = vmatprep.subr.mxu1 %v10113_v53  ;;  %10253 = vmatprep.mubr.f32.mxu1 %v12919_v36 }
 0x564   : > { %10337 = vmatprep.mubr.f32.mxu0 %v12919_v36  ;;  %10255 = vmatmul.mubr.f32.gmra.mxu1 %v12731_v40 }
 0x565   : > { %10340 = vmatmul.mubr.f32.gmra.mxu0 %v12735_v57  ;;  %10412 = vmatprep.mubr.f32.mxu1 %v12919_v36 }
 0x566   : > { %10501 = vmatprep.mubr.f32.mxu0 %v12919_v36 }
 0x568   : > { %10416 = vmatmul.mubr.f32.vlgmr.msra.gmra.mxu1 %v10152_v54 }
 0x569   : > { %10503 = vmatmul.mubr.f32.vlgmr.msra.gmra.mxu0 %v12725_v62  ;;  %10549 = vmatpush1.msra.mxu1 %v10115_v24 }
 0x56a   : > { %10642 = vmatpush1.msra.mxu0 %v12765_v7  ;;  %10733 = vmatprep.subr.mxu1 %v10732_v58 }
 0x56b   : > { %10819 = vmatprep.subr.mxu0 %v10729_v63  ;;  %10421 = vmatprep.mubr.f32.mxu1 %v12919_v36 }
 0x56c   : > { %10508 = vmatprep.mubr.f32.mxu0 %v12919_v36  ;;  %10425 = vmatmul.mubr.f32.gmra.mxu1 %v10163_v43 }
 0x56d   : > { %10510 = vmatmul.mubr.f32.gmra.mxu0 %v12731_v40  ;;  %10582 = vmatprep.mubr.f32.mxu1 %v12919_v36 }
 0x56e   : > { %10675 = vmatprep.mubr.f32.mxu0 %v12919_v36 }
 0x570   : > { %10584 = vmatmul.mubr.f32.vlgmr.msra.gmra.mxu1 %v12725_v62 }
 0x571   : > { %10681 = vmatmul.mubr.f32.vlgmr.msra.gmra.mxu0 %v10680_v11  ;;  %10739 = vmatpush1.msra.mxu1 %v10738_v46 }
 0x572   : > { %10822 = vmatpush1.msra.mxu0 %v10735_v52  ;;  %10903 = vmatprep.subr.mxu1 %v12752_v55 }
 0x573   : > { %10990 = vmatprep.subr.mxu0 %v10730_v29  ;;  %10589 = vmatprep.mubr.f32.mxu1 %v12919_v36 }
 0x574   : > { %10686 = vmatprep.mubr.f32.mxu0 %v12919_v36  ;;  %10591 = vmatmul.mubr.f32.gmra.mxu1 %v12731_v40 }
 0x575   : > { %10692 = vmatmul.mubr.f32.gmra.mxu0 %v10691_v59  ;;  %10772 = vmatprep.mubr.f32.mxu1 %v12919_v36 }
 0x576   : > { %10855 = vmatprep.mubr.f32.mxu0 %v12919_v36 }
 0x578   : > { %10774 = vmatmul.mubr.f32.vlgmr.msra.gmra.mxu1 %v12762_v20 }
 0x579   : > { %10858 = vmatmul.mubr.f32.vlgmr.msra.gmra.mxu0 %v10677_v44  ;;  %10905 = vmatpush1.msra.mxu1 %v12765_v7 }
 0x57a   : > { %10994 = vmatpush1.msra.mxu0 %v10736_v35  ;;  %11073 = vmatprep.subr.mxu1 %v12752_v55 }
 0x57b   : > { %10779 = vmatprep.mubr.f32.mxu1 %v12919_v36  ;;  %10863 = vmatprep.mubr.f32.mxu0 %v12919_v36 }
 0x57c   : > { %10781 = vmatmul.mubr.f32.gmra.mxu1 %v12770_v16 }
 0x57d   : > { %10866 = vmatmul.mubr.f32.gmra.mxu0 %v10688_v1  ;;  %10938 = vmatprep.mubr.f32.mxu1 %v12919_v36 }
 0x57e   : > { %11027 = vmatprep.mubr.f32.mxu0 %v12919_v36 }
 0x580   : > { %10942 = vmatmul.mubr.f32.vlgmr.msra.gmra.mxu1 %v10678_v51 }
 0x581   : > { %11075 = vmatpush1.msra.mxu1 %v12765_v7  ;;  %11029 = vmatmul.mubr.f32.vlgmr.msra.gmra.mxu0 %v12762_v20 }
 0x582   : > { %10947 = vmatprep.mubr.f32.mxu1 %v12919_v36  ;;  %11034 = vmatprep.mubr.f32.mxu0 %v12919_v36 }
 0x584   : > { %10951 = vmatmul.mubr.f32.gmra.mxu1 %v10689_v17 }
 0x585   : > { %11036 = vmatmul.mubr.f32.gmra.mxu0 %v12770_v16  ;;  %11108 = vmatprep.mubr.f32.mxu1 %v12919_v36 }
 0x588   : > { %11110 = vmatmul.mubr.f32.vlgmr.msra.gmra.mxu1 %v12762_v20 }
 0x589   : > { %11115 = vmatprep.mubr.f32.mxu1 %v12919_v36 }
 0x58c   : > { %11117 = vmatmul.mubr.f32.gmra.mxu1 %v12770_v16 }
 0x618   : > { %v10156_v62 = vpop.f32.mrf.mxu0 }
 0x61a   : > { %v10158_v40 = vpop.f32.mrf.mxu0 }
 0x61c   : > { %v10167_v28 = vpop.f32.mrf.mxu0 }
 0x61e   : > { %v10169_v10 = vpop.f32.mrf.mxu0 }
 0x620   : > { %v10249_v50 = vpop.f32.mrf.mxu1  ;;  %v10333_v49 = vpop.f32.mrf.mxu0 }
 0x621   : > { %v10250_v4 = vadd.f32 %v10249_v50, %v10156_v62 }
 0x622   : > { %v10251_v23 = vpop.f32.mrf.mxu1  ;;  %v10335_v21 = vpop.f32.mrf.mxu0 }
 0x623   : > { %v10252_v43 = vadd.f32 %v10251_v23, %v10158_v40  ;;  %v10334_v22 = vadd.f32 %v10333_v49, %v10250_v4 }
 0x624   : > { %v10256_v34 = vpop.f32.mrf.mxu1 }
 0x625   : > { %v10341_v54 = vpop.f32.mrf.mxu0  ;;  %v10257_v24 = vadd.f32 %v10256_v34, %v10167_v28  ;;  %v10336_v0 = vadd.f32 %v10335_v21, %v10252_v43 }
 0x626   : > { %v10258_v57 = vpop.f32.mrf.mxu1 }
 0x627   : > { %v10343_v60 = vpop.f32.mrf.mxu0  ;;  %v10259_v53 = vadd.f32 %v10258_v57, %v10169_v10  ;;  %v10342_v18 = vadd.f32 %v10341_v54, %v10257_v24 }
 0x628   : > { %v10417_v47 = vpop.f32.mrf.mxu1 }
 0x629   : > { %v10504_v12 = vpop.f32.mrf.mxu0  ;;  %v10418_v26 = vadd.f32 %v10417_v47, %v10334_v22  ;;  %v10344_v48 = vadd.f32 %v10343_v60, %v10259_v53 }
 0x62a   : > { %v10419_v2 = vpop.f32.mrf.mxu1 }
 0x62b   : > { %v10506_v42 = vpop.f32.mrf.mxu0  ;;  %v10420_v14 = vadd.f32 %v10419_v2, %v10336_v0  ;;  %v10505_v33 = vadd.f32 %v10504_v12, %v10418_v26 }
 0x62c   : > { %v10426_v36 = vpop.f32.mrf.mxu1 }
 0x62d   : > { %v10511_v25 = vpop.f32.mrf.mxu0  ;;  %v10427_v55 = vadd.f32 %v10426_v36, %v10342_v18  ;;  %v10507_v5 = vadd.f32 %v10506_v42, %v10420_v14  ;;  %v11128_v42 = vpop.permute.xlu1 %11127 }
 0x62e   : > { %v10428_v32 = vpop.f32.mrf.mxu1  ;;  %v11133_v18 = vpop.permute.xlu0 %11132 }
 0x62f   : > { %v10513_v41 = vpop.f32.mrf.mxu0  ;;  %v10429_v31 = vadd.f32 %v10428_v32, %v10344_v48  ;;  %v10512_v8 = vadd.f32 %v10511_v25, %v10427_v55 }
 0x630   : > { %v10585_v38 = vpop.f32.mrf.mxu1 }
 0x631   : > { %v10682_v45 = vpop.f32.mrf.mxu0  ;;  %v10586_v37 = vadd.f32 %v10585_v38, %v10505_v33  ;;  %v10514_v29 = vadd.f32 %v10513_v41, %v10429_v31 }
 0x632   : > { %v10587_v6 = vpop.f32.mrf.mxu1 }
 0x633   : > { %v10684_v61 = vpop.f32.mrf.mxu0  ;;  %v10588_v20 = vadd.f32 %v10587_v6, %v10507_v5  ;;  %v10683_v44 = vadd.f32 %v10682_v45, %v10586_v37 }
 0x634   : > { %v10592_v9 = vpop.f32.mrf.mxu1 }
 0x635   : > { %v10693_v39 = vpop.f32.mrf.mxu0  ;;  %v10593_v16 = vadd.f32 %v10592_v9, %v10512_v8  ;;  %v10685_v51 = vadd.f32 %v10684_v61, %v10588_v20 }
 0x636   : > { %v10594_v19 = vpop.f32.mrf.mxu1 }
 0x637   : > { %v10695_v27 = vpop.f32.mrf.mxu0  ;;  %v10595_v1 = vadd.f32 %v10594_v19, %v10514_v29  ;;  %v10694_v17 = vadd.f32 %v10693_v39, %v10593_v16 }
 0x638   : > { %v10775_v63 = vpop.f32.mrf.mxu1 }
 0x639   : > { %v10859_v56 = vpop.f32.mrf.mxu0  ;;  %v10776_v35 = vadd.f32 %v10775_v63, %v10683_v44  ;;  %v10696_v46 = vadd.f32 %v10695_v27, %v10595_v1 }
 0x63a   : > { %v10777_v7 = vpop.f32.mrf.mxu1 }
 0x63b   : > { %v10861_v52 = vpop.f32.mrf.mxu0  ;;  %v10778_v3 = vadd.f32 %v10777_v7, %v10685_v51  ;;  %v10860_v59 = vadd.f32 %v10859_v56, %v10776_v35 }
 0x63c   : > { %v10782_v13 = vpop.f32.mrf.mxu1 }
 0x63d   : > { %v10867_v58 = vpop.f32.mrf.mxu0  ;;  %v10783_v62 = vadd.f32 %v10782_v13, %v10694_v17  ;;  %v10862_v10 = vadd.f32 %v10861_v52, %v10778_v3 }
 0x63e   : > { %v10784_v15 = vpop.f32.mrf.mxu1 }
 0x63f   : > { %v10869_v11 = vpop.f32.mrf.mxu0  ;;  %v10785_v50 = vadd.f32 %v10784_v15, %v10696_v46  ;;  %v10868_v34 = vadd.f32 %v10867_v58, %v10783_v62 }
 0x640   : > { %v10943_v30 = vpop.f32.mrf.mxu1 }
 0x641   : > { %v11030_v40 = vpop.f32.mrf.mxu0  ;;  %v10944_v49 = vadd.f32 %v10943_v30, %v10860_v59  ;;  %v10870_v47 = vadd.f32 %v10869_v11, %v10785_v50 }
 0x642   : > { %v10945_v28 = vpop.f32.mrf.mxu1 }
 0x643   : > { %v11032_v23 = vpop.f32.mrf.mxu0  ;;  %v10946_v54 = vadd.f32 %v10945_v28, %v10862_v10  ;;  %v11031_v12 = vadd.f32 %v11030_v40, %v10944_v49 }
 0x644   : > { %v10952_v21 = vpop.f32.mrf.mxu1 }
 0x645   : > { %v11037_v60 = vpop.f32.mrf.mxu0  ;;  %v10953_v2 = vadd.f32 %v10952_v21, %v10868_v34  ;;  %v11033_v36 = vadd.f32 %v11032_v23, %v10946_v54 }
 0x646   : > { %v10954_v57 = vpop.f32.mrf.mxu1 }
 0x647   : > { %v10955_v43 = vadd.f32 %v10954_v57, %v10870_v47  ;;  %v11039_v32 = vpop.f32.mrf.mxu0  ;;  %v11038_v24 = vadd.f32 %v11037_v60, %v10953_v2 }
 0x648   : > { %v11111_v4 = vpop.f32.mrf.mxu1 }
 0x649   : > { %v11112_v25 = vadd.f32 %v11111_v4, %v11031_v12  ;;  %v11040_v53 = vadd.f32 %v11039_v32, %v10955_v43 }
 0x64a   : > { %v11113_v22 = vpop.f32.mrf.mxu1 }
 0x64b   : > { %v11135_v41 = vadd.f32 %v11128_v42, %v11112_v25  ;;  %v11114_v38 = vadd.f32 %v11113_v22, %v11033_v36 }
 0x64c   : > { %v11118_v0 = vpop.f32.mrf.mxu1 }
 0x64d   : > { %v11139_v26 = vmax.f32 %v11135_v41, 0.0  ;;  %v11136_v45 = vadd.f32 %v11128_v42, %v11114_v38  ;;  %v11119_v6 = vadd.f32 %v11118_v0, %v11038_v24 }
 0x64e   : > { %v11120_v14 = vpop.f32.mrf.mxu1 }
 0x64f   : > { %11143 = vst [vmem:[%s622_s25] sm:$0xff] %v11139_v26  ;;  %v11140_v61 = vmax.f32 %v11136_v45, 0.0  ;;  %v11137_v9 = vadd.f32 %v11133_v18, %v11119_v6  ;;  %v11121_v48 = vadd.f32 %v11120_v14, %v11040_v53 }
 0x651   : > { %11144 = vst [vmem:[%s622_s25 + $0x8] sm:$0xff] %v11140_v61  ;;  %v11141_v33 = vmax.f32 %v11137_v9, 0.0  ;;  %v11138_v55 = vadd.f32 %v11133_v18, %v11121_v48 }
 0x653   : > { %11145 = vst [vmem:[%s622_s25 + $0x10] sm:$0xff] %v11141_v33  ;;  %v11142_v39 = vmax.f32 %v11138_v55, 0.0 }
 0x655   : > { %11146 = vst [vmem:[%s622_s25 + $0x18] sm:$0xff] %v11142_v39 }
 0x656 PF: > { %s29_s0 = sadd.s32 1, %s11271_s0  }
 0x657   : > { %p26_p4 = scmp.ge.s32.totalorder %s29_s0, 4  }
 0x659   :  { %28 = sbr.rel (!%p26_p4) target bundleno = 5 (0x5), region = 141 }

</bundles_post_ra>
